<compile_context>
chip_gen: v7x
topology: tpu7x:2x2x1
jax: 0.10.0
libtpu: 0.0.40
codegen_flags: <defaults>
</compile_context>

<pallas_src>
import functools

import jax
import jax.numpy as jnp
import numpy as np
from jax.experimental import pallas as pl
from jax.experimental.pallas import tpu as pltpu

BN_EPS = 1e-5


# ----------------------------- Pallas kernels ------------------------------

def _mm_bn_relu_kernel(p_ref, w_ref, o_ref, *, phases, cout, inv_count):
    """(M, K)bf16 @ (K, phases*cout)bf16 -> BN(batch stats, per channel over all
    rows AND phases) -> ReLU -> bf16 (M, phases*cout)."""
    y = jnp.dot(p_ref[...], w_ref[...], preferred_element_type=jnp.float32)

    # One-pass batch statistics: column sums / sums of squares ...
    s1 = jnp.sum(y, axis=0, keepdims=True)              # (1, P*C) f32
    s2 = jnp.sum(y * y, axis=0, keepdims=True)          # (1, P*C) f32

    # ... folded across the P phase blocks onto the C真 channels with a tiled
    # identity matrix (MXU op; avoids lane-offset slicing / reshapes).
    eye = (jax.lax.broadcasted_iota(jnp.int32, (cout, cout), 0) ==
           jax.lax.broadcasted_iota(jnp.int32, (cout, cout), 1)).astype(jnp.float32)
    fold = jnp.concatenate([eye] * phases, axis=0) if phases > 1 else eye  # (P*C, C)

    mean = jnp.dot(s1, fold, preferred_element_type=jnp.float32) * inv_count  # (1, C)
    ex2 = jnp.dot(s2, fold, preferred_element_type=jnp.float32) * inv_count
    var = ex2 - mean * mean                             # biased batch variance
    inv_std = jax.lax.rsqrt(var + BN_EPS)               # EUP slot

    if phases > 1:
        mean_t = jnp.concatenate([mean] * phases, axis=-1)      # (1, P*C)
        istd_t = jnp.concatenate([inv_std] * phases, axis=-1)
    else:
        mean_t, istd_t = mean, inv_std

    o_ref[...] = jnp.maximum((y - mean_t) * istd_t, 0.0).astype(o_ref.dtype)


def _mm_bias_t_kernel(w_ref, p_ref, b_ref, o_ref):
    """Final conv layer, transposed orientation for a lane-dense store:
    (P*Cout, K)bf16 @ (K, M)bf16 + bias(P*Cout, 1) -> f32 (P*Cout, M)."""
    y = jnp.dot(w_ref[...], p_ref[...], preferred_element_type=jnp.float32)
    o_ref[...] = y + b_ref[...]


# ----------------------------- pallas wrappers ------------------------------

def _full_spec(shape):
    return pl.BlockSpec(shape, lambda i: (0,) * len(shape))


_CPARAMS = pltpu.CompilerParams(dimension_semantics=("arbitrary",))


def _mm_bn_relu(patches, w_mat, phases, cout):
    m = patches.shape[0]
    pc = phases * cout
    kern = functools.partial(_mm_bn_relu_kernel, phases=phases, cout=cout,
                             inv_count=1.0 / float(phases * m))
    return pl.pallas_call(
        kern,
        grid=(1,),
        in_specs=[_full_spec(patches.shape), _full_spec(w_mat.shape)],
        out_specs=_full_spec((m, pc)),
        out_shape=jax.ShapeDtypeStruct((m, pc), jnp.bfloat16),
        compiler_params=_CPARAMS,
    )(patches, w_mat)


def _mm_bias_t(w_t, patches_t, b_col):
    pc, _ = w_t.shape
    m = patches_t.shape[1]
    return pl.pallas_call(
        _mm_bias_t_kernel,
        grid=(1,),
        in_specs=[_full_spec(w_t.shape), _full_spec(patches_t.shape),
                  _full_spec(b_col.shape)],
        out_specs=_full_spec((pc, m)),
        out_shape=jax.ShapeDtypeStruct((pc, m), jnp.float32),
        compiler_params=_CPARAMS,
    )(w_t, patches_t, b_col)


# ------------------------------- glue (JAX) ---------------------------------

def _patches_1x3(x):
    """Compact patches for ConvT(k=(1,4), s=(1,2), p=(0,1)): 1x3 'same' window."""
    n, h, w, c = x.shape
    xp = jnp.pad(x, ((0, 0), (0, 0), (1, 1), (0, 0)))
    cols = [xp[:, :, j:j + w, :] for j in range(3)]
    return jnp.concatenate(cols, axis=-1).reshape(n * h * w, 3 * c)


def _patches_3x3(x):
    """Compact patches for ConvT(k=4, s=2, p=1): 3x3 'same' window."""
    n, h, w, c = x.shape
    xp = jnp.pad(x, ((0, 0), (1, 1), (1, 1), (0, 0)))
    cols = [xp[:, i:i + h, j:j + w, :] for i in range(3) for j in range(3)]
    return jnp.concatenate(cols, axis=-1).reshape(n * h * w, 9 * c)


def _shuffle_hw(y2d, n, h, w, c):
    """(n*h*w, 4c) with columns ordered (eh, ew, co) -> (n, 2h, 2w, c)."""
    y = y2d.reshape(n, h, w, 2, 2, c)
    y = jnp.transpose(y, (0, 1, 3, 2, 4, 5))
    return y.reshape(n, 2 * h, 2 * w, c)


def decoder_forward(z, params):
    """z: (N, latent_dim) f32 -> (N, 1, 32, 128) f32 (PyTorch NCHW output)."""
    w1, w2, w3, w4, w5, w6_t, b6 = params
    n = z.shape[0]

    # Layer 1: ConvT(latent -> 16nf, k=4, s=1, p=0) on a 1x1 map == dense matmul.
    c = w1.shape[1] // 16
    x = _mm_bn_relu(z.astype(jnp.bfloat16), w1, phases=16, cout=c)
    x = x.reshape(n, 4, 4, c)                                 # columns = (a, b, co)

    # Layers 2-3: ConvT(k=(1,4), s=(1,2), p=(0,1)) + BN + ReLU (width upsample x2).
    for w_mat in (w2, w3):
        _, h, wd, _ = x.shape
        c = w_mat.shape[1] // 2
        y = _mm_bn_relu(_patches_1x3(x), w_mat, phases=2, cout=c)
        x = y.reshape(n, h, 2 * wd, c)                        # width pixel-shuffle

    # Layers 4-5: ConvT(k=4, s=2, p=1) + BN + ReLU (HxW upsample x2).
    for w_mat in (w4, w5):
        _, h, wd, _ = x.shape
        c = w_mat.shape[1] // 4
        y = _mm_bn_relu(_patches_3x3(x), w_mat, phases=4, cout=c)
        x = _shuffle_hw(y, n, h, wd, c)

    # Layer 6: ConvT(k=4, s=2, p=1) + bias (no BN/ReLU), lane-dense (transposed).
    _, h, wd, _ = x.shape
    c = w6_t.shape[0] // 4
    p_t = jnp.transpose(_patches_3x3(x))                      # (K, M)
    y = _mm_bias_t(w6_t, p_t, b6)                             # (4*c, M) f32
    out = _shuffle_hw(jnp.transpose(y), n, h, wd, c)          # (N, 2h, 2w, c) NHWC
    return jnp.transpose(out, (0, 3, 1, 2))                   # NCHW like PyTorch


# -------------------------- parameter preparation ---------------------------

def prepare_params(ws_pt, bias):
    """Pack PyTorch ConvTranspose2d weights (Cin, Cout, KH, KW) into the
    sub-pixel-conv matmul layout used by the kernels (done once, outside jit)."""

    def dense_w(w):                              # layer 1 (k=4, s=1, p=0, 1x1 in)
        cin, cout = w.shape[0], w.shape[1]
        return jnp.transpose(w, (0, 2, 3, 1)).reshape(cin, 16 * cout)

    def width_w(w):                              # k=(1,4), s=(1,2), p=(0,1)
        cin, cout = w.shape[0], w.shape[1]
        wn = np.asarray(w, np.float32)
        k = np.zeros((3, cin, 2, cout), np.float32)
        for i_dw, dw in enumerate((-1, 0, 1)):
            for ew in range(2):
                b = ew + 1 - 2 * dw
                if 0 <= b < 4:
                    k[i_dw, :, ew, :] = wn[:, :, 0, b]
        return jnp.asarray(k.reshape(3 * cin, 2 * cout))

    def full_w(w):                               # k=4, s=2, p=1
        cin, cout = w.shape[0], w.shape[1]
        wn = np.asarray(w, np.float32)
        k = np.zeros((3, 3, cin, 2, 2, cout), np.float32)
        for i_dh, dh in enumerate((-1, 0, 1)):
            for i_dw, dw in enumerate((-1, 0, 1)):
                for eh in range(2):
                    a = eh + 1 - 2 * dh
                    if not (0 <= a < 4):
                        continue
                    for ew in range(2):
                        b = ew + 1 - 2 * dw
                        if not (0 <= b < 4):
                            continue
                        k[i_dh, i_dw, :, eh, ew, :] = wn[:, :, a, b]
        return jnp.asarray(k.reshape(9 * cin, 4 * cout))

    w1 = dense_w(ws_pt[0]).astype(jnp.bfloat16)
    w2 = width_w(ws_pt[1]).astype(jnp.bfloat16)
    w3 = width_w(ws_pt[2]).astype(jnp.bfloat16)
    w4 = full_w(ws_pt[3]).astype(jnp.bfloat16)
    w5 = full_w(ws_pt[4]).astype(jnp.bfloat16)
    w6_t = jnp.transpose(full_w(ws_pt[5])).astype(jnp.bfloat16)   # (4*Cout, 9*Cin)
    cout6 = ws_pt[5].shape[1]
    b_col = jnp.tile(jnp.asarray(bias, jnp.float32), 4).reshape(4 * cout6, 1)
    return (w1, w2, w3, w4, w5, w6_t, b_col)


# ------------------------------ pure-JAX ref ---------------------------------

def _conv_transpose_ref(x_nhwc, w_pt, stride, pad):
    kh, kw = w_pt.shape[2], w_pt.shape[3]
    w_hwio = jnp.transpose(w_pt[:, :, ::-1, ::-1], (2, 3, 0, 1))
    return jax.lax.conv_general_dilated(
        x_nhwc, w_hwio, window_strides=(1, 1),
        padding=[(kh - 1 - pad[0], kh - 1 - pad[0]),
                 (kw - 1 - pad[1], kw - 1 - pad[1])],
        lhs_dilation=stride,
        dimension_numbers=("NHWC", "HWIO", "NHWC"),
        precision=jax.lax.Precision.HIGHEST)


def _bn_relu_ref(y):
    m = jnp.mean(y, axis=(0, 1, 2), keepdims=True)
    v = jnp.mean(jnp.square(y - m), axis=(0, 1, 2), keepdims=True)
    return jnp.maximum((y - m) * jax.lax.rsqrt(v + BN_EPS), 0.0)


def decoder_ref(z, ws_pt, bias):
    n, latent = z.shape
    x = z.reshape(n, 1, 1, latent)                            # Unflatten (NHWC)
    x = _bn_relu_ref(_conv_transpose_ref(x, ws_pt[0], (1, 1), (0, 0)))
    x = _bn_relu_ref(_conv_transpose_ref(x, ws_pt[1], (1, 2), (0, 1)))
    x = _bn_relu_ref(_conv_transpose_ref(x, ws_pt[2], (1, 2), (0, 1)))
    x = _bn_relu_ref(_conv_transpose_ref(x, ws_pt[3], (2, 2), (1, 1)))
    x = _bn_relu_ref(_conv_transpose_ref(x, ws_pt[4], (2, 2), (1, 1)))
    y = _conv_transpose_ref(x, ws_pt[5], (2, 2), (1, 1)) + bias.reshape(1, 1, 1, -1)
    return jnp.transpose(y, (0, 3, 1, 2))                     # NCHW


# ---------------------------------- main -------------------------------------

if __name__ == "__main__":
    LATENT_DIM = 16
    NF = 8          # num_features kept small for the test (module default is 32)
    N = 2

    key = jax.random.PRNGKey(0)
    kz, *kw = jax.random.split(key, 8)
    z = jax.random.normal(kz, (N, LATENT_DIM), jnp.float32)

    # ConvTranspose2d weights in PyTorch layout (Cin, Cout, KH, KW) + final bias.
    specs = [
        (LATENT_DIM, 16 * NF, 4, 4),
        (16 * NF, 8 * NF, 1, 4),
        (8 * NF, 4 * NF, 1, 4),
        (4 * NF, 2 * NF, 4, 4),
        (2 * NF, NF, 4, 4),
        (NF, 1, 4, 4),
    ]
    ws = [0.05 * jax.random.normal(k, s, jnp.float32) for k, s in zip(kw[:6], specs)]
    bias = 0.05 * jax.random.normal(kw[6], (1,), jnp.float32)

    params = prepare_params(ws, bias)
    fwd = jax.jit(decoder_forward)
    out = jax.block_until_ready(fwd(z, params))
    assert out.shape == (N, 1, 32, 128), out.shape

    ref = decoder_ref(z, ws, bias)
    # bf16 MXU operands (f32 accumulation / f32 BN path) vs f32 reference.
    np.testing.assert_allclose(np.asarray(out), np.asarray(ref), rtol=1e-2, atol=1e-2)

    print("KERNEL_OK")
</pallas_src>

<mosaic_0001>
module attributes {stable_mosaic.version = 11 : i64} {
  func.func @_mm_bn_relu_kernel(%arg0: i32, %arg1: memref<2x16xbf16, #tpu.memory_space<vmem>>, %arg2: memref<16x2048xbf16, #tpu.memory_space<vmem>>, %arg3: memref<2x2048xbf16, #tpu.memory_space<vmem>>) attributes {dimension_semantics = [#tpu.dimension_semantics<arbitrary>], iteration_bounds = array<i64: 1>, scalar_prefetch = 0 : i64, scratch_operands = 0 : i64, tpu.core_type = #tpu.core_type<tc>, window_params = [{pipeline_mode = #tpu.pipeline_mode<synchronous>, transform_indices = @transform_0, window_bounds = array<i64: 2, 16>}, {pipeline_mode = #tpu.pipeline_mode<synchronous>, transform_indices = @transform_1, window_bounds = array<i64: 16, 2048>}, {pipeline_mode = #tpu.pipeline_mode<synchronous>, transform_indices = @transform_2, window_bounds = array<i64: 2, 2048>}]} {
    %c0 = arith.constant 0 : index
    %c0_0 = arith.constant 0 : index
    %0 = vector.load %arg1[%c0, %c0_0] : memref<2x16xbf16, #tpu.memory_space<vmem>>, vector<2x16xbf16>
    %c0_1 = arith.constant 0 : index
    %c0_2 = arith.constant 0 : index
    %1 = vector.load %arg2[%c0_1, %c0_2] : memref<16x2048xbf16, #tpu.memory_space<vmem>>, vector<16x2048xbf16>
    %cst = arith.constant dense<0.000000e+00> : vector<2x2048xf32>
    %2 = tpu.matmul %0, %1, %cst {dimension_numbers = #tpu.dot_dimension_numbers<[1], [0], [0], [1], [0, 0, 1, 1], [], []>} : vector<2x16xbf16>, vector<16x2048xbf16>, vector<2x2048xf32> -> vector<2x2048xf32>
    %cst_3 = arith.constant dense<0.000000e+00> : vector<2048xf32>
    %3 = vector.multi_reduction <add>, %2, %cst_3 [0] : vector<2x2048xf32> to vector<2048xf32>
    %4 = vector.shape_cast %3 : vector<2048xf32> to vector<1x2048xf32>
    %5 = arith.mulf %2, %2 : vector<2x2048xf32>
    %cst_4 = arith.constant dense<0.000000e+00> : vector<2048xf32>
    %6 = vector.multi_reduction <add>, %5, %cst_4 [0] : vector<2x2048xf32> to vector<2048xf32>
    %7 = vector.shape_cast %6 : vector<2048xf32> to vector<1x2048xf32>
    %8 = tpu.iota {dimensions = array<i32: 0>} : vector<128x128xi32>
    %9 = tpu.iota {dimensions = array<i32: 1>} : vector<128x128xi32>
    %10 = arith.cmpi eq, %8, %9 : vector<128x128xi32>
    %11 = arith.extui %10 : vector<128x128xi1> to vector<128x128xi32>
    %12 = arith.sitofp %11 : vector<128x128xi32> to vector<128x128xf32>
    %13 = tpu.concatenate %12, %12, %12, %12, %12, %12, %12, %12, %12, %12, %12, %12, %12, %12, %12, %12 in 0 : vector<128x128xf32>, vector<128x128xf32>, vector<128x128xf32>, vector<128x128xf32>, vector<128x128xf32>, vector<128x128xf32>, vector<128x128xf32>, vector<128x128xf32>, vector<128x128xf32>, vector<128x128xf32>, vector<128x128xf32>, vector<128x128xf32>, vector<128x128xf32>, vector<128x128xf32>, vector<128x128xf32>, vector<128x128xf32> -> vector<2048x128xf32>
    %cst_5 = arith.constant dense<0.000000e+00> : vector<1x128xf32>
    %14 = tpu.matmul %4, %13, %cst_5 {dimension_numbers = #tpu.dot_dimension_numbers<[1], [0], [0], [1], [0, 0, 1, 1], [], []>} : vector<1x2048xf32>, vector<2048x128xf32>, vector<1x128xf32> -> vector<1x128xf32>
    %cst_6 = arith.constant 3.125000e-02 : f32
    %15 = vector.broadcast %cst_6 : f32 to vector<1x128xf32>
    %16 = arith.mulf %14, %15 : vector<1x128xf32>
    %cst_7 = arith.constant dense<0.000000e+00> : vector<1x128xf32>
    %17 = tpu.matmul %7, %13, %cst_7 {dimension_numbers = #tpu.dot_dimension_numbers<[1], [0], [0], [1], [0, 0, 1, 1], [], []>} : vector<1x2048xf32>, vector<2048x128xf32>, vector<1x128xf32> -> vector<1x128xf32>
    %cst_8 = arith.constant 3.125000e-02 : f32
    %18 = vector.broadcast %cst_8 : f32 to vector<1x128xf32>
    %19 = arith.mulf %17, %18 : vector<1x128xf32>
    %20 = arith.mulf %16, %16 : vector<1x128xf32>
    %21 = arith.subf %19, %20 : vector<1x128xf32>
    %cst_9 = arith.constant 9.99999974E-6 : f32
    %22 = vector.broadcast %cst_9 : f32 to vector<1x128xf32>
    %23 = arith.addf %21, %22 : vector<1x128xf32>
    %24 = math.rsqrt %23 : vector<1x128xf32>
    %25 = tpu.concatenate %16, %16, %16, %16, %16, %16, %16, %16, %16, %16, %16, %16, %16, %16, %16, %16 in 1 : vector<1x128xf32>, vector<1x128xf32>, vector<1x128xf32>, vector<1x128xf32>, vector<1x128xf32>, vector<1x128xf32>, vector<1x128xf32>, vector<1x128xf32>, vector<1x128xf32>, vector<1x128xf32>, vector<1x128xf32>, vector<1x128xf32>, vector<1x128xf32>, vector<1x128xf32>, vector<1x128xf32>, vector<1x128xf32> -> vector<1x2048xf32>
    %26 = tpu.concatenate %24, %24, %24, %24, %24, %24, %24, %24, %24, %24, %24, %24, %24, %24, %24, %24 in 1 : vector<1x128xf32>, vector<1x128xf32>, vector<1x128xf32>, vector<1x128xf32>, vector<1x128xf32>, vector<1x128xf32>, vector<1x128xf32>, vector<1x128xf32>, vector<1x128xf32>, vector<1x128xf32>, vector<1x128xf32>, vector<1x128xf32>, vector<1x128xf32>, vector<1x128xf32>, vector<1x128xf32>, vector<1x128xf32> -> vector<1x2048xf32>
    %27 = vector.broadcast %25 : vector<1x2048xf32> to vector<2x2048xf32>
    %28 = arith.subf %2, %27 : vector<2x2048xf32>
    %29 = vector.broadcast %26 : vector<1x2048xf32> to vector<2x2048xf32>
    %30 = arith.mulf %28, %29 : vector<2x2048xf32>
    %cst_10 = arith.constant 0.000000e+00 : f32
    %31 = vector.broadcast %cst_10 : f32 to vector<2x2048xf32>
    %32 = arith.maximumf %30, %31 : vector<2x2048xf32>
    %33 = arith.truncf %32 : vector<2x2048xf32> to vector<2x2048xbf16>
    %c0_11 = arith.constant 0 : index
    %c0_12 = arith.constant 0 : index
    %34 = vector.load %arg3[%c0_11, %c0_12] : memref<2x2048xbf16, #tpu.memory_space<vmem>>, vector<2x2048xbf16>
    tpu.vector_store %arg3[%c0_11, %c0_12], %33 {strides = array<i32>} : memref<2x2048xbf16, #tpu.memory_space<vmem>>, vector<2x2048xbf16>,
    return
  }
  func.func @transform_0(%arg0: i32) -> (i32, i32) {
    %c0_i32 = arith.constant 0 : i32
    %c0_i32_0 = arith.constant 0 : i32
    %c0_i32_1 = arith.constant 0 : i32
    return %c0_i32, %c0_i32_0 : i32, i32
  }
  func.func @transform_1(%arg0: i32) -> (i32, i32) {
    %c0_i32 = arith.constant 0 : i32
    %c0_i32_0 = arith.constant 0 : i32
    %c0_i32_1 = arith.constant 0 : i32
    return %c0_i32, %c0_i32_0 : i32, i32
  }
  func.func @transform_2(%arg0: i32) -> (i32, i32) {
    %c0_i32 = arith.constant 0 : i32
    %c0_i32_0 = arith.constant 0 : i32
    %c0_i32_1 = arith.constant 0 : i32
    return %c0_i32, %c0_i32_0 : i32, i32
  }
}

module attributes {stable_mosaic.version = 11 : i64} {
  func.func @_mm_bn_relu_kernel(%arg0: i32, %arg1: memref<32x384xbf16, #tpu.memory_space<vmem>>, %arg2: memref<384x128xbf16, #tpu.memory_space<vmem>>, %arg3: memref<32x128xbf16, #tpu.memory_space<vmem>>) attributes {dimension_semantics = [#tpu.dimension_semantics<arbitrary>], iteration_bounds = array<i64: 1>, scalar_prefetch = 0 : i64, scratch_operands = 0 : i64, tpu.core_type = #tpu.core_type<tc>, window_params = [{pipeline_mode = #tpu.pipeline_mode<synchronous>, transform_indices = @transform_0, window_bounds = array<i64: 32, 384>}, {pipeline_mode = #tpu.pipeline_mode<synchronous>, transform_indices = @transform_1, window_bounds = array<i64: 384, 128>}, {pipeline_mode = #tpu.pipeline_mode<synchronous>, transform_indices = @transform_2, window_bounds = array<i64: 32, 128>}]} {
    %c0 = arith.constant 0 : index
    %c0_0 = arith.constant 0 : index
    %0 = vector.load %arg1[%c0, %c0_0] : memref<32x384xbf16, #tpu.memory_space<vmem>>, vector<32x384xbf16>
    %c0_1 = arith.constant 0 : index
    %c0_2 = arith.constant 0 : index
    %1 = vector.load %arg2[%c0_1, %c0_2] : memref<384x128xbf16, #tpu.memory_space<vmem>>, vector<384x128xbf16>
    %cst = arith.constant dense<0.000000e+00> : vector<32x128xf32>
    %2 = tpu.matmul %0, %1, %cst {dimension_numbers = #tpu.dot_dimension_numbers<[1], [0], [0], [1], [0, 0, 1, 1], [], []>} : vector<32x384xbf16>, vector<384x128xbf16>, vector<32x128xf32> -> vector<32x128xf32>
    %cst_3 = arith.constant dense<0.000000e+00> : vector<128xf32>
    %3 = vector.multi_reduction <add>, %2, %cst_3 [0] : vector<32x128xf32> to vector<128xf32>
    %4 = vector.shape_cast %3 : vector<128xf32> to vector<1x128xf32>
    %5 = arith.mulf %2, %2 : vector<32x128xf32>
    %cst_4 = arith.constant dense<0.000000e+00> : vector<128xf32>
    %6 = vector.multi_reduction <add>, %5, %cst_4 [0] : vector<32x128xf32> to vector<128xf32>
    %7 = vector.shape_cast %6 : vector<128xf32> to vector<1x128xf32>
    %8 = tpu.iota {dimensions = array<i32: 0>} : vector<64x64xi32>
    %9 = tpu.iota {dimensions = array<i32: 1>} : vector<64x64xi32>
    %10 = arith.cmpi eq, %8, %9 : vector<64x64xi32>
    %11 = arith.extui %10 : vector<64x64xi1> to vector<64x64xi32>
    %12 = arith.sitofp %11 : vector<64x64xi32> to vector<64x64xf32>
    %13 = tpu.concatenate %12, %12 in 0 : vector<64x64xf32>, vector<64x64xf32> -> vector<128x64xf32>
    %cst_5 = arith.constant dense<0.000000e+00> : vector<1x64xf32>
    %14 = tpu.matmul %4, %13, %cst_5 {dimension_numbers = #tpu.dot_dimension_numbers<[1], [0], [0], [1], [0, 0, 1, 1], [], []>} : vector<1x128xf32>, vector<128x64xf32>, vector<1x64xf32> -> vector<1x64xf32>
    %cst_6 = arith.constant 1.562500e-02 : f32
    %15 = vector.broadcast %cst_6 : f32 to vector<1x64xf32>
    %16 = arith.mulf %14, %15 : vector<1x64xf32>
    %cst_7 = arith.constant dense<0.000000e+00> : vector<1x64xf32>
    %17 = tpu.matmul %7, %13, %cst_7 {dimension_numbers = #tpu.dot_dimension_numbers<[1], [0], [0], [1], [0, 0, 1, 1], [], []>} : vector<1x128xf32>, vector<128x64xf32>, vector<1x64xf32> -> vector<1x64xf32>
    %cst_8 = arith.constant 1.562500e-02 : f32
    %18 = vector.broadcast %cst_8 : f32 to vector<1x64xf32>
    %19 = arith.mulf %17, %18 : vector<1x64xf32>
    %20 = arith.mulf %16, %16 : vector<1x64xf32>
    %21 = arith.subf %19, %20 : vector<1x64xf32>
    %cst_9 = arith.constant 9.99999974E-6 : f32
    %22 = vector.broadcast %cst_9 : f32 to vector<1x64xf32>
    %23 = arith.addf %21, %22 : vector<1x64xf32>
    %24 = math.rsqrt %23 : vector<1x64xf32>
    %25 = tpu.concatenate %16, %16 in 1 : vector<1x64xf32>, vector<1x64xf32> -> vector<1x128xf32>
    %26 = tpu.concatenate %24, %24 in 1 : vector<1x64xf32>, vector<1x64xf32> -> vector<1x128xf32>
    %27 = vector.broadcast %25 : vector<1x128xf32> to vector<32x128xf32>
    %28 = arith.subf %2, %27 : vector<32x128xf32>
    %29 = vector.broadcast %26 : vector<1x128xf32> to vector<32x128xf32>
    %30 = arith.mulf %28, %29 : vector<32x128xf32>
    %cst_10 = arith.constant 0.000000e+00 : f32
    %31 = vector.broadcast %cst_10 : f32 to vector<32x128xf32>
    %32 = arith.maximumf %30, %31 : vector<32x128xf32>
    %33 = arith.truncf %32 : vector<32x128xf32> to vector<32x128xbf16>
    %c0_11 = arith.constant 0 : index
    %c0_12 = arith.constant 0 : index
    %34 = vector.load %arg3[%c0_11, %c0_12] : memref<32x128xbf16, #tpu.memory_space<vmem>>, vector<32x128xbf16>
    tpu.vector_store %arg3[%c0_11, %c0_12], %33 {strides = array<i32>} : memref<32x128xbf16, #tpu.memory_space<vmem>>, vector<32x128xbf16>,
    return
  }
  func.func @transform_0(%arg0: i32) -> (i32, i32) {
    %c0_i32 = arith.constant 0 : i32
    %c0_i32_0 = arith.constant 0 : i32
    %c0_i32_1 = arith.constant 0 : i32
    return %c0_i32, %c0_i32_0 : i32, i32
  }
  func.func @transform_1(%arg0: i32) -> (i32, i32) {
    %c0_i32 = arith.constant 0 : i32
    %c0_i32_0 = arith.constant 0 : i32
    %c0_i32_1 = arith.constant 0 : i32
    return %c0_i32, %c0_i32_0 : i32, i32
  }
  func.func @transform_2(%arg0: i32) -> (i32, i32) {
    %c0_i32 = arith.constant 0 : i32
    %c0_i32_0 = arith.constant 0 : i32
    %c0_i32_1 = arith.constant 0 : i32
    return %c0_i32, %c0_i32_0 : i32, i32
  }
}

module attributes {stable_mosaic.version = 11 : i64} {
  func.func @_mm_bn_relu_kernel(%arg0: i32, %arg1: memref<64x192xbf16, #tpu.memory_space<vmem>>, %arg2: memref<192x64xbf16, #tpu.memory_space<vmem>>, %arg3: memref<64x64xbf16, #tpu.memory_space<vmem>>) attributes {dimension_semantics = [#tpu.dimension_semantics<arbitrary>], iteration_bounds = array<i64: 1>, scalar_prefetch = 0 : i64, scratch_operands = 0 : i64, tpu.core_type = #tpu.core_type<tc>, window_params = [{pipeline_mode = #tpu.pipeline_mode<synchronous>, transform_indices = @transform_0, window_bounds = array<i64: 64, 192>}, {pipeline_mode = #tpu.pipeline_mode<synchronous>, transform_indices = @transform_1, window_bounds = array<i64: 192, 64>}, {pipeline_mode = #tpu.pipeline_mode<synchronous>, transform_indices = @transform_2, window_bounds = array<i64: 64, 64>}]} {
    %c0 = arith.constant 0 : index
    %c0_0 = arith.constant 0 : index
    %0 = vector.load %arg1[%c0, %c0_0] : memref<64x192xbf16, #tpu.memory_space<vmem>>, vector<64x192xbf16>
    %c0_1 = arith.constant 0 : index
    %c0_2 = arith.constant 0 : index
    %1 = vector.load %arg2[%c0_1, %c0_2] : memref<192x64xbf16, #tpu.memory_space<vmem>>, vector<192x64xbf16>
    %cst = arith.constant dense<0.000000e+00> : vector<64x64xf32>
    %2 = tpu.matmul %0, %1, %cst {dimension_numbers = #tpu.dot_dimension_numbers<[1], [0], [0], [1], [0, 0, 1, 1], [], []>} : vector<64x192xbf16>, vector<192x64xbf16>, vector<64x64xf32> -> vector<64x64xf32>
    %cst_3 = arith.constant dense<0.000000e+00> : vector<64xf32>
    %3 = vector.multi_reduction <add>, %2, %cst_3 [0] : vector<64x64xf32> to vector<64xf32>
    %4 = vector.shape_cast %3 : vector<64xf32> to vector<1x64xf32>
    %5 = arith.mulf %2, %2 : vector<64x64xf32>
    %cst_4 = arith.constant dense<0.000000e+00> : vector<64xf32>
    %6 = vector.multi_reduction <add>, %5, %cst_4 [0] : vector<64x64xf32> to vector<64xf32>
    %7 = vector.shape_cast %6 : vector<64xf32> to vector<1x64xf32>
    %8 = tpu.iota {dimensions = array<i32: 0>} : vector<32x32xi32>
    %9 = tpu.iota {dimensions = array<i32: 1>} : vector<32x32xi32>
    %10 = arith.cmpi eq, %8, %9 : vector<32x32xi32>
    %11 = arith.extui %10 : vector<32x32xi1> to vector<32x32xi32>
    %12 = arith.sitofp %11 : vector<32x32xi32> to vector<32x32xf32>
    %13 = tpu.concatenate %12, %12 in 0 : vector<32x32xf32>, vector<32x32xf32> -> vector<64x32xf32>
    %cst_5 = arith.constant dense<0.000000e+00> : vector<1x32xf32>
    %14 = tpu.matmul %4, %13, %cst_5 {dimension_numbers = #tpu.dot_dimension_numbers<[1], [0], [0], [1], [0, 0, 1, 1], [], []>} : vector<1x64xf32>, vector<64x32xf32>, vector<1x32xf32> -> vector<1x32xf32>
    %cst_6 = arith.constant 7.812500e-03 : f32
    %15 = vector.broadcast %cst_6 : f32 to vector<1x32xf32>
    %16 = arith.mulf %14, %15 : vector<1x32xf32>
    %cst_7 = arith.constant dense<0.000000e+00> : vector<1x32xf32>
    %17 = tpu.matmul %7, %13, %cst_7 {dimension_numbers = #tpu.dot_dimension_numbers<[1], [0], [0], [1], [0, 0, 1, 1], [], []>} : vector<1x64xf32>, vector<64x32xf32>, vector<1x32xf32> -> vector<1x32xf32>
    %cst_8 = arith.constant 7.812500e-03 : f32
    %18 = vector.broadcast %cst_8 : f32 to vector<1x32xf32>
    %19 = arith.mulf %17, %18 : vector<1x32xf32>
    %20 = arith.mulf %16, %16 : vector<1x32xf32>
    %21 = arith.subf %19, %20 : vector<1x32xf32>
    %cst_9 = arith.constant 9.99999974E-6 : f32
    %22 = vector.broadcast %cst_9 : f32 to vector<1x32xf32>
    %23 = arith.addf %21, %22 : vector<1x32xf32>
    %24 = math.rsqrt %23 : vector<1x32xf32>
    %25 = tpu.concatenate %16, %16 in 1 : vector<1x32xf32>, vector<1x32xf32> -> vector<1x64xf32>
    %26 = tpu.concatenate %24, %24 in 1 : vector<1x32xf32>, vector<1x32xf32> -> vector<1x64xf32>
    %27 = vector.broadcast %25 : vector<1x64xf32> to vector<64x64xf32>
    %28 = arith.subf %2, %27 : vector<64x64xf32>
    %29 = vector.broadcast %26 : vector<1x64xf32> to vector<64x64xf32>
    %30 = arith.mulf %28, %29 : vector<64x64xf32>
    %cst_10 = arith.constant 0.000000e+00 : f32
    %31 = vector.broadcast %cst_10 : f32 to vector<64x64xf32>
    %32 = arith.maximumf %30, %31 : vector<64x64xf32>
    %33 = arith.truncf %32 : vector<64x64xf32> to vector<64x64xbf16>
    %c0_11 = arith.constant 0 : index
    %c0_12 = arith.constant 0 : index
    %34 = vector.load %arg3[%c0_11, %c0_12] : memref<64x64xbf16, #tpu.memory_space<vmem>>, vector<64x64xbf16>
    tpu.vector_store %arg3[%c0_11, %c0_12], %33 {strides = array<i32>} : memref<64x64xbf16, #tpu.memory_space<vmem>>, vector<64x64xbf16>,
    return
  }
  func.func @transform_0(%arg0: i32) -> (i32, i32) {
    %c0_i32 = arith.constant 0 : i32
    %c0_i32_0 = arith.constant 0 : i32
    %c0_i32_1 = arith.constant 0 : i32
    return %c0_i32, %c0_i32_0 : i32, i32
  }
  func.func @transform_1(%arg0: i32) -> (i32, i32) {
    %c0_i32 = arith.constant 0 : i32
    %c0_i32_0 = arith.constant 0 : i32
    %c0_i32_1 = arith.constant 0 : i32
    return %c0_i32, %c0_i32_0 : i32, i32
  }
  func.func @transform_2(%arg0: i32) -> (i32, i32) {
    %c0_i32 = arith.constant 0 : i32
    %c0_i32_0 = arith.constant 0 : i32
    %c0_i32_1 = arith.constant 0 : i32
    return %c0_i32, %c0_i32_0 : i32, i32
  }
}

module attributes {stable_mosaic.version = 11 : i64} {
  func.func @_mm_bn_relu_kernel(%arg0: i32, %arg1: memref<128x288xbf16, #tpu.memory_space<vmem>>, %arg2: memref<288x64xbf16, #tpu.memory_space<vmem>>, %arg3: memref<128x64xbf16, #tpu.memory_space<vmem>>) attributes {dimension_semantics = [#tpu.dimension_semantics<arbitrary>], iteration_bounds = array<i64: 1>, scalar_prefetch = 0 : i64, scratch_operands = 0 : i64, tpu.core_type = #tpu.core_type<tc>, window_params = [{pipeline_mode = #tpu.pipeline_mode<synchronous>, transform_indices = @transform_0, window_bounds = array<i64: 128, 288>}, {pipeline_mode = #tpu.pipeline_mode<synchronous>, transform_indices = @transform_1, window_bounds = array<i64: 288, 64>}, {pipeline_mode = #tpu.pipeline_mode<synchronous>, transform_indices = @transform_2, window_bounds = array<i64: 128, 64>}]} {
    %c0 = arith.constant 0 : index
    %c0_0 = arith.constant 0 : index
    %0 = vector.load %arg1[%c0, %c0_0] : memref<128x288xbf16, #tpu.memory_space<vmem>>, vector<128x288xbf16>
    %c0_1 = arith.constant 0 : index
    %c0_2 = arith.constant 0 : index
    %1 = vector.load %arg2[%c0_1, %c0_2] : memref<288x64xbf16, #tpu.memory_space<vmem>>, vector<288x64xbf16>
    %cst = arith.constant dense<0.000000e+00> : vector<128x64xf32>
    %2 = tpu.matmul %0, %1, %cst {dimension_numbers = #tpu.dot_dimension_numbers<[1], [0], [0], [1], [0, 0, 1, 1], [], []>} : vector<128x288xbf16>, vector<288x64xbf16>, vector<128x64xf32> -> vector<128x64xf32>
    %cst_3 = arith.constant dense<0.000000e+00> : vector<64xf32>
    %3 = vector.multi_reduction <add>, %2, %cst_3 [0] : vector<128x64xf32> to vector<64xf32>
    %4 = vector.shape_cast %3 : vector<64xf32> to vector<1x64xf32>
    %5 = arith.mulf %2, %2 : vector<128x64xf32>
    %cst_4 = arith.constant dense<0.000000e+00> : vector<64xf32>
    %6 = vector.multi_reduction <add>, %5, %cst_4 [0] : vector<128x64xf32> to vector<64xf32>
    %7 = vector.shape_cast %6 : vector<64xf32> to vector<1x64xf32>
    %8 = tpu.iota {dimensions = array<i32: 0>} : vector<16x16xi32>
    %9 = tpu.iota {dimensions = array<i32: 1>} : vector<16x16xi32>
    %10 = arith.cmpi eq, %8, %9 : vector<16x16xi32>
    %11 = arith.extui %10 : vector<16x16xi1> to vector<16x16xi32>
    %12 = arith.sitofp %11 : vector<16x16xi32> to vector<16x16xf32>
    %13 = tpu.concatenate %12, %12, %12, %12 in 0 : vector<16x16xf32>, vector<16x16xf32>, vector<16x16xf32>, vector<16x16xf32> -> vector<64x16xf32>
    %cst_5 = arith.constant dense<0.000000e+00> : vector<1x16xf32>
    %14 = tpu.matmul %4, %13, %cst_5 {dimension_numbers = #tpu.dot_dimension_numbers<[1], [0], [0], [1], [0, 0, 1, 1], [], []>} : vector<1x64xf32>, vector<64x16xf32>, vector<1x16xf32> -> vector<1x16xf32>
    %cst_6 = arith.constant 0.001953125 : f32
    %15 = vector.broadcast %cst_6 : f32 to vector<1x16xf32>
    %16 = arith.mulf %14, %15 : vector<1x16xf32>
    %cst_7 = arith.constant dense<0.000000e+00> : vector<1x16xf32>
    %17 = tpu.matmul %7, %13, %cst_7 {dimension_numbers = #tpu.dot_dimension_numbers<[1], [0], [0], [1], [0, 0, 1, 1], [], []>} : vector<1x64xf32>, vector<64x16xf32>, vector<1x16xf32> -> vector<1x16xf32>
    %cst_8 = arith.constant 0.001953125 : f32
    %18 = vector.broadcast %cst_8 : f32 to vector<1x16xf32>
    %19 = arith.mulf %17, %18 : vector<1x16xf32>
    %20 = arith.mulf %16, %16 : vector<1x16xf32>
    %21 = arith.subf %19, %20 : vector<1x16xf32>
    %cst_9 = arith.constant 9.99999974E-6 : f32
    %22 = vector.broadcast %cst_9 : f32 to vector<1x16xf32>
    %23 = arith.addf %21, %22 : vector<1x16xf32>
    %24 = math.rsqrt %23 : vector<1x16xf32>
    %25 = tpu.concatenate %16, %16, %16, %16 in 1 : vector<1x16xf32>, vector<1x16xf32>, vector<1x16xf32>, vector<1x16xf32> -> vector<1x64xf32>
    %26 = tpu.concatenate %24, %24, %24, %24 in 1 : vector<1x16xf32>, vector<1x16xf32>, vector<1x16xf32>, vector<1x16xf32> -> vector<1x64xf32>
    %27 = vector.broadcast %25 : vector<1x64xf32> to vector<128x64xf32>
    %28 = arith.subf %2, %27 : vector<128x64xf32>
    %29 = vector.broadcast %26 : vector<1x64xf32> to vector<128x64xf32>
    %30 = arith.mulf %28, %29 : vector<128x64xf32>
    %cst_10 = arith.constant 0.000000e+00 : f32
    %31 = vector.broadcast %cst_10 : f32 to vector<128x64xf32>
    %32 = arith.maximumf %30, %31 : vector<128x64xf32>
    %33 = arith.truncf %32 : vector<128x64xf32> to vector<128x64xbf16>
    %c0_11 = arith.constant 0 : index
    %c0_12 = arith.constant 0 : index
    %34 = vector.load %arg3[%c0_11, %c0_12] : memref<128x64xbf16, #tpu.memory_space<vmem>>, vector<128x64xbf16>
    tpu.vector_store %arg3[%c0_11, %c0_12], %33 {strides = array<i32>} : memref<128x64xbf16, #tpu.memory_space<vmem>>, vector<128x64xbf16>,
    return
  }
  func.func @transform_0(%arg0: i32) -> (i32, i32) {
    %c0_i32 = arith.constant 0 : i32
    %c0_i32_0 = arith.constant 0 : i32
    %c0_i32_1 = arith.constant 0 : i32
    return %c0_i32, %c0_i32_0 : i32, i32
  }
  func.func @transform_1(%arg0: i32) -> (i32, i32) {
    %c0_i32 = arith.constant 0 : i32
    %c0_i32_0 = arith.constant 0 : i32
    %c0_i32_1 = arith.constant 0 : i32
    return %c0_i32, %c0_i32_0 : i32, i32
  }
  func.func @transform_2(%arg0: i32) -> (i32, i32) {
    %c0_i32 = arith.constant 0 : i32
    %c0_i32_0 = arith.constant 0 : i32
    %c0_i32_1 = arith.constant 0 : i32
    return %c0_i32, %c0_i32_0 : i32, i32
  }
}

module attributes {stable_mosaic.version = 11 : i64} {
  func.func @_mm_bn_relu_kernel(%arg0: i32, %arg1: memref<512x144xbf16, #tpu.memory_space<vmem>>, %arg2: memref<144x32xbf16, #tpu.memory_space<vmem>>, %arg3: memref<512x32xbf16, #tpu.memory_space<vmem>>) attributes {dimension_semantics = [#tpu.dimension_semantics<arbitrary>], iteration_bounds = array<i64: 1>, scalar_prefetch = 0 : i64, scratch_operands = 0 : i64, tpu.core_type = #tpu.core_type<tc>, window_params = [{pipeline_mode = #tpu.pipeline_mode<synchronous>, transform_indices = @transform_0, window_bounds = array<i64: 512, 144>}, {pipeline_mode = #tpu.pipeline_mode<synchronous>, transform_indices = @transform_1, window_bounds = array<i64: 144, 32>}, {pipeline_mode = #tpu.pipeline_mode<synchronous>, transform_indices = @transform_2, window_bounds = array<i64: 512, 32>}]} {
    %c0 = arith.constant 0 : index
    %c0_0 = arith.constant 0 : index
    %0 = vector.load %arg1[%c0, %c0_0] : memref<512x144xbf16, #tpu.memory_space<vmem>>, vector<512x144xbf16>
    %c0_1 = arith.constant 0 : index
    %c0_2 = arith.constant 0 : index
    %1 = vector.load %arg2[%c0_1, %c0_2] : memref<144x32xbf16, #tpu.memory_space<vmem>>, vector<144x32xbf16>
    %cst = arith.constant dense<0.000000e+00> : vector<512x32xf32>
    %2 = tpu.matmul %0, %1, %cst {dimension_numbers = #tpu.dot_dimension_numbers<[1], [0], [0], [1], [0, 0, 1, 1], [], []>} : vector<512x144xbf16>, vector<144x32xbf16>, vector<512x32xf32> -> vector<512x32xf32>
    %cst_3 = arith.constant dense<0.000000e+00> : vector<32xf32>
    %3 = vector.multi_reduction <add>, %2, %cst_3 [0] : vector<512x32xf32> to vector<32xf32>
    %4 = vector.shape_cast %3 : vector<32xf32> to vector<1x32xf32>
    %5 = arith.mulf %2, %2 : vector<512x32xf32>
    %cst_4 = arith.constant dense<0.000000e+00> : vector<32xf32>
    %6 = vector.multi_reduction <add>, %5, %cst_4 [0] : vector<512x32xf32> to vector<32xf32>
    %7 = vector.shape_cast %6 : vector<32xf32> to vector<1x32xf32>
    %8 = tpu.iota {dimensions = array<i32: 0>} : vector<8x8xi32>
    %9 = tpu.iota {dimensions = array<i32: 1>} : vector<8x8xi32>
    %10 = arith.cmpi eq, %8, %9 : vector<8x8xi32>
    %11 = arith.extui %10 : vector<8x8xi1> to vector<8x8xi32>
    %12 = arith.sitofp %11 : vector<8x8xi32> to vector<8x8xf32>
    %13 = tpu.concatenate %12, %12, %12, %12 in 0 : vector<8x8xf32>, vector<8x8xf32>, vector<8x8xf32>, vector<8x8xf32> -> vector<32x8xf32>
    %cst_5 = arith.constant dense<0.000000e+00> : vector<1x8xf32>
    %14 = tpu.matmul %4, %13, %cst_5 {dimension_numbers = #tpu.dot_dimension_numbers<[1], [0], [0], [1], [0, 0, 1, 1], [], []>} : vector<1x32xf32>, vector<32x8xf32>, vector<1x8xf32> -> vector<1x8xf32>
    %cst_6 = arith.constant 4.8828125E-4 : f32
    %15 = vector.broadcast %cst_6 : f32 to vector<1x8xf32>
    %16 = arith.mulf %14, %15 : vector<1x8xf32>
    %cst_7 = arith.constant dense<0.000000e+00> : vector<1x8xf32>
    %17 = tpu.matmul %7, %13, %cst_7 {dimension_numbers = #tpu.dot_dimension_numbers<[1], [0], [0], [1], [0, 0, 1, 1], [], []>} : vector<1x32xf32>, vector<32x8xf32>, vector<1x8xf32> -> vector<1x8xf32>
    %cst_8 = arith.constant 4.8828125E-4 : f32
    %18 = vector.broadcast %cst_8 : f32 to vector<1x8xf32>
    %19 = arith.mulf %17, %18 : vector<1x8xf32>
    %20 = arith.mulf %16, %16 : vector<1x8xf32>
    %21 = arith.subf %19, %20 : vector<1x8xf32>
    %cst_9 = arith.constant 9.99999974E-6 : f32
    %22 = vector.broadcast %cst_9 : f32 to vector<1x8xf32>
    %23 = arith.addf %21, %22 : vector<1x8xf32>
    %24 = math.rsqrt %23 : vector<1x8xf32>
    %25 = tpu.concatenate %16, %16, %16, %16 in 1 : vector<1x8xf32>, vector<1x8xf32>, vector<1x8xf32>, vector<1x8xf32> -> vector<1x32xf32>
    %26 = tpu.concatenate %24, %24, %24, %24 in 1 : vector<1x8xf32>, vector<1x8xf32>, vector<1x8xf32>, vector<1x8xf32> -> vector<1x32xf32>
    %27 = vector.broadcast %25 : vector<1x32xf32> to vector<512x32xf32>
    %28 = arith.subf %2, %27 : vector<512x32xf32>
    %29 = vector.broadcast %26 : vector<1x32xf32> to vector<512x32xf32>
    %30 = arith.mulf %28, %29 : vector<512x32xf32>
    %cst_10 = arith.constant 0.000000e+00 : f32
    %31 = vector.broadcast %cst_10 : f32 to vector<512x32xf32>
    %32 = arith.maximumf %30, %31 : vector<512x32xf32>
    %33 = arith.truncf %32 : vector<512x32xf32> to vector<512x32xbf16>
    %c0_11 = arith.constant 0 : index
    %c0_12 = arith.constant 0 : index
    %34 = vector.load %arg3[%c0_11, %c0_12] : memref<512x32xbf16, #tpu.memory_space<vmem>>, vector<512x32xbf16>
    tpu.vector_store %arg3[%c0_11, %c0_12], %33 {strides = array<i32>} : memref<512x32xbf16, #tpu.memory_space<vmem>>, vector<512x32xbf16>,
    return
  }
  func.func @transform_0(%arg0: i32) -> (i32, i32) {
    %c0_i32 = arith.constant 0 : i32
    %c0_i32_0 = arith.constant 0 : i32
    %c0_i32_1 = arith.constant 0 : i32
    return %c0_i32, %c0_i32_0 : i32, i32
  }
  func.func @transform_1(%arg0: i32) -> (i32, i32) {
    %c0_i32 = arith.constant 0 : i32
    %c0_i32_0 = arith.constant 0 : i32
    %c0_i32_1 = arith.constant 0 : i32
    return %c0_i32, %c0_i32_0 : i32, i32
  }
  func.func @transform_2(%arg0: i32) -> (i32, i32) {
    %c0_i32 = arith.constant 0 : i32
    %c0_i32_0 = arith.constant 0 : i32
    %c0_i32_1 = arith.constant 0 : i32
    return %c0_i32, %c0_i32_0 : i32, i32
  }
}

module attributes {stable_mosaic.version = 11 : i64} {
  func.func @_mm_bias_t_kernel(%arg0: i32, %arg1: memref<4x72xbf16, #tpu.memory_space<vmem>>, %arg2: memref<72x2048xbf16, #tpu.memory_space<vmem>>, %arg3: memref<4x1xf32, #tpu.memory_space<vmem>>, %arg4: memref<4x2048xf32, #tpu.memory_space<vmem>>) attributes {dimension_semantics = [#tpu.dimension_semantics<arbitrary>], iteration_bounds = array<i64: 1>, scalar_prefetch = 0 : i64, scratch_operands = 0 : i64, tpu.core_type = #tpu.core_type<tc>, window_params = [{pipeline_mode = #tpu.pipeline_mode<synchronous>, transform_indices = @transform_0, window_bounds = array<i64: 4, 72>}, {pipeline_mode = #tpu.pipeline_mode<synchronous>, transform_indices = @transform_1, window_bounds = array<i64: 72, 2048>}, {pipeline_mode = #tpu.pipeline_mode<synchronous>, transform_indices = @transform_2, window_bounds = array<i64: 4, 1>}, {pipeline_mode = #tpu.pipeline_mode<synchronous>, transform_indices = @transform_3, window_bounds = array<i64: 4, 2048>}]} {
    %c0 = arith.constant 0 : index
    %c0_0 = arith.constant 0 : index
    %0 = vector.load %arg1[%c0, %c0_0] : memref<4x72xbf16, #tpu.memory_space<vmem>>, vector<4x72xbf16>
    %c0_1 = arith.constant 0 : index
    %c0_2 = arith.constant 0 : index
    %1 = vector.load %arg2[%c0_1, %c0_2] : memref<72x2048xbf16, #tpu.memory_space<vmem>>, vector<72x2048xbf16>
    %cst = arith.constant dense<0.000000e+00> : vector<4x2048xf32>
    %2 = tpu.matmul %0, %1, %cst {dimension_numbers = #tpu.dot_dimension_numbers<[1], [0], [0], [1], [0, 0, 1, 1], [], []>} : vector<4x72xbf16>, vector<72x2048xbf16>, vector<4x2048xf32> -> vector<4x2048xf32>
    %c0_3 = arith.constant 0 : index
    %c0_4 = arith.constant 0 : index
    %3 = vector.load %arg3[%c0_3, %c0_4] : memref<4x1xf32, #tpu.memory_space<vmem>>, vector<4x1xf32>
    %4 = vector.broadcast %3 : vector<4x1xf32> to vector<4x2048xf32>
    %5 = arith.addf %2, %4 : vector<4x2048xf32>
    %c0_5 = arith.constant 0 : index
    %c0_6 = arith.constant 0 : index
    %6 = vector.load %arg4[%c0_5, %c0_6] : memref<4x2048xf32, #tpu.memory_space<vmem>>, vector<4x2048xf32>
    tpu.vector_store %arg4[%c0_5, %c0_6], %5 {strides = array<i32>} : memref<4x2048xf32, #tpu.memory_space<vmem>>, vector<4x2048xf32>,
    return
  }
  func.func @transform_0(%arg0: i32) -> (i32, i32) {
    %c0_i32 = arith.constant 0 : i32
    %c0_i32_0 = arith.constant 0 : i32
    %c0_i32_1 = arith.constant 0 : i32
    return %c0_i32, %c0_i32_0 : i32, i32
  }
  func.func @transform_1(%arg0: i32) -> (i32, i32) {
    %c0_i32 = arith.constant 0 : i32
    %c0_i32_0 = arith.constant 0 : i32
    %c0_i32_1 = arith.constant 0 : i32
    return %c0_i32, %c0_i32_0 : i32, i32
  }
  func.func @transform_2(%arg0: i32) -> (i32, i32) {
    %c0_i32 = arith.constant 0 : i32
    %c0_i32_0 = arith.constant 0 : i32
    %c0_i32_1 = arith.constant 0 : i32
    return %c0_i32, %c0_i32_0 : i32, i32
  }
  func.func @transform_3(%arg0: i32) -> (i32, i32) {
    %c0_i32 = arith.constant 0 : i32
    %c0_i32_0 = arith.constant 0 : i32
    %c0_i32_1 = arith.constant 0 : i32
    return %c0_i32, %c0_i32_0 : i32, i32
  }
}

</mosaic_0001>

<bundles_post_ra>
// kernel: decoder_forward.7
= control target key start
LH: loop header
LB: loop body
LE: loop exit
PB: predicated region body
PF: predicated region fallthrough
CT: control target
= control target key end

     0   :  { %7 = vsyncpa [#allocation3], 0  ;;  %s979_s9 = smov [#allocation2]   ;;  %s1100_s0 = inlined_call_operand.vmem [shape: bf16[32,384], index: 0, kind: input, shape index: {}]   ;;  %s1101_s1 = inlined_call_operand.hbm [shape: bf16[384,128], index: 1, kind: input, shape index: {}]   ;;  %s1102_s2 = inlined_call_operand.vmem [shape: bf16[32,128], index: 2, kind: output, shape index: {}]  }
   0x1   :  { %s15_s10 = sshll.u32 %s979_s9, 4  ;;  %s955_s13 = scalar_lea.hbm %s1101_s1, 3072  ;;  %s16_s10 = int_to_ptr.vmem [resolvable:$true] %s15_s10 }
   0x2   :  { %p956_p0 = scmp.ne.s32.totalorder %s1101_s1, %s955_s13  ;;  %p959_p1 = scmp.lt.u32.totalorder %s955_s13, %s1101_s1 }
   0x4   :  { %p961_p2 = pnand %p959_p1, %p956_p0 }
   0x6   :  { %964 = shalt.err (!%p961_p2)
}
   0x7   :  { %s965_s18 = scalar_lea.vmem %s16_s10, 3072  ;;  %p970_p4 = scmp.lt.s32.totalorder %s16_s10, %s16_s10 }
   0x8   :  { %p966_p3 = scmp.ne.s32.totalorder %s16_s10, %s965_s18  ;;  %p971_p5 = scmp.lt.s32.totalorder %s965_s18, %s965_s18 }
   0xa   :  { %p972_p6 = por %p971_p5, %p970_p4 }
   0xc   :  { %p973_p7 = pnand %p972_p6, %p966_p3 }
   0xe   :  { %976 = shalt.err (!%p973_p7)
}
   0xf   :  { %s980_s19 = smov 64   ;;  %s981_s20 = smov 4  }
  0x10   :  { %21 = dma.hbm_to_vmem [thread:$0]  %s1101_s1, 3072, %s16_s10, [#allocation3], %s980_s19, %s980_s19, %s981_s20  }
  0x11   :  { %977 = dma.done.wait [#allocation3], 3072  }
  0x12   :  { %978 = vsyncadd [#allocation3], 4294964224  ;;  %v921_v0 = vld [vmem:[#allocation2 + $0x40] sm:$0xff]   ;;  %v924_v3 = vld [vmem:[#allocation2 + $0x48] sm:$0xff]   ;;  %v378_v16 = vlaneseq  ;;  %v982_v33 = vmov 0.0|0.0   ;;  %vm984_vm12 = vmmov 0  }
  0x13   :  { %v922_v1 = vld [vmem:[#allocation2] sm:$0xff]   ;;  %704 = vmatprep.subr.bf16.mxu0 %v921_v0  ;;  %v925_v4 = vld [vmem:[#allocation2 + $0x8] sm:$0xff]   ;;  %v927_v6 = vld [vmem:[#allocation2 + $0x50] sm:$0xff]   ;;  %v983_v35 = vmov 1.0|1.0   ;;  %v985_v46 = vmov 0.0  }
  0x14   :  { %v923_v2 = vld [vmem:[#allocation2 + $0x80] sm:$0xff]   ;;  %705 = vmatpush3.bf16.msra.mxu0 %v922_v1  ;;  %v926_v5 = vld [vmem:[#allocation2 + $0x88] sm:$0xff]   ;;  %v928_v7 = vld [vmem:[#allocation2 + $0x10] sm:$0xff]   ;;  %v1015_v20 = vshrl.u32 %v378_v16, 7  ;;  %v388_v26 = vand.u32 127, %v378_v16  ;;  %vm563_vm13 = vcmask 523264  }
  0x15   :  { %776 = vmatprep.subr.bf16.mxu1 %v923_v2  ;;  %706 = vmatprep.subr.bf16.mxu0 %v924_v3  ;;  %v929_v8 = vld [vmem:[#allocation2 + $0x90] sm:$0xff]   ;;  %v930_v9 = vld [vmem:[#allocation2 + $0x58] sm:$0xff]   ;;  %v933_v12 = vld [vmem:[#allocation2 + $0x60] sm:$0xff]  }
  0x16   :  { %777 = vmatpush3.bf16.msra.mxu1 %v923_v2  ;;  %v931_v10 = vld [vmem:[#allocation2 + $0x18] sm:$0xff]   ;;  %v935_v13 = vld [vmem:[#allocation2 + $0xa0] sm:$0xff]   ;;  %v936_v15 = vld [vmem:[#allocation2 + $0x68] sm:$0xff]   ;;  %v380_v25 = vadd.s32 8, %v1015_v20  ;;  %vm389_vm0 = vcmp.eq.s32.totalorder %v1015_v20, %v388_v26  ;;  %v381_v37 = vadd.s32 16, %v1015_v20  ;;  %v382_v38 = vadd.s32 24, %v1015_v20 }
  0x17   :  { %778 = vmatprep.subr.bf16.mxu1 %v926_v5  ;;  %v932_v11 = vld [vmem:[#allocation2 + $0x98] sm:$0xff]   ;;  %v934_v14 = vld [vmem:[#allocation2 + $0x20] sm:$0xff]   ;;  %v938_v17 = vld [vmem:[#allocation2 + $0xa8] sm:$0xff]   ;;  %v383_v40 = vadd.s32 32, %v1015_v20  ;;  %v384_v41 = vadd.s32 40, %v1015_v20  ;;  %v385_v43 = vadd.s32 48, %v1015_v20 }
  0x18   :  { %707 = vmatpush3.bf16.msra.mxu0 %v925_v4  ;;  %v937_v18 = vld [vmem:[#allocation2 + $0x28] sm:$0xff]   ;;  %v939_v19 = vld [vmem:[#allocation2 + $0x70] sm:$0xff]   ;;  %v942_v23 = vld [vmem:[#allocation2 + $0x78] sm:$0xff]   ;;  %vm390_vm1 = vcmp.eq.s32.totalorder %v380_v25, %v388_v26  ;;  %vm391_vm3 = vcmp.eq.s32.totalorder %v381_v37, %v388_v26  ;;  %vm392_vm4 = vcmp.eq.s32.totalorder %v382_v38, %v388_v26  ;;  %v386_v44 = vadd.s32 56, %v1015_v20 }
  0x19   :  { %708 = vmatprep.subr.bf16.mxu0 %v927_v6  ;;  %v940_v21 = vld [vmem:[#allocation2 + $0x30] sm:$0xff]   ;;  %v944_v24 = vld [vmem:[#allocation2 + $0xb8] sm:$0xff]   ;;  %v945_v30 = vld [vmem:[%s1100_s0] ss:$12 sps:$4 sm:$0xff]   ;;  %vm393_vm6 = vcmp.eq.s32.totalorder %v383_v40, %v388_v26  ;;  %vm394_vm7 = vcmp.eq.s32.totalorder %v384_v41, %v388_v26  ;;  %vm395_vm9 = vcmp.eq.s32.totalorder %v385_v43, %v388_v26  ;;  %v572_v37 = vsub.s32 0, %v1015_v20 }
  0x1a   :  { %779 = vmatpush3.bf16.msra.mxu1 %v926_v5  ;;  %v941_v22 = vld [vmem:[#allocation2 + $0xb0] sm:$0xff]   ;;  %v943_v29 = vld [vmem:[#allocation2 + $0x38] sm:$0xff]   ;;  %v949_v32 = vld [vmem:[%s1100_s0 + $0x20] ss:$12 sps:$4 sm:$0xff]   ;;  %vm396_vm10 = vcmp.eq.s32.totalorder %v386_v44, %v388_v26 }
  0x1b   :  { %780 = vmatprep.subr.bf16.mxu1 %v929_v8  ;;  %v947_v27 = vld [vmem:[%s1100_s0 + $0x4] ss:$12 sps:$4 sm:$0xff]   ;;  %v948_v28 = vld [vmem:[%s1100_s0 + $0x8] ss:$12 sps:$4 sm:$0xff]   ;;  %vm1034_vm2 = vmpackc.low %vm390_vm1, %vm389_vm0 }
  0x1c   :  { %709 = vmatpush3.bf16.msra.mxu0 %v928_v7  ;;  %290 = vmatprep.mubr.bf16.mxu0 %v947_v27  ;;  %v950_v31 = vld [vmem:[%s1100_s0 + $0x1c] ss:$12 sps:$4 sm:$0xff]   ;;  %v952_v36 = vld [vmem:[%s1100_s0 + $0x18] ss:$12 sps:$4 sm:$0xff]   ;;  %vm1047_vm5 = vmpackc.low %vm392_vm4, %vm391_vm3 }
  0x1d   :  { %710 = vmatprep.subr.bf16.mxu0 %v930_v9  ;;  %792 = vmatprep.mubr.bf16.mxu1 %v948_v28  ;;  %vm1057_vm8 = vmpackc.low %vm394_vm7, %vm393_vm6 }
  0x1e   :  { %781 = vmatpush3.bf16.msra.mxu1 %v929_v8  ;;  %vm1067_vm11 = vmpackc.low %vm396_vm10, %vm395_vm9 }
  0x1f   :  { %782 = vmatprep.subr.bf16.mxu1 %v932_v11 }
  0x20   :  { %711 = vmatpush3.bf16.msra.mxu0 %v931_v10 }
  0x21   :  { %712 = vmatprep.subr.bf16.mxu0 %v933_v12 }
  0x22   :  { %783 = vmatpush3.bf16.msra.mxu1 %v932_v11 }
  0x23   :  { %784 = vmatprep.subr.bf16.mxu1 %v935_v13 }
  0x24   :  { %713 = vmatpush3.bf16.msra.mxu0 %v934_v14 }
  0x25   :  { %714 = vmatprep.subr.bf16.mxu0 %v936_v15 }
  0x26   :  { %785 = vmatpush3.bf16.msra.mxu1 %v935_v13 }
  0x27   :  { %786 = vmatprep.subr.bf16.mxu1 %v938_v17 }
  0x28   :  { %715 = vmatpush3.bf16.msra.mxu0 %v937_v18 }
  0x29   :  { %716 = vmatprep.subr.bf16.mxu0 %v939_v19 }
  0x2a   :  { %787 = vmatpush3.bf16.msra.mxu1 %v938_v17 }
  0x2b   :  { %788 = vmatprep.subr.bf16.mxu1 %v941_v22 }
  0x2c   :  { %717 = vmatpush3.bf16.msra.mxu0 %v940_v21 }
  0x2d   :  { %718 = vmatprep.subr.bf16.mxu0 %v942_v23 }
  0x2e   :  { %789 = vmatpush3.bf16.msra.mxu1 %v941_v22 }
  0x2f   :  { %790 = vmatprep.subr.bf16.mxu1 %v944_v24 }
  0x30   :  { %719 = vmatpush3.bf16.msra.mxu0 %v943_v29 }
  0x31   :  { %866 = vmatprep.subr.bf16.mxu0 %v982_v33 }
  0x32   :  { %791 = vmatpush3.bf16.msra.mxu1 %v944_v24 }
  0x33   :  { %291 = vmatmul.mubr.bf16.vlgmr.msra.gmra.mrb[0].mxu0 %v945_v30  ;;  %890 = vmatprep.subr.bf16.mxu1 %v982_v33 }
  0x34   :  { %298 = vmatprep.mubr.bf16.mxu0 %v950_v31  ;;  %868 = vmatpush3.bf16.msk.msra.mxu0 %vm1034_vm2, %v983_v35 }
  0x35   :  { %793 = vmatmul.mubr.bf16.vlgmr.msra.gmra.mrb[0].mxu1 %v949_v32  ;;  %869 = vmatprep.subr.bf16.mxu0 %v982_v33 }
  0x36   :  { %892 = vmatpush3.bf16.msk.msra.mxu1 %vm1034_vm2, %v983_v35  ;;  %863 = vmatprep.mubr.msk.f32.mxu1 %vm984_vm12, %v985_v46 }
  0x37   :  { %893 = vmatprep.subr.bf16.mxu1 %v982_v33 }
  0x38   :  { %871 = vmatpush3.bf16.msk.msra.mxu0 %vm1047_vm5, %v983_v35 }
  0x39   :  { %872 = vmatprep.subr.bf16.mxu0 %v982_v33 }
  0x3a   :  { %895 = vmatpush3.bf16.msk.msra.mxu1 %vm1047_vm5, %v983_v35 }
  0x3b   :  { %299 = vmatmul.mubr.bf16.gmra.mrb[4].mxu0 %v952_v36  ;;  %896 = vmatprep.subr.bf16.mxu1 %v982_v33 }
  0x3c   :  { %874 = vmatpush3.bf16.msk.msra.mxu0 %vm1057_vm8, %v983_v35  ;;  %828 = vmatprep.mubr.msk.f32.mxu0 %vm984_vm12, %v985_v46 }
  0x3d   :  { %875 = vmatprep.subr.bf16.mxu0 %v982_v33 }
  0x3e   :  { %898 = vmatpush3.bf16.msk.msra.mxu1 %vm1057_vm8, %v983_v35 }
  0x3f   :  { %899 = vmatprep.subr.bf16.mxu1 %v982_v33 }
  0x40   :  { %877 = vmatpush3.bf16.msk.msra.mxu0 %vm1067_vm11, %v983_v35 }
  0x41   :  { %878 = vmatprep.subr.bf16.mxu0 %v982_v33 }
  0x42   :  { %901 = vmatpush3.bf16.msk.msra.mxu1 %vm1067_vm11, %v983_v35 }
  0x43   :  { %902 = vmatprep.subr.bf16.mxu1 %v982_v33 }
  0x44   :  { %880 = vmatpush3.bf16.msk.msra.mxu0 %vm1034_vm2, %v983_v35 }
  0x45   :  { %881 = vmatprep.subr.bf16.mxu0 %v982_v33 }
  0x46   :  { %904 = vmatpush3.bf16.msk.msra.mxu1 %vm1034_vm2, %v983_v35 }
  0x47   :  { %905 = vmatprep.subr.bf16.mxu1 %v982_v33 }
  0x48   :  { %883 = vmatpush3.bf16.msk.msra.mxu0 %vm1047_vm5, %v983_v35 }
  0x49   :  { %884 = vmatprep.subr.bf16.mxu0 %v982_v33 }
  0x4a   :  { %907 = vmatpush3.bf16.msk.msra.mxu1 %vm1047_vm5, %v983_v35 }
  0x4b   :  { %908 = vmatprep.subr.bf16.mxu1 %v982_v33 }
  0x4c   :  { %886 = vmatpush3.bf16.msk.msra.mxu0 %vm1057_vm8, %v983_v35 }
  0x4d   :  { %887 = vmatprep.subr.bf16.mxu0 %v982_v33 }
  0x4e   :  { %910 = vmatpush3.bf16.msk.msra.mxu1 %vm1057_vm8, %v983_v35 }
  0x4f   :  { %911 = vmatprep.subr.bf16.mxu1 %v982_v33 }
  0x50   :  { %889 = vmatpush3.bf16.msk.msra.mxu0 %vm1067_vm11, %v983_v35 }
  0x52   :  { %913 = vmatpush3.bf16.msk.msra.mxu1 %vm1067_vm11, %v983_v35 }
 0x106   :  { %v720_v47 = vpop.f32.mrb[0].mxu0 }
 0x107   :  { %v721_v48 = vpop.f32.mrb[1].mxu0 }
 0x108   :  { %v722_v49 = vadd.f32 %v721_v48, %v720_v47  ;;  %v723_v50 = vpop.f32.mrb[2].mxu0  ;;  %v794_v51 = vpop.f32.mrb[0].mxu1 }
 0x109   :  { %v724_v52 = vpop.f32.mrb[3].mxu0  ;;  %v341_v53 = vpop.f32.mrb[1].mxu1 }
 0x10a   :  { %v725_v54 = vadd.f32 %v724_v52, %v723_v50  ;;  %v342_v55 = vadd.f32 %v722_v49, %v341_v53  ;;  %v795_v56 = vpop.f32.mrb[2].mxu1 }
 0x10b   :  { %v344_v57 = vpop.f32.mrb[3].mxu1 }
 0x10c   :  { %v345_v58 = vadd.f32 %v725_v54, %v344_v57  ;;  %v365_v1 = vmul.f32 %v342_v55, %v342_v55 }
 0x10e   :  { %v726_v59 = vpop.f32.mrb[4].mxu0  ;;  %v366_v61 = vmul.f32 %v345_v58, %v345_v58  ;;  %v356_v2 = vadd.f32 %v345_v58, %v342_v55 }
 0x10f   :  { %v727_v60 = vpop.f32.mrb[5].mxu0 }
 0x110   :  { %v728_v62 = vadd.f32 %v727_v60, %v726_v59  ;;  %v729_v63 = vpop.f32.mrb[6].mxu0  ;;  %v369_v5 = vadd.f32 %v366_v61, %v365_v1 }
 0x111   :  { %v730_v0 = vpop.f32.mrb[7].mxu0 }
 0x112   :  { %v350_v3 = vadd.f32 %v794_v51, %v728_v62  ;;  %v731_v4 = vadd.f32 %v730_v0, %v729_v63 }
 0x114   :  { %v357_v6 = vadd.f32 %v356_v2, %v350_v3  ;;  %v367_v7 = vmul.f32 %v350_v3, %v350_v3  ;;  %v353_v8 = vadd.f32 %v795_v56, %v731_v4 }
 0x116   :  { %v370_v9 = vadd.f32 %v369_v5, %v367_v7  ;;  %v358_v10 = vadd.f32 %v357_v6, %v353_v8  ;;  %v368_v11 = vmul.f32 %v353_v8, %v353_v8 }
 0x118   :  { %v359_v12 = vrot.slane %v358_v10, 4  ;;  %v371_v13 = vadd.f32 %v370_v9, %v368_v11 }
 0x11a   :  { %v360_v14 = vadd.f32 %v359_v12, %v358_v10  ;;  %v372_v15 = vrot.slane %v371_v13, 4 }
 0x11c   :  { %v361_v16 = vrot.slane %v360_v14, 2  ;;  %v373_v17 = vadd.f32 %v372_v15, %v371_v13 }
 0x11e   :  { %v362_v18 = vadd.f32 %v361_v16, %v360_v14  ;;  %v374_v19 = vrot.slane %v373_v17, 2 }
 0x120   :  { %v363_v21 = vrot.slane %v362_v18, 1  ;;  %v375_v22 = vadd.f32 %v374_v19, %v373_v17 }
 0x122   :  { %v364_v23 = vadd.f32 %v363_v21, %v362_v18  ;;  %v376_v24 = vrot.slane %v375_v22, 1 }
 0x124   :  { %829 = vmatmul.mubr.f32.vlgmr.msra.gmra.mrb[8].mxu0 %v364_v23  ;;  %v377_v25 = vadd.f32 %v376_v24, %v375_v22 }
 0x126   :  { %864 = vmatmul.mubr.f32.vlgmr.msra.gmra.mrb[4].mxu1 %v377_v25 }
 0x1f7   :  { %v479_v26 = vpop.f32.mrb[8].mxu0 }
 0x1f8   :  { %v483_v27 = vmul.f32 0.015625, %v479_v26  ;;  %v830_v28 = vpop.f32.mrb[9].mxu0 }
 0x1f9   :  { %v550_v29 = vpop.f32.mrb[4].mxu1 }
 0x1fa   :  { %v554_v30 = vmul.f32 0.015625, %v550_v29  ;;  %v555_v31 = vmul.f32 %v483_v27, %v483_v27  ;;  %v865_v32 = vpop.f32.mrb[5].mxu1  ;;  %560 = vrot.lane.b32.xlu0 %v483_v27, %s980_s19 }
 0x1fc   :  { %v556_v33 = vsub.f32 %v554_v30, %v555_v31 }
 0x1fe   :  { %v557_v34 = vadd.f32 1e-05, %v556_v33 }
 0x200   :  { %953 = vrsqrt.f32 %v557_v34 }
 0x20a   :  { %v954_v35 = vpop.eup %953 }
 0x20b   :  { %566 = vrot.lane.b32.xlu0 %v954_v35, %s980_s19 }
 0x26c   :  { %v561_v36 = vpop.permute.xlu0 %560 }
 0x26d   :  { %v564_v38 = vsel %vm563_vm13, %v483_v27, %v561_v36 }
 0x26e   :  { %v573_v39 = vrot.slane %v564_v38, %v572_v37 }
 0x270   :  { %v574_v41 = vsub.f32 %v342_v55, %v573_v39  ;;  %v575_v43 = vsub.f32 %v345_v58, %v573_v39  ;;  %v576_v44 = vsub.f32 %v350_v3, %v573_v39  ;;  %v577_v45 = vsub.f32 %v353_v8, %v573_v39 }
 0x27d   :  { %v567_v40 = vpop.permute.xlu0 %566 }
 0x27e   :  { %v569_v42 = vsel %vm563_vm13, %v954_v35, %v567_v40 }
 0x27f   :  { %v581_v46 = vrot.slane %v569_v42, %v572_v37 }
 0x281   :  { %v582_v47 = vmul.f32 %v581_v46, %v574_v41  ;;  %v583_v48 = vmul.f32 %v581_v46, %v575_v43  ;;  %v584_v49 = vmul.f32 %v581_v46, %v576_v44  ;;  %v585_v50 = vmul.f32 %v581_v46, %v577_v45 }
 0x283   :  { %v586_v51 = vmax.f32 %v582_v47, 0.0  ;;  %v587_v52 = vmax.f32 %v583_v48, 0.0  ;;  %v588_v53 = vmax.f32 %v584_v49, 0.0  ;;  %v589_v54 = vmax.f32 %v585_v50, 0.0 }
 0x285   :  { %v696_v56 = vpack.c.bf16 %v587_v52, %v586_v51  ;;  %v701_v57 = vpack.c.bf16 %v589_v54, %v588_v53 }
 0x287   :  { %697 = vst [vmem:[%s1102_s2] sm:$0xff] %v696_v56   ;;  %703 = vst [vmem:[%s1102_s2 + $0x8] sm:$0xff] %v701_v57  }
 0x288   :  { %614 = vsyncpa [#allocation3], 1 }

// kernel: decoder_forward.6
= control target key start
LH: loop header
LB: loop body
LE: loop exit
PB: predicated region body
PF: predicated region fallthrough
CT: control target
= control target key end

     0   :  { %7 = vsyncpa [#allocation3], 0  ;;  %s3748_s9 = smov [#allocation2]   ;;  %s4880_s0 = inlined_call_operand.vmem [shape: bf16[2,16], index: 0, kind: input, shape index: {}]   ;;  %s4881_s1 = inlined_call_operand.hbm [shape: bf16[16,2048], index: 1, kind: input, shape index: {}]   ;;  %s4882_s2 = inlined_call_operand.vmem [shape: bf16[2,2048], index: 2, kind: output, shape index: {}]  }
   0x1   :  { %s15_s10 = sshll.u32 %s3748_s9, 4  ;;  %s3724_s13 = scalar_lea.hbm %s4881_s1, 2048  ;;  %s16_s10 = int_to_ptr.vmem [resolvable:$true] %s15_s10 }
   0x2   :  { %p3725_p0 = scmp.ne.s32.totalorder %s4881_s1, %s3724_s13  ;;  %p3728_p1 = scmp.lt.u32.totalorder %s3724_s13, %s4881_s1 }
   0x4   :  { %p3730_p2 = pnand %p3728_p1, %p3725_p0 }
   0x6   :  { %3733 = shalt.err (!%p3730_p2)
}
   0x7   :  { %s3734_s18 = scalar_lea.vmem %s16_s10, 2048  ;;  %p3739_p4 = scmp.lt.s32.totalorder %s16_s10, %s16_s10 }
   0x8   :  { %p3735_p3 = scmp.ne.s32.totalorder %s16_s10, %s3734_s18  ;;  %p3740_p5 = scmp.lt.s32.totalorder %s3734_s18, %s3734_s18 }
   0xa   :  { %p3741_p6 = por %p3740_p5, %p3739_p4 }
   0xc   :  { %p3742_p7 = pnand %p3741_p6, %p3735_p3 }
   0xe   :  { %3745 = shalt.err (!%p3742_p7)
}
   0xf   :  { %s3749_s19 = smov 1024   ;;  %s3750_s20 = smov 64  }
  0x10   :  { %21 = dma.hbm_to_vmem [thread:$0]  %s4881_s1, 2048, %s16_s10, [#allocation3], %s3749_s19, %s3749_s19, %s3750_s20  }
  0x11   :  { %3746 = dma.done.wait [#allocation3], 2048  }
  0x12   :  { %3747 = vsyncadd [#allocation3], 4294965248  ;;  %v3751_v0 = vmov 0   ;;  %v27_v1 = vld [vmem:[#allocation2] sm:$0xff]  ;;  %v28_v3 = vld [vmem:[#allocation2 + $0x8] sm:$0xff]  ;;  %vm123_vm0 = vcmask 130048   ;;  %v696_v24 = vlaneseq }
  0x13   :  { %159 = vmatprep.mubr.bf16.mxu0 %v3751_v0  ;;  %200 = vmatprep.mubr.bf16.mxu1 %v3751_v0  ;;  %v35_v2 = vld [vmem:[#allocation2 + $0x40] sm:$0xff]  ;;  %v36_v5 = vld [vmem:[#allocation2 + $0x48] sm:$0xff]  ;;  %v29_v7 = vld [vmem:[#allocation2 + $0x10] sm:$0xff]  ;;  %v3752_v41 = vmov 1.0|1.0  }
  0x14   :  { %v2085_v4 = vcombine.high %v27_v1, %v35_v2  ;;  %v2084_v6 = vcombine.low %v27_v1, %v35_v2  ;;  %v2087_v8 = vcombine.high %v28_v3, %v36_v5  ;;  %v2086_v9 = vcombine.low %v28_v3, %v36_v5  ;;  %v37_v10 = vld [vmem:[#allocation2 + $0x50] sm:$0xff]  ;;  %v30_v11 = vld [vmem:[#allocation2 + $0x18] sm:$0xff]  ;;  %v31_v15 = vld [vmem:[#allocation2 + $0x20] sm:$0xff] }
  0x15   :  { %v38_v12 = vld [vmem:[#allocation2 + $0x58] sm:$0xff]  ;;  %v2089_v13 = vcombine.high %v29_v7, %v37_v10  ;;  %v39_v16 = vld [vmem:[#allocation2 + $0x60] sm:$0xff]  ;;  %v2088_v18 = vcombine.low %v29_v7, %v37_v10  ;;  %v32_v19 = vld [vmem:[#allocation2 + $0x28] sm:$0xff]  ;;  %v3794_v30 = vshrl.u32 %v696_v24, 7  ;;  %v3801_v35 = vand.u32 127, %v696_v24 }
  0x16   :  { %127 = vmatprep.subr.bf16.mxu0 %v2085_v4  ;;  %v2091_v14 = vcombine.high %v30_v11, %v38_v12  ;;  %168 = vmatprep.subr.bf16.mxu1 %v2087_v8  ;;  %v3786_v17 = vld [vmem:[%s4880_s0] sm:$0x1]  ;;  %v40_v20 = vld [vmem:[#allocation2 + $0x68] sm:$0xff]  ;;  %v2090_v21 = vcombine.low %v30_v11, %v38_v12  ;;  %v2093_v22 = vcombine.high %v31_v15, %v39_v16  ;;  %v33_v25 = vld [vmem:[#allocation2 + $0x30] sm:$0xff] }
  0x17   :  { %128 = vmatpush1.bf16.msra.mxu0 %v2084_v6  ;;  %169 = vmatpush1.bf16.msra.mxu1 %v2086_v9  ;;  %v2095_v23 = vcombine.high %v32_v19, %v40_v20  ;;  %v41_v26 = vld [vmem:[#allocation2 + $0x70] sm:$0xff]  ;;  %v2092_v27 = vcombine.low %v31_v15, %v39_v16  ;;  %v34_v28 = vld [vmem:[#allocation2 + $0x38] sm:$0xff]  ;;  %v2094_v31 = vcombine.low %v32_v19, %v40_v20  ;;  %v698_v34 = vadd.s32 8, %v3794_v30 }
  0x18   :  { %209 = vmatprep.subr.bf16.mxu0 %v2089_v13  ;;  %250 = vmatprep.subr.bf16.mxu1 %v2091_v14  ;;  %v42_v29 = vld [vmem:[#allocation2 + $0x78] sm:$0xff]  ;;  %v2097_v32 = vcombine.high %v33_v25, %v41_v26  ;;  %v2096_v36 = vcombine.low %v33_v25, %v41_v26  ;;  %vm715_vm1 = vcmp.eq.s32.totalorder %v3794_v30, %v3801_v35  ;;  %v699_v39 = vadd.s32 16, %v3794_v30 }
  0x19   :  { %v2099_v33 = vcombine.high %v34_v28, %v42_v29  ;;  %vm716_vm2 = vcmp.eq.s32.totalorder %v698_v34, %v3801_v35  ;;  %v2098_v37 = vcombine.low %v34_v28, %v42_v29  ;;  %v700_v40 = vadd.s32 24, %v3794_v30 }
  0x1a   :  { %2100 = vmatmul.mubr.msk.bf16.vlgmr.msra.gmra.mrb[0].mxu0 %vm123_vm0, %v3786_v17  ;;  %2101 = vmatmul.mubr.msk.bf16.vlgmr.msra.gmra.mrb[0].mxu1 %vm123_vm0, %v3786_v17  ;;  %vm3810_vm3 = vmpackc.low %vm716_vm2, %vm715_vm1  ;;  %vm717_vm4 = vcmp.eq.s32.totalorder %v699_v39, %v3801_v35  ;;  %v701_v42 = vadd.s32 32, %v3794_v30  ;;  %v702_v43 = vadd.s32 40, %v3794_v30  ;;  %v703_v45 = vadd.s32 48, %v3794_v30 }
  0x1b   :  { %210 = vmatpush1.bf16.msra.mxu0 %v2088_v18  ;;  %241 = vmatprep.mubr.bf16.mxu0 %v3751_v0  ;;  %vm718_vm5 = vcmp.eq.s32.totalorder %v700_v40, %v3801_v35  ;;  %v704_v46 = vadd.s32 56, %v3794_v30  ;;  %v705_v48 = vadd.s32 64, %v3794_v30  ;;  %v706_v49 = vadd.s32 72, %v3794_v30 }
  0x1c   :  { %251 = vmatpush1.bf16.msra.mxu1 %v2090_v21  ;;  %282 = vmatprep.mubr.bf16.mxu1 %v3751_v0  ;;  %vm3830_vm6 = vmpackc.low %vm718_vm5, %vm717_vm4  ;;  %vm719_vm7 = vcmp.eq.s32.totalorder %v701_v42, %v3801_v35  ;;  %vm720_vm8 = vcmp.eq.s32.totalorder %v702_v43, %v3801_v35  ;;  %vm721_vm10 = vcmp.eq.s32.totalorder %v703_v45, %v3801_v35  ;;  %v707_v52 = vadd.s32 80, %v3794_v30 }
  0x1d   :  { %291 = vmatprep.subr.bf16.mxu0 %v2093_v22  ;;  %332 = vmatprep.subr.bf16.mxu1 %v2095_v23  ;;  %vm3854_vm9 = vmpackc.low %vm720_vm8, %vm719_vm7  ;;  %vm722_vm11 = vcmp.eq.s32.totalorder %v704_v46, %v3801_v35  ;;  %vm723_vm13 = vcmp.eq.s32.totalorder %v705_v48, %v3801_v35  ;;  %vm724_vm14 = vcmp.eq.s32.totalorder %v706_v49, %v3801_v35  ;;  %v708_v53 = vadd.s32 88, %v3794_v30 }
  0x1e   :  { %vm3874_vm12 = vmpackc.low %vm722_vm11, %vm721_vm10  ;;  %v709_v55 = vadd.s32 96, %v3794_v30  ;;  %v710_v56 = vadd.s32 104, %v3794_v30  ;;  %v711_v58 = vadd.s32 112, %v3794_v30  ;;  %v712_v59 = vadd.s32 120, %v3794_v30 }
  0x1f   :  { %vm3892_vm15 = vmpackc.low %vm724_vm14, %vm723_vm13  ;;  %vm726_vm1 = vcmp.eq.s32.totalorder %v708_v53, %v3801_v35  ;;  %vm455_vm13 = vcmask 1041408  }
  0x20   :  { %vm727_vm4 = vcmp.eq.s32.totalorder %v709_v55, %v3801_v35  ;;  %vm728_vm5 = vcmp.eq.s32.totalorder %v710_v56, %v3801_v35  ;;  %vm729_vm8 = vcmp.eq.s32.totalorder %v711_v58, %v3801_v35  ;;  %vm730_vm10 = vcmp.eq.s32.totalorder %v712_v59, %v3801_v35 }
  0x21   :  { %vm3938_vm7 = vmpackc.low %vm728_vm5, %vm727_vm4 }
  0x22   :  { %2102 = vmatmul.mubr.msk.bf16.vlgmr.msra.gmra.mrb[4].mxu0 %vm123_vm0, %v3786_v17  ;;  %2103 = vmatmul.mubr.msk.bf16.vlgmr.msra.gmra.mrb[4].mxu1 %vm123_vm0, %v3786_v17  ;;  %vm3958_vm11 = vmpackc.low %vm730_vm10, %vm729_vm8 }
  0x23   :  { %292 = vmatpush1.bf16.msra.mxu0 %v2092_v27  ;;  %323 = vmatprep.mubr.bf16.mxu0 %v3751_v0 }
  0x24   :  { %333 = vmatpush1.bf16.msra.mxu1 %v2094_v31  ;;  %364 = vmatprep.mubr.bf16.mxu1 %v3751_v0 }
  0x25   :  { %373 = vmatprep.subr.bf16.mxu0 %v2097_v32  ;;  %414 = vmatprep.subr.bf16.mxu1 %v2099_v33 }
  0x2a   :  { %2104 = vmatmul.mubr.msk.bf16.vlgmr.msra.gmra.mrb[8].mxu0 %vm123_vm0, %v3786_v17  ;;  %2105 = vmatmul.mubr.msk.bf16.vlgmr.msra.gmra.mrb[8].mxu1 %vm123_vm0, %v3786_v17 }
  0x2b   :  { %374 = vmatpush1.bf16.msra.mxu0 %v2096_v36  ;;  %405 = vmatprep.mubr.bf16.mxu0 %v3751_v0 }
  0x2c   :  { %415 = vmatpush1.bf16.msra.mxu1 %v2098_v37  ;;  %446 = vmatprep.mubr.bf16.mxu1 %v3751_v0 }
  0x2d   :  { %3205 = vmatprep.subr.msk.bf16.mxu0 %vm3810_vm3, %v3752_v41  ;;  %3237 = vmatprep.subr.msk.bf16.mxu1 %vm3810_vm3, %v3752_v41 }
  0x32   :  { %2106 = vmatmul.mubr.msk.bf16.vlgmr.msra.gmra.mrb[12].mxu0 %vm123_vm0, %v3786_v17  ;;  %2107 = vmatmul.mubr.msk.bf16.vlgmr.msra.gmra.mrb[12].mxu1 %vm123_vm0, %v3786_v17  ;;  %vm725_vm0 = vcmp.eq.s32.totalorder %v707_v52, %v3801_v35 }
  0x33   :  { %3207 = vmatpush3.bf16.msk.msra.mxu0 %vm3810_vm3, %v3752_v41  ;;  %3239 = vmatpush3.bf16.msk.msra.mxu1 %vm3810_vm3, %v3752_v41  ;;  %vm3918_vm2 = vmpackc.low %vm726_vm1, %vm725_vm0 }
  0x34   :  { %3209 = vmatprep.subr.msk.bf16.mxu0 %vm3830_vm6, %v3752_v41  ;;  %3241 = vmatprep.subr.msk.bf16.mxu1 %vm3830_vm6, %v3752_v41 }
  0x37   :  { %3211 = vmatpush3.bf16.msk.msra.mxu0 %vm3830_vm6, %v3752_v41  ;;  %3243 = vmatpush3.bf16.msk.msra.mxu1 %vm3830_vm6, %v3752_v41 }
  0x38   :  { %3213 = vmatprep.subr.msk.bf16.mxu0 %vm3854_vm9, %v3752_v41  ;;  %3245 = vmatprep.subr.msk.bf16.mxu1 %vm3854_vm9, %v3752_v41 }
  0x3b   :  { %3215 = vmatpush3.bf16.msk.msra.mxu0 %vm3854_vm9, %v3752_v41  ;;  %3247 = vmatpush3.bf16.msk.msra.mxu1 %vm3854_vm9, %v3752_v41 }
  0x3c   :  { %3217 = vmatprep.subr.msk.bf16.mxu0 %vm3874_vm12, %v3752_v41  ;;  %3249 = vmatprep.subr.msk.bf16.mxu1 %vm3874_vm12, %v3752_v41 }
  0x3f   :  { %3219 = vmatpush3.bf16.msk.msra.mxu0 %vm3874_vm12, %v3752_v41  ;;  %3251 = vmatpush3.bf16.msk.msra.mxu1 %vm3874_vm12, %v3752_v41 }
  0x40   :  { %3221 = vmatprep.subr.msk.bf16.mxu0 %vm3892_vm15, %v3752_v41  ;;  %3253 = vmatprep.subr.msk.bf16.mxu1 %vm3892_vm15, %v3752_v41 }
  0x43   :  { %3223 = vmatpush3.bf16.msk.msra.mxu0 %vm3892_vm15, %v3752_v41  ;;  %3255 = vmatpush3.bf16.msk.msra.mxu1 %vm3892_vm15, %v3752_v41 }
  0x44   :  { %3225 = vmatprep.subr.msk.bf16.mxu0 %vm3918_vm2, %v3752_v41  ;;  %3257 = vmatprep.subr.msk.bf16.mxu1 %vm3918_vm2, %v3752_v41 }
  0x47   :  { %3227 = vmatpush3.bf16.msk.msra.mxu0 %vm3918_vm2, %v3752_v41  ;;  %3259 = vmatpush3.bf16.msk.msra.mxu1 %vm3918_vm2, %v3752_v41 }
  0x48   :  { %3229 = vmatprep.subr.msk.bf16.mxu0 %vm3938_vm7, %v3752_v41  ;;  %3261 = vmatprep.subr.msk.bf16.mxu1 %vm3938_vm7, %v3752_v41 }
  0x4b   :  { %3231 = vmatpush3.bf16.msk.msra.mxu0 %vm3938_vm7, %v3752_v41  ;;  %3263 = vmatpush3.bf16.msk.msra.mxu1 %vm3938_vm7, %v3752_v41 }
  0x4c   :  { %3233 = vmatprep.subr.msk.bf16.mxu0 %vm3958_vm11, %v3752_v41  ;;  %3265 = vmatprep.subr.msk.bf16.mxu1 %vm3958_vm11, %v3752_v41 }
  0x4f   :  { %3235 = vmatpush3.bf16.msk.msra.mxu0 %vm3958_vm11, %v3752_v41  ;;  %3267 = vmatpush3.bf16.msk.msra.mxu1 %vm3958_vm11, %v3752_v41 }
  0x50   :  { %3269 = vmatprep.subr.msk.bf16.mxu0 %vm3810_vm3, %v3752_v41  ;;  %3301 = vmatprep.subr.msk.bf16.mxu1 %vm3810_vm3, %v3752_v41 }
  0xed   :  { %v3980_v61 = vpop.f32.mrb[0].mxu0  ;;  %v3986_v0 = vpop.f32.mrb[0].mxu1 }
  0xee   :  { %v456_v62 = vsel %vm455_vm13, %v3980_v61, 0.0  ;;  %v568_v63 = vmul.f32 %v3980_v61, %v3980_v61  ;;  %v3988_v1 = vpop.f32.mrb[1].mxu0  ;;  %v470_v3 = vsel %vm455_vm13, %v3986_v0, 0.0  ;;  %v570_v4 = vmul.f32 %v3986_v0, %v3986_v0  ;;  %v3996_v6 = vpop.f32.mrb[1].mxu1 }
  0xef   :  { %v457_v2 = vrot.slane %v456_v62, 4  ;;  %v463_v5 = vsel %vm455_vm13, %v3988_v1, 0.0  ;;  %v165_v7 = vpop.f32.mrb[2].mxu0  ;;  %v471_v9 = vrot.slane %v470_v3, 4  ;;  %v569_v11 = vmul.f32 %v3988_v1, %v3988_v1  ;;  %v206_v12 = vpop.f32.mrb[2].mxu1 }
  0xf0   :  { %v3999_v8 = vsel %vm455_vm13, %v568_v63, 0.0  ;;  %v464_v10 = vrot.slane %v463_v5, 4  ;;  %v166_v13 = vpop.f32.mrb[3].mxu0  ;;  %v4004_v15 = vsel %vm455_vm13, %v570_v4, 0.0  ;;  %v477_v16 = vsel %vm455_vm13, %v3996_v6, 0.0  ;;  %v207_v17 = vpop.f32.mrb[3].mxu1 }
  0xf1   :  { %v458_v14 = vadd.f32 %v457_v2, %v456_v62  ;;  %v472_v18 = vadd.f32 %v471_v9, %v470_v3  ;;  %v4009_v20 = vsel %vm455_vm13, %v569_v11, 0.0  ;;  %v478_v22 = vrot.slane %v477_v16, 4 }
  0xf2   :  { %v465_v19 = vadd.f32 %v464_v10, %v463_v5  ;;  %v571_v25 = vmul.f32 %v3996_v6, %v3996_v6 }
  0xf3   :  { %v459_v21 = vrot.slane %v458_v14, 2  ;;  %v473_v23 = vrot.slane %v472_v18, 2  ;;  %v479_v27 = vadd.f32 %v478_v22, %v477_v16 }
  0xf4   :  { %v466_v24 = vrot.slane %v465_v19, 2  ;;  %v4016_v31 = vsel %vm455_vm13, %v571_v25, 0.0 }
  0xf5   :  { %v460_v26 = vadd.f32 %v459_v21, %v458_v14  ;;  %v4013_v28 = vpop.f32.mrb[4].mxu0  ;;  %v474_v29 = vadd.f32 %v473_v23, %v472_v18  ;;  %v4020_v34 = vpop.f32.mrb[4].mxu1  ;;  %v480_v36 = vrot.slane %v479_v27, 2 }
  0xf6   :  { %v467_v32 = vadd.f32 %v466_v24, %v465_v19  ;;  %v4018_v33 = vpop.f32.mrb[5].mxu0  ;;  %v4022_v37 = vpop.f32.mrb[5].mxu1  ;;  %v572_v52 = vmul.f32 %v4013_v28, %v4013_v28  ;;  %v574_v63 = vmul.f32 %v4020_v34, %v4020_v34 }
  0xf7   :  { %v461_v35 = vrot.slane %v460_v26, 1  ;;  %v247_v39 = vpop.f32.mrb[6].mxu0  ;;  %v288_v43 = vpop.f32.mrb[6].mxu1  ;;  %v481_v45 = vadd.f32 %v480_v36, %v479_v27  ;;  %v475_v48 = vrot.slane %v474_v29, 1  ;;  %v491_v53 = vsel %vm455_vm13, %v4018_v33, 0.0 }
  0xf8   :  { %v468_v40 = vrot.slane %v467_v32, 1  ;;  %v248_v42 = vpop.f32.mrb[7].mxu0  ;;  %v289_v46 = vpop.f32.mrb[7].mxu1  ;;  %v492_v58 = vrot.slane %v491_v53, 4  ;;  %v573_v59 = vmul.f32 %v4018_v33, %v4018_v33  ;;  %v4031_v62 = vsel %vm455_vm13, %v572_v52, 0.0 }
  0xf9   :  { %v482_v55 = vrot.slane %v481_v45, 1  ;;  %v462_v56 = vadd.f32 %v461_v35, %v460_v26  ;;  %v505_v2 = vsel %vm455_vm13, %v4022_v37, 0.0  ;;  %v476_v7 = vadd.f32 %v475_v48, %v474_v29 }
  0xfa   :  { %v469_v49 = vadd.f32 %v468_v40, %v467_v32  ;;  %v493_v4 = vadd.f32 %v492_v58, %v491_v53  ;;  %v4043_v9 = vsel %vm455_vm13, %v573_v59, 0.0  ;;  %v4046_v10 = vsel %vm455_vm13, %v574_v63, 0.0 }
  0xfb   :  { %v483_v3 = vadd.f32 %v482_v55, %v481_v45  ;;  %v506_v11 = vrot.slane %v505_v2, 4  ;;  %v575_v19 = vmul.f32 %v4022_v37, %v4022_v37  ;;  %v484_v27 = vsel %vm455_vm13, %v4013_v28, 0.0 }
  0xfc   :  { %827 = vmatprep.mubr.f32.mxu0 %v469_v49  ;;  %v494_v14 = vrot.slane %v493_v4, 2  ;;  %v485_v42 = vrot.slane %v484_v27, 4  ;;  %v498_v49 = vsel %vm455_vm13, %v4020_v34, 0.0 }
  0xfd   :  { %828 = vmatmul.mubr.f32.vlgmr.msra.gmra.mrb[16].mxu0 %v462_v56  ;;  %v4037_v5 = vpop.f32.mrb[8].mxu0  ;;  %v4050_v13 = vpop.f32.mrb[8].mxu1  ;;  %897 = vmatprep.mubr.f32.mxu1 %v483_v3  ;;  %v507_v18 = vadd.f32 %v506_v11, %v505_v2  ;;  %v4069_v26 = vsel %vm455_vm13, %v575_v19, 0.0  ;;  %v499_v11 = vrot.slane %v498_v49, 4 }
  0xfe   :  { %3271 = vmatpush3.bf16.msk.msra.mxu0 %vm3810_vm3, %v3752_v41  ;;  %v4048_v12 = vpop.f32.mrb[9].mxu0  ;;  %v4055_v16 = vpop.f32.mrb[9].mxu1  ;;  %898 = vmatmul.mubr.f32.vlgmr.msra.gmra.mrb[16].mxu1 %v476_v7  ;;  %v495_v23 = vadd.f32 %v494_v14, %v493_v4  ;;  %v4078_v35 = vsel %vm455_vm13, %v4037_v5, 0.0  ;;  %v576_v39 = vmul.f32 %v4037_v5, %v4037_v5  ;;  %v4113_v63 = vsel %vm455_vm13, %v4050_v13, 0.0 }
  0xff   :  { %3273 = vmatprep.subr.msk.bf16.mxu0 %vm3830_vm6, %v3752_v41  ;;  %v329_v17 = vpop.f32.mrb[10].mxu0  ;;  %v370_v22 = vpop.f32.mrb[10].mxu1  ;;  %3303 = vmatpush3.bf16.msk.msra.mxu1 %vm3810_vm3, %v3752_v41  ;;  %v508_v25 = vrot.slane %v507_v18, 2  ;;  %v519_v45 = vsel %vm455_vm13, %v4048_v12, 0.0  ;;  %v577_v55 = vmul.f32 %v4048_v12, %v4048_v12  ;;  %v578_v14 = vmul.f32 %v4050_v13, %v4050_v13 }
 0x100   :  { %v330_v21 = vpop.f32.mrb[11].mxu0  ;;  %v371_v24 = vpop.f32.mrb[11].mxu1  ;;  %3305 = vmatprep.subr.msk.bf16.mxu1 %vm3830_vm6, %v3752_v41  ;;  %v496_v29 = vrot.slane %v495_v23, 1  ;;  %v4105_v52 = vsel %vm455_vm13, %v576_v39, 0.0  ;;  %v520_v53 = vrot.slane %v519_v45, 4  ;;  %v533_v17 = vsel %vm455_vm13, %v4055_v16, 0.0 }
 0x101   :  { %v509_v32 = vadd.f32 %v508_v25, %v507_v18  ;;  %v4119_v4 = vsel %vm455_vm13, %v577_v55, 0.0  ;;  %v486_v18 = vadd.f32 %v485_v42, %v484_v27  ;;  %v534_v21 = vrot.slane %v533_v17, 4 }
 0x102   :  { %3275 = vmatpush3.bf16.msk.msra.mxu0 %vm3830_vm6, %v3752_v41  ;;  %v497_v36 = vadd.f32 %v496_v29, %v495_v23  ;;  %v521_v19 = vadd.f32 %v520_v53, %v519_v45  ;;  %v4135_v22 = vsel %vm455_vm13, %v578_v14, 0.0  ;;  %v579_v23 = vmul.f32 %v4055_v16, %v4055_v16 }
 0x103   :  { %3277 = vmatprep.subr.msk.bf16.mxu0 %vm3854_vm9, %v3752_v41  ;;  %3307 = vmatpush3.bf16.msk.msra.mxu1 %vm3830_vm6, %v3752_v41  ;;  %v510_v43 = vrot.slane %v509_v32, 1  ;;  %v535_v24 = vadd.f32 %v534_v21, %v533_v17  ;;  %v500_v25 = vadd.f32 %v499_v11, %v498_v49 }
 0x104   :  { %3309 = vmatprep.subr.msk.bf16.mxu1 %vm3854_vm9, %v3752_v41  ;;  %967 = vmatprep.mubr.f32.mxu0 %v497_v36  ;;  %v4149_v27 = vsel %vm455_vm13, %v579_v23, 0.0  ;;  %v522_v36 = vrot.slane %v521_v19, 2 }
 0x105   :  { %v4085_v40 = vpop.f32.mrb[12].mxu0  ;;  %v4097_v48 = vpop.f32.mrb[12].mxu1  ;;  %v511_v59 = vadd.f32 %v510_v43, %v509_v32  ;;  %v487_v32 = vrot.slane %v486_v18, 2  ;;  %v536_v42 = vrot.slane %v535_v24, 2  ;;  %v501_v43 = vrot.slane %v500_v25, 2 }
 0x106   :  { %3279 = vmatpush3.bf16.msk.msra.mxu0 %vm3854_vm9, %v3752_v41  ;;  %v4095_v46 = vpop.f32.mrb[13].mxu0  ;;  %v4109_v56 = vpop.f32.mrb[13].mxu1  ;;  %v4153_v29 = vsel %vm455_vm13, %v4085_v40, 0.0  ;;  %v580_v39 = vmul.f32 %v4085_v40, %v4085_v40  ;;  %v523_v55 = vadd.f32 %v522_v36, %v521_v19 }
 0x107   :  { %3281 = vmatprep.subr.msk.bf16.mxu0 %vm3874_vm12, %v3752_v41  ;;  %v411_v58 = vpop.f32.mrb[14].mxu0  ;;  %v452_v3 = vpop.f32.mrb[14].mxu1  ;;  %3311 = vmatpush3.bf16.msk.msra.mxu1 %vm3854_vm9, %v3752_v41  ;;  %v547_v49 = vsel %vm455_vm13, %v4095_v46, 0.0  ;;  %v488_v53 = vadd.f32 %v487_v32, %v486_v18  ;;  %v561_v14 = vsel %vm455_vm13, %v4109_v56, 0.0  ;;  %v583_v23 = vmul.f32 %v4109_v56, %v4109_v56 }
 0x108   :  { %v412_v2 = vpop.f32.mrb[15].mxu0  ;;  %v453_v7 = vpop.f32.mrb[15].mxu1  ;;  %3313 = vmatprep.subr.msk.bf16.mxu1 %vm3874_vm12, %v3752_v41  ;;  %1037 = vmatprep.mubr.f32.mxu1 %v511_v59  ;;  %v4170_v45 = vsel %vm455_vm13, %v580_v39, 0.0  ;;  %v581_v58 = vmul.f32 %v4095_v46, %v4095_v46  ;;  %v4181_v59 = vsel %vm455_vm13, %v4097_v48, 0.0  ;;  %v582_v3 = vmul.f32 %v4097_v48, %v4097_v48 }
 0x109   :  { %v537_v2 = vadd.f32 %v536_v42, %v535_v24  ;;  %v502_v7 = vadd.f32 %v501_v43, %v500_v25  ;;  %v489_v17 = vrot.slane %v488_v53, 1  ;;  %v524_v18 = vrot.slane %v523_v55, 1 }
 0x10a   :  { %3283 = vmatpush3.bf16.msk.msra.mxu0 %vm3874_vm12, %v3752_v41  ;;  %v4195_v11 = vsel %vm455_vm13, %v581_v58, 0.0  ;;  %v4203_v19 = vsel %vm455_vm13, %v582_v3, 0.0  ;;  %v4220_v36 = vsel %vm455_vm13, %v583_v23, 0.0  ;;  %v513_v43 = vrot.slane %v4078_v35, 4 }
 0x10b   :  { %3285 = vmatprep.subr.msk.bf16.mxu0 %vm3892_vm15, %v3752_v41  ;;  %3315 = vmatpush3.bf16.msk.msra.mxu1 %vm3874_vm12, %v3752_v41  ;;  %v538_v21 = vrot.slane %v537_v2, 1  ;;  %v503_v24 = vrot.slane %v502_v7, 1  ;;  %v490_v25 = vadd.f32 %v489_v17, %v488_v53  ;;  %v525_v32 = vadd.f32 %v524_v18, %v523_v55 }
 0x10c   :  { %3317 = vmatprep.subr.msk.bf16.mxu1 %vm3892_vm15, %v3752_v41  ;;  %v548_v53 = vrot.slane %v547_v49, 4  ;;  %v562_v55 = vrot.slane %v561_v14, 4  ;;  %v527_v58 = vrot.slane %v4113_v63, 4  ;;  %v669_v38 = vrot.slane %v4170_v45, 4 }
 0x10d   :  { %v539_v39 = vadd.f32 %v538_v21, %v537_v2  ;;  %v504_v42 = vadd.f32 %v503_v24, %v502_v7  ;;  %v514_v2 = vadd.f32 %v513_v43, %v4078_v35  ;;  %v683_v44 = vrot.slane %v4203_v19, 4 }
 0x10e   :  { %3287 = vmatpush3.bf16.msk.msra.mxu0 %vm3892_vm15, %v3752_v41  ;;  %v549_v3 = vadd.f32 %v548_v53, %v547_v49  ;;  %v563_v7 = vadd.f32 %v562_v55, %v561_v14  ;;  %v528_v17 = vadd.f32 %v527_v58, %v4113_v63 }
 0x10f   :  { %3289 = vmatprep.subr.msk.bf16.mxu0 %vm3918_vm2, %v3752_v41  ;;  %3319 = vmatpush3.bf16.msk.msra.mxu1 %vm3892_vm15, %v3752_v41  ;;  %v515_v35 = vrot.slane %v514_v2, 2  ;;  %v684_v47 = vadd.f32 %v683_v44, %v4203_v19 }
 0x110   :  { %3321 = vmatprep.subr.msk.bf16.mxu1 %vm3918_vm2, %v3752_v41  ;;  %v550_v49 = vrot.slane %v549_v3, 2  ;;  %v564_v14 = vrot.slane %v563_v7, 2  ;;  %v529_v63 = vrot.slane %v528_v17, 2 }
 0x111   :  { %v516_v18 = vadd.f32 %v515_v35, %v514_v2  ;;  %v541_v2 = vrot.slane %v4153_v29, 4  ;;  %v685_v19 = vrot.slane %v684_v47, 2 }
 0x112   :  { %3291 = vmatpush3.bf16.msk.msra.mxu0 %vm3918_vm2, %v3752_v41  ;;  %v551_v21 = vadd.f32 %v550_v49, %v549_v3  ;;  %v565_v23 = vadd.f32 %v564_v14, %v563_v7  ;;  %v530_v24 = vadd.f32 %v529_v63, %v528_v17  ;;  %v592_v3 = vrot.slane %v4009_v20, 4 }
 0x113   :  { %3293 = vmatprep.subr.msk.bf16.mxu0 %vm3938_vm7, %v3752_v41  ;;  %3323 = vmatpush3.bf16.msk.msra.mxu1 %vm3918_vm2, %v3752_v41  ;;  %v555_v7 = vrot.slane %v4181_v59, 4  ;;  %v606_v17 = vrot.slane %v4016_v31, 4  ;;  %v542_v35 = vadd.f32 %v541_v2, %v4153_v29  ;;  %v585_v2 = vrot.slane %v3999_v8, 4 }
 0x114   :  { %3325 = vmatprep.subr.msk.bf16.mxu1 %vm3938_vm7, %v3752_v41  ;;  %v593_v49 = vadd.f32 %v592_v3, %v4009_v20  ;;  %v620_v3 = vrot.slane %v4043_v9, 4 }
 0x115   :  { %v556_v14 = vadd.f32 %v555_v7, %v4181_v59  ;;  %v607_v29 = vadd.f32 %v606_v17, %v4016_v31  ;;  %v543_v63 = vrot.slane %v542_v35, 2  ;;  %v599_v7 = vrot.slane %v4004_v15, 4 }
 0x116   :  { %3295 = vmatpush3.bf16.msk.msra.mxu0 %vm3938_vm7, %v3752_v41  ;;  %v594_v20 = vrot.slane %v593_v49, 2  ;;  %v586_v17 = vadd.f32 %v585_v2, %v3999_v8  ;;  %v662_v2 = vrot.slane %v4149_v27, 4 }
 0x117   :  { %3297 = vmatprep.subr.msk.bf16.mxu0 %vm3958_vm11, %v3752_v41  ;;  %3327 = vmatpush3.bf16.msk.msra.mxu1 %vm3938_vm7, %v3752_v41  ;;  %v557_v59 = vrot.slane %v556_v14, 2  ;;  %v544_v31 = vadd.f32 %v543_v63, %v542_v35  ;;  %v634_v35 = vrot.slane %v4069_v26, 4 }
 0x118   :  { %3329 = vmatprep.subr.msk.bf16.mxu1 %vm3958_vm11, %v3752_v41  ;;  %v587_v8 = vrot.slane %v586_v17, 2 }
 0x11a   :  { %3299 = vmatpush3.bf16.msk.msra.mxu0 %vm3958_vm11, %v3752_v41  ;;  %v588_v63 = vadd.f32 %v587_v8, %v586_v17  ;;  %v663_v17 = vadd.f32 %v662_v2, %v4149_v27 }
 0x11b   :  { %3333 = vmatprep.subr.msk.bf16.mxu0 %vm3810_vm3, %v3752_v41  ;;  %3331 = vmatpush3.bf16.msk.msra.mxu1 %vm3958_vm11, %v3752_v41 }
 0x11c   :  { %3365 = vmatprep.subr.msk.bf16.mxu1 %vm3810_vm3, %v3752_v41  ;;  %v664_v27 = vrot.slane %v663_v17, 2 }
 0x11d   :  { %968 = vmatmul.mubr.f32.vlgmr.msra.gmra.mrb[18].mxu0 %v490_v25  ;;  %v517_v25 = vrot.slane %v516_v18, 1 }
 0x11e   :  { %3335 = vmatpush3.bf16.msk.msra.mxu0 %vm3810_vm3, %v3752_v41  ;;  %1107 = vmatprep.mubr.f32.mxu0 %v525_v32  ;;  %v552_v32 = vrot.slane %v551_v21, 1 }
 0x11f   :  { %3337 = vmatprep.subr.msk.bf16.mxu0 %vm3830_vm6, %v3752_v41  ;;  %1038 = vmatmul.mubr.f32.vlgmr.msra.gmra.mrb[18].mxu1 %v504_v42  ;;  %v531_v42 = vrot.slane %v530_v24, 1  ;;  %v518_v43 = vadd.f32 %v517_v25, %v516_v18  ;;  %v608_v18 = vrot.slane %v607_v29, 2 }
 0x120   :  { %3367 = vmatpush3.bf16.msk.msra.mxu1 %vm3810_vm3, %v3752_v41  ;;  %1177 = vmatprep.mubr.f32.mxu1 %v539_v39  ;;  %v566_v39 = vrot.slane %v565_v23, 1  ;;  %v553_v53 = vadd.f32 %v552_v32, %v551_v21  ;;  %v595_v21 = vadd.f32 %v594_v20, %v593_v49  ;;  %v621_v49 = vadd.f32 %v620_v3, %v4043_v9 }
 0x121   :  { %3369 = vmatprep.subr.msk.bf16.mxu1 %vm3830_vm6, %v3752_v41  ;;  %v532_v58 = vadd.f32 %v531_v42, %v530_v24  ;;  %v545_v24 = vrot.slane %v544_v31, 1  ;;  %v609_v25 = vadd.f32 %v608_v18, %v607_v29  ;;  %v635_v29 = vadd.f32 %v634_v35, %v4069_v26 }
 0x122   :  { %3339 = vmatpush3.bf16.msk.msra.mxu0 %vm3830_vm6, %v3752_v41  ;;  %v567_v55 = vadd.f32 %v566_v39, %v565_v23  ;;  %v558_v23 = vadd.f32 %v557_v59, %v556_v14  ;;  %v596_v32 = vrot.slane %v595_v21, 1  ;;  %v600_v14 = vadd.f32 %v599_v7, %v4004_v15 }
 0x123   :  { %3341 = vmatprep.subr.msk.bf16.mxu0 %vm3854_vm9, %v3752_v41  ;;  %v546_v42 = vadd.f32 %v545_v24, %v544_v31  ;;  %v622_v15 = vrot.slane %v621_v49, 2  ;;  %v636_v26 = vrot.slane %v635_v29, 2  ;;  %v589_v31 = vrot.slane %v588_v63, 1 }
 0x124   :  { %3371 = vmatpush3.bf16.msk.msra.mxu1 %vm3830_vm6, %v3752_v41  ;;  %v559_v39 = vrot.slane %v558_v23, 1  ;;  %v601_v9 = vrot.slane %v600_v14, 2 }
 0x125   :  { %3373 = vmatprep.subr.msk.bf16.mxu1 %vm3854_vm9, %v3752_v41  ;;  %v623_v20 = vadd.f32 %v622_v15, %v621_v49  ;;  %v637_v18 = vadd.f32 %v636_v26, %v635_v29  ;;  %v590_v24 = vadd.f32 %v589_v31, %v588_v63  ;;  %v665_v29 = vadd.f32 %v664_v27, %v663_v17 }
 0x126   :  { %3343 = vmatpush3.bf16.msk.msra.mxu0 %vm3854_vm9, %v3752_v41  ;;  %v602_v59 = vadd.f32 %v601_v9, %v600_v14  ;;  %v670_v27 = vadd.f32 %v669_v38, %v4170_v45 }
 0x127   :  { %3345 = vmatprep.subr.msk.bf16.mxu0 %vm3874_vm12, %v3752_v41  ;;  %v666_v26 = vrot.slane %v665_v29, 1 }
 0x128   :  { %3375 = vmatpush3.bf16.msk.msra.mxu1 %vm3854_vm9, %v3752_v41 }
 0x129   :  { %3377 = vmatprep.subr.msk.bf16.mxu1 %vm3874_vm12, %v3752_v41  ;;  %v667_v31 = vadd.f32 %v666_v26, %v665_v29 }
 0x12a   :  { %3347 = vmatpush3.bf16.msk.msra.mxu0 %vm3874_vm12, %v3752_v41 }
 0x12b   :  { %3349 = vmatprep.subr.msk.bf16.mxu0 %vm3892_vm15, %v3752_v41 }
 0x12c   :  { %3379 = vmatpush3.bf16.msk.msra.mxu1 %vm3874_vm12, %v3752_v41 }
 0x12d   :  { %3381 = vmatprep.subr.msk.bf16.mxu1 %vm3892_vm15, %v3752_v41 }
 0x12e   :  { %3351 = vmatpush3.bf16.msk.msra.mxu0 %vm3892_vm15, %v3752_v41 }
 0x12f   :  { %3353 = vmatprep.subr.msk.bf16.mxu0 %vm3918_vm2, %v3752_v41 }
 0x130   :  { %3383 = vmatpush3.bf16.msk.msra.mxu1 %vm3892_vm15, %v3752_v41 }
 0x131   :  { %3385 = vmatprep.subr.msk.bf16.mxu1 %vm3918_vm2, %v3752_v41 }
 0x132   :  { %3355 = vmatpush3.bf16.msk.msra.mxu0 %vm3918_vm2, %v3752_v41 }
 0x133   :  { %3357 = vmatprep.subr.msk.bf16.mxu0 %vm3938_vm7, %v3752_v41 }
 0x134   :  { %3387 = vmatpush3.bf16.msk.msra.mxu1 %vm3918_vm2, %v3752_v41 }
 0x135   :  { %3389 = vmatprep.subr.msk.bf16.mxu1 %vm3938_vm7, %v3752_v41 }
 0x136   :  { %3359 = vmatpush3.bf16.msk.msra.mxu0 %vm3938_vm7, %v3752_v41 }
 0x137   :  { %3361 = vmatprep.subr.msk.bf16.mxu0 %vm3958_vm11, %v3752_v41 }
 0x138   :  { %3391 = vmatpush3.bf16.msk.msra.mxu1 %vm3938_vm7, %v3752_v41 }
 0x139   :  { %3393 = vmatprep.subr.msk.bf16.mxu1 %vm3958_vm11, %v3752_v41 }
 0x13a   :  { %3363 = vmatpush3.bf16.msk.msra.mxu0 %vm3958_vm11, %v3752_v41 }
 0x13b   :  { %3397 = vmatprep.subr.msk.bf16.mxu0 %vm3810_vm3, %v3752_v41 }
 0x13c   :  { %3395 = vmatpush3.bf16.msk.msra.mxu1 %vm3958_vm11, %v3752_v41 }
 0x13d   :  { %1108 = vmatmul.mubr.f32.vlgmr.msra.gmra.mrb[20].mxu0 %v518_v43  ;;  %3429 = vmatprep.subr.msk.bf16.mxu1 %vm3810_vm3, %v3752_v41  ;;  %v610_v43 = vrot.slane %v609_v25, 1 }
 0x13e   :  { %3399 = vmatpush3.bf16.msk.msra.mxu0 %vm3810_vm3, %v3752_v41  ;;  %1247 = vmatprep.mubr.f32.mxu0 %v553_v53  ;;  %v597_v53 = vadd.f32 %v596_v32, %v595_v21  ;;  %v624_v21 = vrot.slane %v623_v20, 1 }
 0x13f   :  { %3401 = vmatprep.subr.msk.bf16.mxu0 %vm3830_vm6, %v3752_v41  ;;  %1178 = vmatmul.mubr.f32.vlgmr.msra.gmra.mrb[20].mxu1 %v532_v58  ;;  %v611_v58 = vadd.f32 %v610_v43, %v609_v25  ;;  %v638_v25 = vrot.slane %v637_v18, 1  ;;  %v613_v43 = vrot.slane %v4031_v62, 4 }
 0x140   :  { %3431 = vmatpush3.bf16.msk.msra.mxu1 %vm3810_vm3, %v3752_v41  ;;  %1317 = vmatprep.mubr.f32.mxu1 %v567_v55  ;;  %v560_v55 = vadd.f32 %v559_v39, %v558_v23  ;;  %v603_v23 = vrot.slane %v602_v59, 1  ;;  %v625_v32 = vadd.f32 %v624_v21, %v623_v20  ;;  %v676_v21 = vrot.slane %v4195_v11, 4 }
 0x141   :  { %3433 = vmatprep.subr.msk.bf16.mxu1 %vm3830_vm6, %v3752_v41 }
 0x142   :  { %3403 = vmatpush3.bf16.msk.msra.mxu0 %vm3830_vm6, %v3752_v41  ;;  %v604_v39 = vadd.f32 %v603_v23, %v602_v59  ;;  %v655_v23 = vrot.slane %v4135_v22, 4 }
 0x143   :  { %3405 = vmatprep.subr.msk.bf16.mxu0 %vm3854_vm9, %v3752_v41 }
 0x144   :  { %3435 = vmatpush3.bf16.msk.msra.mxu1 %vm3830_vm6, %v3752_v41 }
 0x145   :  { %3437 = vmatprep.subr.msk.bf16.mxu1 %vm3854_vm9, %v3752_v41 }
 0x146   :  { %3407 = vmatpush3.bf16.msk.msra.mxu0 %vm3854_vm9, %v3752_v41 }
 0x147   :  { %3409 = vmatprep.subr.msk.bf16.mxu0 %vm3874_vm12, %v3752_v41 }
 0x148   :  { %3439 = vmatpush3.bf16.msk.msra.mxu1 %vm3854_vm9, %v3752_v41 }
 0x149   :  { %3441 = vmatprep.subr.msk.bf16.mxu1 %vm3874_vm12, %v3752_v41 }
 0x14a   :  { %3411 = vmatpush3.bf16.msk.msra.mxu0 %vm3874_vm12, %v3752_v41 }
 0x14b   :  { %3413 = vmatprep.subr.msk.bf16.mxu0 %vm3892_vm15, %v3752_v41 }
 0x14c   :  { %3443 = vmatpush3.bf16.msk.msra.mxu1 %vm3874_vm12, %v3752_v41 }
 0x14d   :  { %3445 = vmatprep.subr.msk.bf16.mxu1 %vm3892_vm15, %v3752_v41 }
 0x14e   :  { %3415 = vmatpush3.bf16.msk.msra.mxu0 %vm3892_vm15, %v3752_v41 }
 0x14f   :  { %3417 = vmatprep.subr.msk.bf16.mxu0 %vm3918_vm2, %v3752_v41 }
 0x150   :  { %3447 = vmatpush3.bf16.msk.msra.mxu1 %vm3892_vm15, %v3752_v41 }
 0x151   :  { %3449 = vmatprep.subr.msk.bf16.mxu1 %vm3918_vm2, %v3752_v41 }
 0x152   :  { %3419 = vmatpush3.bf16.msk.msra.mxu0 %vm3918_vm2, %v3752_v41 }
 0x153   :  { %3421 = vmatprep.subr.msk.bf16.mxu0 %vm3938_vm7, %v3752_v41 }
 0x154   :  { %3451 = vmatpush3.bf16.msk.msra.mxu1 %vm3918_vm2, %v3752_v41 }
 0x155   :  { %3453 = vmatprep.subr.msk.bf16.mxu1 %vm3938_vm7, %v3752_v41 }
 0x156   :  { %3423 = vmatpush3.bf16.msk.msra.mxu0 %vm3938_vm7, %v3752_v41 }
 0x157   :  { %3425 = vmatprep.subr.msk.bf16.mxu0 %vm3958_vm11, %v3752_v41 }
 0x158   :  { %3455 = vmatpush3.bf16.msk.msra.mxu1 %vm3938_vm7, %v3752_v41 }
 0x159   :  { %3457 = vmatprep.subr.msk.bf16.mxu1 %vm3958_vm11, %v3752_v41 }
 0x15a   :  { %3427 = vmatpush3.bf16.msk.msra.mxu0 %vm3958_vm11, %v3752_v41 }
 0x15b   :  { %3461 = vmatprep.subr.msk.bf16.mxu0 %vm3810_vm3, %v3752_v41 }
 0x15c   :  { %3459 = vmatpush3.bf16.msk.msra.mxu1 %vm3958_vm11, %v3752_v41 }
 0x15d   :  { %1248 = vmatmul.mubr.f32.vlgmr.msra.gmra.mrb[22].mxu0 %v546_v42  ;;  %3493 = vmatprep.subr.msk.bf16.mxu1 %vm3810_vm3, %v3752_v41  ;;  %v639_v42 = vadd.f32 %v638_v25, %v637_v18  ;;  %v641_v18 = vrot.slane %v4105_v52, 4  ;;  %v690_v25 = vrot.slane %v4220_v36, 4 }
 0x15e   :  { %3463 = vmatpush3.bf16.msk.msra.mxu0 %vm3810_vm3, %v3752_v41  ;;  %1388 = vmatprep.mubr.f32.mxu0 %v597_v53  ;;  %v648_v53 = vrot.slane %v4119_v4, 4 }
 0x15f   :  { %3465 = vmatprep.subr.msk.bf16.mxu0 %vm3830_vm6, %v3752_v41  ;;  %1318 = vmatmul.mubr.f32.vlgmr.msra.gmra.mrb[22].mxu1 %v560_v55  ;;  %v627_v55 = vrot.slane %v4046_v10, 4 }
 0x160   :  { %3495 = vmatpush3.bf16.msk.msra.mxu1 %vm3810_vm3, %v3752_v41  ;;  %1458 = vmatprep.mubr.f32.mxu1 %v611_v58  ;;  %v614_v58 = vadd.f32 %v613_v43, %v4031_v62  ;;  %v649_v3 = vadd.f32 %v648_v53, %v4119_v4 }
 0x161   :  { %3497 = vmatprep.subr.msk.bf16.mxu1 %vm3830_vm6, %v3752_v41  ;;  %v628_v7 = vadd.f32 %v627_v55, %v4046_v10 }
 0x162   :  { %3467 = vmatpush3.bf16.msk.msra.mxu0 %vm3830_vm6, %v3752_v41  ;;  %v615_v62 = vrot.slane %v614_v58, 2  ;;  %v650_v10 = vrot.slane %v649_v3, 2 }
 0x163   :  { %3469 = vmatprep.subr.msk.bf16.mxu0 %vm3854_vm9, %v3752_v41  ;;  %v629_v4 = vrot.slane %v628_v7, 2 }
 0x164   :  { %3499 = vmatpush3.bf16.msk.msra.mxu1 %vm3830_vm6, %v3752_v41  ;;  %v616_v35 = vadd.f32 %v615_v62, %v614_v58  ;;  %v651_v49 = vadd.f32 %v650_v10, %v649_v3 }
 0x165   :  { %3501 = vmatprep.subr.msk.bf16.mxu1 %vm3854_vm9, %v3752_v41  ;;  %v630_v14 = vadd.f32 %v629_v4, %v628_v7 }
 0x166   :  { %3471 = vmatpush3.bf16.msk.msra.mxu0 %vm3854_vm9, %v3752_v41  ;;  %v617_v8 = vrot.slane %v616_v35, 1  ;;  %v652_v15 = vrot.slane %v651_v49, 1 }
 0x167   :  { %3473 = vmatprep.subr.msk.bf16.mxu0 %vm3874_vm12, %v3752_v41  ;;  %v631_v9 = vrot.slane %v630_v14, 1 }
 0x168   :  { %3503 = vmatpush3.bf16.msk.msra.mxu1 %vm3854_vm9, %v3752_v41  ;;  %v618_v63 = vadd.f32 %v617_v8, %v616_v35  ;;  %v653_v20 = vadd.f32 %v652_v15, %v651_v49  ;;  %v671_v49 = vrot.slane %v670_v27, 2 }
 0x169   :  { %3505 = vmatprep.subr.msk.bf16.mxu1 %vm3874_vm12, %v3752_v41  ;;  %v632_v59 = vadd.f32 %v631_v9, %v630_v14  ;;  %v686_v9 = vadd.f32 %v685_v19, %v684_v47 }
 0x16a   :  { %3475 = vmatpush3.bf16.msk.msra.mxu0 %vm3874_vm12, %v3752_v41  ;;  %v672_v8 = vadd.f32 %v671_v49, %v670_v27 }
 0x16b   :  { %3477 = vmatprep.subr.msk.bf16.mxu0 %vm3892_vm15, %v3752_v41  ;;  %v687_v54 = vrot.slane %v686_v9, 1 }
 0x16c   :  { %3507 = vmatpush3.bf16.msk.msra.mxu1 %vm3874_vm12, %v3752_v41  ;;  %v673_v26 = vrot.slane %v672_v8, 1 }
 0x16d   :  { %3509 = vmatprep.subr.msk.bf16.mxu1 %vm3892_vm15, %v3752_v41 }
 0x16e   :  { %3479 = vmatpush3.bf16.msk.msra.mxu0 %vm3892_vm15, %v3752_v41 }
 0x16f   :  { %3481 = vmatprep.subr.msk.bf16.mxu0 %vm3918_vm2, %v3752_v41 }
 0x170   :  { %3511 = vmatpush3.bf16.msk.msra.mxu1 %vm3892_vm15, %v3752_v41 }
 0x171   :  { %3513 = vmatprep.subr.msk.bf16.mxu1 %vm3918_vm2, %v3752_v41 }
 0x172   :  { %3483 = vmatpush3.bf16.msk.msra.mxu0 %vm3918_vm2, %v3752_v41 }
 0x173   :  { %3485 = vmatprep.subr.msk.bf16.mxu0 %vm3938_vm7, %v3752_v41 }
 0x174   :  { %3515 = vmatpush3.bf16.msk.msra.mxu1 %vm3918_vm2, %v3752_v41 }
 0x175   :  { %3517 = vmatprep.subr.msk.bf16.mxu1 %vm3938_vm7, %v3752_v41 }
 0x176   :  { %3487 = vmatpush3.bf16.msk.msra.mxu0 %vm3938_vm7, %v3752_v41 }
 0x177   :  { %3489 = vmatprep.subr.msk.bf16.mxu0 %vm3958_vm11, %v3752_v41 }
 0x178   :  { %3519 = vmatpush3.bf16.msk.msra.mxu1 %vm3938_vm7, %v3752_v41 }
 0x179   :  { %3521 = vmatprep.subr.msk.bf16.mxu1 %vm3958_vm11, %v3752_v41 }
 0x17a   :  { %3491 = vmatpush3.bf16.msk.msra.mxu0 %vm3958_vm11, %v3752_v41 }
 0x17b   :  { %3525 = vmatprep.subr.msk.bf16.mxu0 %vm3810_vm3, %v3752_v41 }
 0x17c   :  { %3523 = vmatpush3.bf16.msk.msra.mxu1 %vm3958_vm11, %v3752_v41 }
 0x17d   :  { %1389 = vmatmul.mubr.f32.vlgmr.msra.gmra.mrb[24].mxu0 %v590_v24  ;;  %3557 = vmatprep.subr.msk.bf16.mxu1 %vm3810_vm3, %v3752_v41  ;;  %v642_v24 = vadd.f32 %v641_v18, %v4105_v52 }
 0x17e   :  { %3527 = vmatpush3.bf16.msk.msra.mxu0 %vm3810_vm3, %v3752_v41  ;;  %1528 = vmatprep.mubr.f32.mxu0 %v625_v32  ;;  %v677_v32 = vadd.f32 %v676_v21, %v4195_v11 }
 0x17f   :  { %3529 = vmatprep.subr.msk.bf16.mxu0 %vm3830_vm6, %v3752_v41  ;;  %1459 = vmatmul.mubr.f32.vlgmr.msra.gmra.mrb[24].mxu1 %v604_v39  ;;  %v656_v39 = vadd.f32 %v655_v23, %v4135_v22  ;;  %v643_v52 = vrot.slane %v642_v24, 2 }
 0x180   :  { %3559 = vmatpush3.bf16.msk.msra.mxu1 %vm3810_vm3, %v3752_v41  ;;  %1598 = vmatprep.mubr.f32.mxu1 %v639_v42  ;;  %v691_v42 = vadd.f32 %v690_v25, %v4220_v36  ;;  %v678_v22 = vrot.slane %v677_v32, 2 }
 0x181   :  { %3561 = vmatprep.subr.msk.bf16.mxu1 %vm3830_vm6, %v3752_v41  ;;  %v657_v11 = vrot.slane %v656_v39, 2  ;;  %v644_v43 = vadd.f32 %v643_v52, %v642_v24 }
 0x182   :  { %3531 = vmatpush3.bf16.msk.msra.mxu0 %vm3830_vm6, %v3752_v41  ;;  %v692_v36 = vrot.slane %v691_v42, 2  ;;  %v679_v53 = vadd.f32 %v678_v22, %v677_v32 }
 0x183   :  { %3533 = vmatprep.subr.msk.bf16.mxu0 %vm3854_vm9, %v3752_v41  ;;  %v658_v55 = vadd.f32 %v657_v11, %v656_v39  ;;  %v645_v58 = vrot.slane %v644_v43, 1 }
 0x184   :  { %3563 = vmatpush3.bf16.msk.msra.mxu1 %vm3830_vm6, %v3752_v41  ;;  %v693_v2 = vadd.f32 %v692_v36, %v691_v42  ;;  %v680_v3 = vrot.slane %v679_v53, 1 }
 0x185   :  { %3565 = vmatprep.subr.msk.bf16.mxu1 %vm3854_vm9, %v3752_v41  ;;  %v659_v7 = vrot.slane %v658_v55, 1  ;;  %v646_v62 = vadd.f32 %v645_v58, %v644_v43 }
 0x186   :  { %3535 = vmatpush3.bf16.msk.msra.mxu0 %vm3854_vm9, %v3752_v41  ;;  %v694_v17 = vrot.slane %v693_v2, 1  ;;  %v681_v10 = vadd.f32 %v680_v3, %v679_v53 }
 0x187   :  { %3537 = vmatprep.subr.msk.bf16.mxu0 %vm3874_vm12, %v3752_v41  ;;  %v660_v4 = vadd.f32 %v659_v7, %v658_v55 }
 0x188   :  { %3567 = vmatpush3.bf16.msk.msra.mxu1 %vm3854_vm9, %v3752_v41  ;;  %v695_v35 = vadd.f32 %v694_v17, %v693_v2  ;;  %v1891_v17 = vsub.s32 0, %v3794_v30 }
 0x189   :  { %3569 = vmatprep.subr.msk.bf16.mxu1 %vm3874_vm12, %v3752_v41 }
 0x18a   :  { %3539 = vmatpush3.bf16.msk.msra.mxu0 %vm3874_vm12, %v3752_v41 }
 0x18b   :  { %3541 = vmatprep.subr.msk.bf16.mxu0 %vm3892_vm15, %v3752_v41 }
 0x18c   :  { %3571 = vmatpush3.bf16.msk.msra.mxu1 %vm3874_vm12, %v3752_v41 }
 0x18d   :  { %3573 = vmatprep.subr.msk.bf16.mxu1 %vm3892_vm15, %v3752_v41 }
 0x18e   :  { %3543 = vmatpush3.bf16.msk.msra.mxu0 %vm3892_vm15, %v3752_v41 }
 0x18f   :  { %3545 = vmatprep.subr.msk.bf16.mxu0 %vm3918_vm2, %v3752_v41 }
 0x190   :  { %3575 = vmatpush3.bf16.msk.msra.mxu1 %vm3892_vm15, %v3752_v41 }
 0x191   :  { %3577 = vmatprep.subr.msk.bf16.mxu1 %vm3918_vm2, %v3752_v41 }
 0x192   :  { %3547 = vmatpush3.bf16.msk.msra.mxu0 %vm3918_vm2, %v3752_v41 }
 0x193   :  { %3549 = vmatprep.subr.msk.bf16.mxu0 %vm3938_vm7, %v3752_v41 }
 0x194   :  { %3579 = vmatpush3.bf16.msk.msra.mxu1 %vm3918_vm2, %v3752_v41 }
 0x195   :  { %3581 = vmatprep.subr.msk.bf16.mxu1 %vm3938_vm7, %v3752_v41 }
 0x196   :  { %3551 = vmatpush3.bf16.msk.msra.mxu0 %vm3938_vm7, %v3752_v41 }
 0x197   :  { %3553 = vmatprep.subr.msk.bf16.mxu0 %vm3958_vm11, %v3752_v41 }
 0x198   :  { %3583 = vmatpush3.bf16.msk.msra.mxu1 %vm3938_vm7, %v3752_v41 }
 0x199   :  { %3585 = vmatprep.subr.msk.bf16.mxu1 %vm3958_vm11, %v3752_v41 }
 0x19a   :  { %3555 = vmatpush3.bf16.msk.msra.mxu0 %vm3958_vm11, %v3752_v41 }
 0x19b   :  { %3589 = vmatprep.subr.msk.bf16.mxu0 %vm3810_vm3, %v3752_v41 }
 0x19c   :  { %3587 = vmatpush3.bf16.msk.msra.mxu1 %vm3958_vm11, %v3752_v41 }
 0x19d   :  { %1529 = vmatmul.mubr.f32.vlgmr.msra.gmra.mrb[26].mxu0 %v618_v63  ;;  %3621 = vmatprep.subr.msk.bf16.mxu1 %vm3810_vm3, %v3752_v41 }
 0x19e   :  { %3591 = vmatpush3.bf16.msk.msra.mxu0 %vm3810_vm3, %v3752_v41  ;;  %1668 = vmatprep.mubr.f32.mxu0 %v653_v20  ;;  %v674_v20 = vadd.f32 %v673_v26, %v672_v8 }
 0x19f   :  { %3593 = vmatprep.subr.msk.bf16.mxu0 %vm3830_vm6, %v3752_v41  ;;  %1599 = vmatmul.mubr.f32.vlgmr.msra.gmra.mrb[26].mxu1 %v632_v59  ;;  %v688_v59 = vadd.f32 %v687_v54, %v686_v9 }
 0x1a0   :  { %3623 = vmatpush3.bf16.msk.msra.mxu1 %vm3810_vm3, %v3752_v41  ;;  %1738 = vmatprep.mubr.f32.mxu1 %v667_v31 }
 0x1a1   :  { %3625 = vmatprep.subr.msk.bf16.mxu1 %vm3830_vm6, %v3752_v41 }
 0x1a2   :  { %3595 = vmatpush3.bf16.msk.msra.mxu0 %vm3830_vm6, %v3752_v41 }
 0x1a3   :  { %3597 = vmatprep.subr.msk.bf16.mxu0 %vm3854_vm9, %v3752_v41 }
 0x1a4   :  { %3627 = vmatpush3.bf16.msk.msra.mxu1 %vm3830_vm6, %v3752_v41 }
 0x1a5   :  { %3629 = vmatprep.subr.msk.bf16.mxu1 %vm3854_vm9, %v3752_v41 }
 0x1a6   :  { %3599 = vmatpush3.bf16.msk.msra.mxu0 %vm3854_vm9, %v3752_v41 }
 0x1a7   :  { %3601 = vmatprep.subr.msk.bf16.mxu0 %vm3874_vm12, %v3752_v41 }
 0x1a8   :  { %3631 = vmatpush3.bf16.msk.msra.mxu1 %vm3854_vm9, %v3752_v41 }
 0x1a9   :  { %3633 = vmatprep.subr.msk.bf16.mxu1 %vm3874_vm12, %v3752_v41 }
 0x1aa   :  { %3603 = vmatpush3.bf16.msk.msra.mxu0 %vm3874_vm12, %v3752_v41 }
 0x1ab   :  { %3605 = vmatprep.subr.msk.bf16.mxu0 %vm3892_vm15, %v3752_v41 }
 0x1ac   :  { %3635 = vmatpush3.bf16.msk.msra.mxu1 %vm3874_vm12, %v3752_v41 }
 0x1ad   :  { %3637 = vmatprep.subr.msk.bf16.mxu1 %vm3892_vm15, %v3752_v41 }
 0x1ae   :  { %3607 = vmatpush3.bf16.msk.msra.mxu0 %vm3892_vm15, %v3752_v41 }
 0x1af   :  { %3609 = vmatprep.subr.msk.bf16.mxu0 %vm3918_vm2, %v3752_v41 }
 0x1b0   :  { %3639 = vmatpush3.bf16.msk.msra.mxu1 %vm3892_vm15, %v3752_v41 }
 0x1b1   :  { %3641 = vmatprep.subr.msk.bf16.mxu1 %vm3918_vm2, %v3752_v41 }
 0x1b2   :  { %3611 = vmatpush3.bf16.msk.msra.mxu0 %vm3918_vm2, %v3752_v41 }
 0x1b3   :  { %3613 = vmatprep.subr.msk.bf16.mxu0 %vm3938_vm7, %v3752_v41 }
 0x1b4   :  { %3643 = vmatpush3.bf16.msk.msra.mxu1 %vm3918_vm2, %v3752_v41 }
 0x1b5   :  { %3645 = vmatprep.subr.msk.bf16.mxu1 %vm3938_vm7, %v3752_v41 }
 0x1b6   :  { %3615 = vmatpush3.bf16.msk.msra.mxu0 %vm3938_vm7, %v3752_v41 }
 0x1b7   :  { %3617 = vmatprep.subr.msk.bf16.mxu0 %vm3958_vm11, %v3752_v41 }
 0x1b8   :  { %3647 = vmatpush3.bf16.msk.msra.mxu1 %vm3938_vm7, %v3752_v41 }
 0x1b9   :  { %3649 = vmatprep.subr.msk.bf16.mxu1 %vm3958_vm11, %v3752_v41 }
 0x1ba   :  { %3619 = vmatpush3.bf16.msk.msra.mxu0 %vm3958_vm11, %v3752_v41 }
 0x1bb   :  { %3653 = vmatprep.subr.msk.bf16.mxu0 %vm3810_vm3, %v3752_v41 }
 0x1bc   :  { %3651 = vmatpush3.bf16.msk.msra.mxu1 %vm3958_vm11, %v3752_v41 }
 0x1bd   :  { %1669 = vmatmul.mubr.f32.vlgmr.msra.gmra.mrb[28].mxu0 %v646_v62  ;;  %3685 = vmatprep.subr.msk.bf16.mxu1 %vm3810_vm3, %v3752_v41 }
 0x1be   :  { %3655 = vmatpush3.bf16.msk.msra.mxu0 %vm3810_vm3, %v3752_v41  ;;  %1808 = vmatprep.mubr.f32.mxu0 %v681_v10 }
 0x1bf   :  { %3657 = vmatprep.subr.msk.bf16.mxu0 %vm3830_vm6, %v3752_v41  ;;  %1739 = vmatmul.mubr.f32.vlgmr.msra.gmra.mrb[28].mxu1 %v660_v4 }
 0x1c0   :  { %3687 = vmatpush3.bf16.msk.msra.mxu1 %vm3810_vm3, %v3752_v41  ;;  %1878 = vmatprep.mubr.f32.mxu1 %v695_v35 }
 0x1c1   :  { %3689 = vmatprep.subr.msk.bf16.mxu1 %vm3830_vm6, %v3752_v41 }
 0x1c2   :  { %3659 = vmatpush3.bf16.msk.msra.mxu0 %vm3830_vm6, %v3752_v41 }
 0x1c3   :  { %3661 = vmatprep.subr.msk.bf16.mxu0 %vm3854_vm9, %v3752_v41 }
 0x1c4   :  { %3691 = vmatpush3.bf16.msk.msra.mxu1 %vm3830_vm6, %v3752_v41 }
 0x1c5   :  { %3693 = vmatprep.subr.msk.bf16.mxu1 %vm3854_vm9, %v3752_v41 }
 0x1c6   :  { %3663 = vmatpush3.bf16.msk.msra.mxu0 %vm3854_vm9, %v3752_v41 }
 0x1c7   :  { %3665 = vmatprep.subr.msk.bf16.mxu0 %vm3874_vm12, %v3752_v41 }
 0x1c8   :  { %3695 = vmatpush3.bf16.msk.msra.mxu1 %vm3854_vm9, %v3752_v41 }
 0x1c9   :  { %3697 = vmatprep.subr.msk.bf16.mxu1 %vm3874_vm12, %v3752_v41 }
 0x1ca   :  { %3667 = vmatpush3.bf16.msk.msra.mxu0 %vm3874_vm12, %v3752_v41 }
 0x1cb   :  { %3669 = vmatprep.subr.msk.bf16.mxu0 %vm3892_vm15, %v3752_v41 }
 0x1cc   :  { %3699 = vmatpush3.bf16.msk.msra.mxu1 %vm3874_vm12, %v3752_v41 }
 0x1cd   :  { %3701 = vmatprep.subr.msk.bf16.mxu1 %vm3892_vm15, %v3752_v41 }
 0x1ce   :  { %3671 = vmatpush3.bf16.msk.msra.mxu0 %vm3892_vm15, %v3752_v41 }
 0x1cf   :  { %3673 = vmatprep.subr.msk.bf16.mxu0 %vm3918_vm2, %v3752_v41 }
 0x1d0   :  { %v2676_v45 = vpop.f32.mrb[16].mxu0  ;;  %3703 = vmatpush3.bf16.msk.msra.mxu1 %vm3892_vm15, %v3752_v41 }
 0x1d1   :  { %v2677_v50 = vpop.f32.mrb[17].mxu0  ;;  %3705 = vmatprep.subr.msk.bf16.mxu1 %vm3918_vm2, %v3752_v41  ;;  %v2711_v29 = vpop.f32.mrb[16].mxu1 }
 0x1d2   :  { %v2678_v14 = vadd.f32 %v2677_v50, %v2676_v45  ;;  %3675 = vmatpush3.bf16.msk.msra.mxu0 %vm3918_vm2, %v3752_v41  ;;  %v2712_v15 = vpop.f32.mrb[17].mxu1 }
 0x1d3   :  { %3677 = vmatprep.subr.msk.bf16.mxu0 %vm3938_vm7, %v3752_v41  ;;  %v2713_v51 = vadd.f32 %v2712_v15, %v2711_v29 }
 0x1d4   :  { %3707 = vmatpush3.bf16.msk.msra.mxu1 %vm3918_vm2, %v3752_v41 }
 0x1d5   :  { %3709 = vmatprep.subr.msk.bf16.mxu1 %vm3938_vm7, %v3752_v41  ;;  %v900_v63 = vadd.f32 %v2713_v51, %v2678_v14 }
 0x1d6   :  { %3679 = vmatpush3.bf16.msk.msra.mxu0 %vm3938_vm7, %v3752_v41 }
 0x1d7   :  { %3681 = vmatprep.subr.msk.bf16.mxu0 %vm3958_vm11, %v3752_v41 }
 0x1d8   :  { %3711 = vmatpush3.bf16.msk.msra.mxu1 %vm3938_vm7, %v3752_v41 }
 0x1d9   :  { %3713 = vmatprep.subr.msk.bf16.mxu1 %vm3958_vm11, %v3752_v41 }
 0x1da   :  { %3683 = vmatpush3.bf16.msk.msra.mxu0 %vm3958_vm11, %v3752_v41 }
 0x1dc   :  { %3715 = vmatpush3.bf16.msk.msra.mxu1 %vm3958_vm11, %v3752_v41 }
 0x1dd   :  { %1809 = vmatmul.mubr.f32.vlgmr.msra.gmra.mrb[30].mxu0 %v674_v20 }
 0x1df   :  { %1879 = vmatmul.mubr.f32.vlgmr.msra.gmra.mrb[30].mxu1 %v688_v59 }
 0x1f0   :  { %v2746_v31 = vpop.f32.mrb[18].mxu0 }
 0x1f1   :  { %v2747_v57 = vpop.f32.mrb[19].mxu0 }
 0x1f2   :  { %v2748_v18 = vadd.f32 %v2747_v57, %v2746_v31  ;;  %v2781_v21 = vpop.f32.mrb[18].mxu1 }
 0x1f3   :  { %v2782_v24 = vpop.f32.mrb[19].mxu1 }
 0x1f4   :  { %v970_v23 = vadd.f32 %v2748_v18, %v900_v63  ;;  %v2783_v25 = vadd.f32 %v2782_v24, %v2781_v21 }
 0x1f6   :  { %v1040_v32 = vadd.f32 %v2783_v25, %v970_v23 }
 0x210   :  { %v2816_v39 = vpop.f32.mrb[20].mxu0 }
 0x211   :  { %v2817_v52 = vpop.f32.mrb[21].mxu0 }
 0x212   :  { %v2818_v42 = vadd.f32 %v2817_v52, %v2816_v39  ;;  %v2851_v22 = vpop.f32.mrb[20].mxu1 }
 0x213   :  { %v2852_v43 = vpop.f32.mrb[21].mxu1 }
 0x214   :  { %v1110_v11 = vadd.f32 %v2818_v42, %v1040_v32  ;;  %v2853_v36 = vadd.f32 %v2852_v43, %v2851_v22 }
 0x216   :  { %v1180_v60 = vadd.f32 %v2853_v36, %v1110_v11 }
 0x230   :  { %v2886_v41 = vpop.f32.mrb[22].mxu0 }
 0x231   :  { %v2887_v53 = vpop.f32.mrb[23].mxu0 }
 0x232   :  { %v2888_v55 = vadd.f32 %v2887_v53, %v2886_v41  ;;  %v2921_v58 = vpop.f32.mrb[22].mxu1 }
 0x233   :  { %v2922_v3 = vpop.f32.mrb[23].mxu1 }
 0x234   :  { %v1250_v2 = vadd.f32 %v2888_v55, %v1180_v60  ;;  %v2923_v7 = vadd.f32 %v2922_v3, %v2921_v58  ;;  %v3753_v60 = vmov 1966171168  }
 0x235   :  { %v1982_v41 = vunpack.c.l.s4 %v3753_v60 }
 0x236   :  { %v1320_v62 = vadd.f32 %v2923_v7, %v1250_v2 }
 0x237   :  { %v1983_v53 = vunpack.c.0.s8 %v1982_v41 }
 0x238   :  { %v1323_v10 = vmul.f32 0.03125, %v1320_v62 }
 0x239   :  { %v1986_v2 = vsub.s32 %v1983_v53, %v3794_v30 }
 0x23a   :  { %v4839_v4 = vrot.slane %v1323_v10, %v1891_v17  ;;  %v1885_v22 = vmul.f32 %v1323_v10, %v1323_v10 }
 0x23c   :  { %v1893_v35 = vsub.f32 %v3980_v61, %v4839_v4  ;;  %v1894_v38 = vsub.f32 %v3988_v1, %v4839_v4  ;;  %v1895_v44 = vsub.f32 %v3986_v0, %v4839_v4  ;;  %v1896_v27 = vsub.f32 %v3996_v6, %v4839_v4 }
 0x23d   :  { %v1897_v47 = vsub.f32 %v4013_v28, %v4839_v4  ;;  %v1898_v49 = vsub.f32 %v4018_v33, %v4839_v4  ;;  %v1899_v45 = vsub.f32 %v4020_v34, %v4839_v4  ;;  %v1900_v61 = vsub.f32 %v4022_v37, %v4839_v4 }
 0x23e   :  { %v1901_v1 = vsub.f32 %v4037_v5, %v4839_v4  ;;  %v1902_v0 = vsub.f32 %v4048_v12, %v4839_v4  ;;  %v1903_v6 = vsub.f32 %v4050_v13, %v4839_v4  ;;  %v1904_v28 = vsub.f32 %v4055_v16, %v4839_v4 }
 0x23f   :  { %v1905_v33 = vsub.f32 %v4085_v40, %v4839_v4  ;;  %v1906_v34 = vsub.f32 %v4095_v46, %v4839_v4  ;;  %v1907_v37 = vsub.f32 %v4097_v48, %v4839_v4  ;;  %v1908_v5 = vsub.f32 %v4109_v56, %v4839_v4 }
 0x250   :  { %v2956_v50 = vpop.f32.mrb[24].mxu0 }
 0x251   :  { %v2957_v12 = vpop.f32.mrb[25].mxu0 }
 0x252   :  { %v2958_v19 = vadd.f32 %v2957_v12, %v2956_v50  ;;  %v2991_v14 = vpop.f32.mrb[24].mxu1 }
 0x253   :  { %v2992_v13 = vpop.f32.mrb[25].mxu1 }
 0x254   :  { %v2993_v8 = vadd.f32 %v2992_v13, %v2991_v14 }
 0x256   :  { %v1461_v29 = vadd.f32 %v2993_v8, %v2958_v19 }
 0x270   :  { %v3026_v16 = vpop.f32.mrb[26].mxu0 }
 0x271   :  { %v3027_v15 = vpop.f32.mrb[27].mxu0 }
 0x272   :  { %v3028_v51 = vadd.f32 %v3027_v15, %v3026_v16  ;;  %v3061_v40 = vpop.f32.mrb[26].mxu1 }
 0x273   :  { %v3062_v63 = vpop.f32.mrb[27].mxu1 }
 0x274   :  { %v1531_v9 = vadd.f32 %v3028_v51, %v1461_v29  ;;  %v3063_v46 = vadd.f32 %v3062_v63, %v3061_v40 }
 0x276   :  { %v1601_v26 = vadd.f32 %v3063_v46, %v1531_v9 }
 0x290   :  { %v3096_v54 = vpop.f32.mrb[28].mxu0 }
 0x291   :  { %v3097_v48 = vpop.f32.mrb[29].mxu0 }
 0x292   :  { %v3098_v20 = vadd.f32 %v3097_v48, %v3096_v54  ;;  %v3131_v59 = vpop.f32.mrb[28].mxu1 }
 0x293   :  { %v3132_v31 = vpop.f32.mrb[29].mxu1 }
 0x294   :  { %v1671_v56 = vadd.f32 %v3098_v20, %v1601_v26  ;;  %v3133_v57 = vadd.f32 %v3132_v31, %v3131_v59 }
 0x296   :  { %v1741_v18 = vadd.f32 %v3133_v57, %v1671_v56 }
 0x2b0   :  { %v3166_v21 = vpop.f32.mrb[30].mxu0 }
 0x2b1   :  { %v3167_v23 = vpop.f32.mrb[31].mxu0 }
 0x2b2   :  { %v3168_v24 = vadd.f32 %v3167_v23, %v3166_v21  ;;  %v3201_v25 = vpop.f32.mrb[30].mxu1 }
 0x2b3   :  { %v3202_v39 = vpop.f32.mrb[31].mxu1 }
 0x2b4   :  { %v1811_v32 = vadd.f32 %v3168_v24, %v1741_v18  ;;  %v3203_v52 = vadd.f32 %v3202_v39, %v3201_v25 }
 0x2b6   :  { %v1881_v42 = vadd.f32 %v3203_v52, %v1811_v32 }
 0x2b8   :  { %v1884_v11 = vmul.f32 0.03125, %v1881_v42 }
 0x2ba   :  { %v1886_v43 = vsub.f32 %v1884_v11, %v1885_v22 }
 0x2bc   :  { %v1887_v36 = vadd.f32 1e-05, %v1886_v43 }
 0x2be   :  { %3722 = vrsqrt.f32 %v1887_v36 }
 0x2c8   :  { %v3723_v55 = vpop.eup %3722 }
 0x2c9   :  { %v1912_v58 = vrot.slane %v3723_v55, %v1891_v17 }
 0x2cb   :  { %v1913_v3 = vmul.f32 %v1912_v58, %v1893_v35  ;;  %v1914_v7 = vmul.f32 %v1912_v58, %v1894_v38  ;;  %v1915_v62 = vmul.f32 %v1912_v58, %v1895_v44  ;;  %v1916_v4 = vmul.f32 %v1912_v58, %v1896_v27 }
 0x2cc   :  { %v1917_v50 = vmul.f32 %v1912_v58, %v1897_v47  ;;  %v1918_v12 = vmul.f32 %v1912_v58, %v1898_v49  ;;  %v1919_v19 = vmul.f32 %v1912_v58, %v1899_v45  ;;  %v1920_v14 = vmul.f32 %v1912_v58, %v1900_v61 }
 0x2cd   :  { %v1921_v10 = vmul.f32 %v1912_v58, %v1901_v1  ;;  %v1922_v13 = vmul.f32 %v1912_v58, %v1902_v0  ;;  %v1923_v8 = vmul.f32 %v1912_v58, %v1903_v6  ;;  %v1924_v29 = vmul.f32 %v1912_v58, %v1904_v28 }
 0x2ce   :  { %v1925_v16 = vmul.f32 %v1912_v58, %v1905_v33  ;;  %v1926_v15 = vmul.f32 %v1912_v58, %v1906_v34  ;;  %v1927_v51 = vmul.f32 %v1912_v58, %v1907_v37  ;;  %v1928_v40 = vmul.f32 %v1912_v58, %v1908_v5 }
 0x2cf   :  { %v1929_v9 = vmax.f32 %v1913_v3, 0.0  ;;  %v1930_v17 = vmax.f32 %v1914_v7, 0.0  ;;  %v1931_v63 = vmax.f32 %v1915_v62, 0.0  ;;  %v1932_v30 = vmax.f32 %v1916_v4, 0.0 }
 0x2d0   :  { %v1933_v35 = vmax.f32 %v1917_v50, 0.0  ;;  %v1934_v38 = vmax.f32 %v1918_v12, 0.0  ;;  %v1935_v44 = vmax.f32 %v1919_v19, 0.0  ;;  %v1936_v27 = vmax.f32 %v1920_v14, 0.0 }
 0x2d1   :  { %v1937_v47 = vmax.f32 %v1921_v10, 0.0  ;;  %v1938_v49 = vmax.f32 %v1922_v13, 0.0  ;;  %v1939_v45 = vmax.f32 %v1923_v8, 0.0  ;;  %v1940_v61 = vmax.f32 %v1924_v29, 0.0 }
 0x2d2   :  { %v1941_v1 = vmax.f32 %v1925_v16, 0.0  ;;  %v1942_v0 = vmax.f32 %v1926_v15, 0.0  ;;  %v1943_v6 = vmax.f32 %v1927_v51, 0.0  ;;  %v1944_v28 = vmax.f32 %v1928_v40, 0.0 }
 0x2d3   :  { %v2636_v33 = vpack.c.bf16 %v1930_v17, %v1929_v9  ;;  %v2637_v34 = vpack.c.bf16 %v1932_v30, %v1931_v63  ;;  %v2638_v37 = vpack.c.bf16 %v1934_v38, %v1933_v35  ;;  %v2639_v5 = vpack.c.bf16 %v1936_v27, %v1935_v44 }
 0x2d4   :  { %v2640_v46 = vpack.c.bf16 %v1938_v49, %v1937_v47  ;;  %v2641_v26 = vpack.c.bf16 %v1940_v61, %v1939_v45  ;;  %v2642_v54 = vpack.c.bf16 %v1942_v0, %v1941_v1  ;;  %v2643_v48 = vpack.c.bf16 %v1944_v28, %v1943_v6 }
 0x2d5   :  { %v1987_v20 = vrot.slane %v2636_v33, %v1986_v2  ;;  %v1994_v59 = vrot.slane %v2637_v34, %v1986_v2  ;;  %v2001_v56 = vrot.slane %v2638_v37, %v1986_v2  ;;  %v2008_v31 = vrot.slane %v2639_v5, %v1986_v2 }
 0x2d6   :  { %v2036_v57 = vrot.slane %v2640_v46, %v1986_v2  ;;  %v2043_v18 = vrot.slane %v2641_v26, %v1986_v2  ;;  %v2050_v21 = vrot.slane %v2642_v54, %v1986_v2  ;;  %v2057_v23 = vrot.slane %v2643_v48, %v1986_v2 }
 0x2d7   :  { %v2009_v24 = vcombine.low %v1987_v20, %v1994_v59  ;;  %v2010_v25 = vcombine.low %v2001_v56, %v2008_v31 }
 0x2d8   :  { %v2058_v32 = vcombine.low %v2036_v57, %v2043_v18  ;;  %v2059_v39 = vcombine.low %v2050_v21, %v2057_v23 }
 0x2d9   :  { %v2017_v52 = vrot.slane %v2009_v24, %v1986_v2  ;;  %v2024_v42 = vrot.slane %v2010_v25, %v1986_v2 }
 0x2da   :  { %v2066_v22 = vrot.slane %v2058_v32, %v1986_v2  ;;  %v2073_v11 = vrot.slane %v2059_v39, %v1986_v2 }
 0x2db   :  { %v2025_v43 = vcombine.low %v2017_v52, %v2024_v42 }
 0x2dc   :  { %v2074_v36 = vcombine.low %v2066_v22, %v2073_v11 }
 0x2dd   :  { %2077 = vst [vmem:[%s4882_s2] sm:$0xff] %v2025_v43 }
 0x2de   :  { %2078 = vst [vmem:[%s4882_s2 + $0x8] sm:$0xff] %v2074_v36 }
 0x2df   :  { %2083 = vsyncpa [#allocation3], 1 }

// kernel: decoder_forward.8
= control target key start
LH: loop header
LB: loop body
LE: loop exit
PB: predicated region body
PF: predicated region fallthrough
CT: control target
= control target key end

     0   :  { %v713_v0 = vmov 0   ;;  %vm152_vm0 = vcmask 523264   ;;  %v280_v21 = vlaneseq  ;;  %v714_v25 = vmov 0.0|0.0   ;;  %s947_s1 = inlined_call_operand.vmem [shape: bf16[192,64], index: 1, kind: input, shape index: {}]   ;;  %s948_s0 = inlined_call_operand.vmem [shape: bf16[64,192], index: 0, kind: input, shape index: {}]   ;;  %s949_s2 = inlined_call_operand.vmem [shape: bf16[64,64], index: 2, kind: output, shape index: {}]  }
   0x1   :  { %165 = vmatprep.subr.bf16.mxu0 %v713_v0  ;;  %v687_v1 = vld [vmem:[%s947_s1] sm:$0xff]   ;;  %v688_v2 = vld [vmem:[%s947_s1 + $0x8] sm:$0xff]   ;;  %v689_v3 = vld [vmem:[%s947_s1 + $0x10] sm:$0xff]   ;;  %657 = vmatprep.subr.bf16.mxu1 %v714_v25  ;;  %v715_v27 = vmov 1.0|1.0   ;;  %vm716_vm7 = vmmov 0  }
   0x2   :  { %166 = vmatpush1.bf16.msra.mxu0 %v687_v1  ;;  %v690_v4 = vld [vmem:[%s947_s1 + $0x18] sm:$0xff]   ;;  %v701_v5 = vld [vmem:[%s948_s0 + $0x4] ss:$8 sps:$4 sm:$0xff]   ;;  %v693_v8 = vld [vmem:[%s947_s1 + $0x30] sm:$0xff]   ;;  %v798_v22 = vshrl.u32 %v280_v21, 7  ;;  %v286_v24 = vand.u32 127, %v280_v21 }
   0x3   :  { %167 = vmatprep.subr.bf16.mxu0 %v713_v0  ;;  %v691_v6 = vld [vmem:[%s947_s1 + $0x20] sm:$0xff]   ;;  %559 = vmatprep.mubr.msk.bf16.mxu0 %vm152_vm0, %v701_v5  ;;  %v692_v7 = vld [vmem:[%s947_s1 + $0x28] sm:$0xff]   ;;  %v694_v9 = vld [vmem:[%s947_s1 + $0x38] sm:$0xff]   ;;  %v717_v31 = vmov 0.0   ;;  %vm455_vm8 = vcmask 261120   ;;  %vm526_vm9 = vcmask 519168  }
   0x4   :  { %v695_v10 = vld [vmem:[%s947_s1 + $0x40] sm:$0xff]   ;;  %v696_v11 = vld [vmem:[%s947_s1 + $0x48] sm:$0xff]   ;;  %v697_v12 = vld [vmem:[%s947_s1 + $0x50] sm:$0xff]   ;;  %v282_v23 = vadd.s32 8, %v798_v22  ;;  %vm287_vm1 = vcmp.eq.s32.totalorder %v798_v22, %v286_v24  ;;  %v283_v28 = vadd.s32 16, %v798_v22  ;;  %v284_v29 = vadd.s32 24, %v798_v22  ;;  %635 = vmatprep.mubr.msk.f32.mxu1 %vm716_vm7, %v717_v31 }
   0x5   :  { %v698_v13 = vld [vmem:[%s947_s1 + $0x58] sm:$0xff]   ;;  %v699_v14 = vld [vmem:[%s948_s0] ss:$8 sps:$4 sm:$0xff]   ;;  %v705_v17 = vld [vmem:[%s948_s0 + $0x24] ss:$8 sps:$4 sm:$0xff]  }
   0x6   :  { %168 = vmatpush1.bf16.msra.mxu0 %v688_v2  ;;  %v702_v15 = vld [vmem:[%s948_s0 + $0x14] ss:$8 sps:$4 sm:$0xff]   ;;  %v704_v16 = vld [vmem:[%s948_s0 + $0x10] ss:$8 sps:$4 sm:$0xff]   ;;  %v707_v18 = vld [vmem:[%s948_s0 + $0x20] ss:$8 sps:$4 sm:$0xff]   ;;  %vm288_vm2 = vcmp.eq.s32.totalorder %v282_v23, %v286_v24  ;;  %vm289_vm4 = vcmp.eq.s32.totalorder %v283_v28, %v286_v24  ;;  %vm290_vm5 = vcmp.eq.s32.totalorder %v284_v29, %v286_v24 }
   0x7   :  { %169 = vmatprep.subr.bf16.mxu0 %v713_v0  ;;  %v708_v19 = vld [vmem:[%s948_s0 + $0x34] ss:$8 sps:$4 sm:$0xff]   ;;  %v710_v20 = vld [vmem:[%s948_s0 + $0x30] ss:$8 sps:$4 sm:$0xff]   ;;  %vm803_vm3 = vmpackc.low %vm288_vm2, %vm287_vm1  ;;  %s718_s0 = smov 32  }
   0x8   :  { %659 = vmatpush3.bf16.msk.msra.mxu1 %vm803_vm3, %v715_v27  ;;  %vm813_vm6 = vmpackc.low %vm290_vm5, %vm289_vm4 }
   0x9   :  { %660 = vmatprep.subr.bf16.mxu1 %v714_v25 }
   0xa   :  { %170 = vmatpush1.bf16.msra.mxu0 %v689_v3 }
   0xb   :  { %171 = vmatprep.subr.bf16.mxu0 %v713_v0 }
   0xc   :  { %662 = vmatpush3.bf16.msk.msra.mxu1 %vm813_vm6, %v715_v27 }
   0xd   :  { %663 = vmatprep.subr.bf16.mxu1 %v714_v25 }
   0xe   :  { %172 = vmatpush1.bf16.msra.mxu0 %v690_v4 }
   0xf   :  { %173 = vmatprep.subr.bf16.mxu0 %v713_v0 }
  0x10   :  { %665 = vmatpush3.bf16.msk.msra.mxu1 %vm803_vm3, %v715_v27 }
  0x11   :  { %666 = vmatprep.subr.bf16.mxu1 %v714_v25 }
  0x12   :  { %174 = vmatpush1.bf16.msra.mxu0 %v691_v6 }
  0x13   :  { %175 = vmatprep.subr.bf16.mxu0 %v713_v0 }
  0x14   :  { %668 = vmatpush3.bf16.msk.msra.mxu1 %vm813_vm6, %v715_v27 }
  0x15   :  { %669 = vmatprep.subr.bf16.mxu1 %v714_v25 }
  0x16   :  { %176 = vmatpush1.bf16.msra.mxu0 %v692_v7 }
  0x17   :  { %177 = vmatprep.subr.bf16.mxu0 %v713_v0 }
  0x1a   :  { %178 = vmatpush1.bf16.msra.mxu0 %v693_v8 }
  0x1b   :  { %179 = vmatprep.subr.bf16.mxu0 %v713_v0 }
  0x1e   :  { %180 = vmatpush1.bf16.msra.mxu0 %v694_v9 }
  0x1f   :  { %181 = vmatprep.subr.bf16.mxu0 %v713_v0 }
  0x22   :  { %182 = vmatpush1.bf16.msra.mxu0 %v695_v10 }
  0x23   :  { %183 = vmatprep.subr.bf16.mxu0 %v713_v0 }
  0x26   :  { %184 = vmatpush1.bf16.msra.mxu0 %v696_v11 }
  0x27   :  { %185 = vmatprep.subr.bf16.mxu0 %v713_v0 }
  0x2a   :  { %186 = vmatpush1.bf16.msra.mxu0 %v697_v12 }
  0x2b   :  { %187 = vmatprep.subr.bf16.mxu0 %v713_v0 }
  0x2e   :  { %188 = vmatpush1.bf16.msra.mxu0 %v698_v13 }
  0x31   :  { %198 = vmatmul.mubr.bf16.vlgmr.msra.gmra.mrb[0].mxu0 %v699_v14 }
  0x32   :  { %560 = vmatprep.mubr.msk.bf16.mxu0 %vm152_vm0, %v702_v15 }
  0x39   :  { %206 = vmatmul.mubr.bf16.gmra.mrb[4].mxu0 %v704_v16 }
  0x3a   :  { %561 = vmatprep.mubr.msk.bf16.mxu0 %vm152_vm0, %v705_v17 }
  0x41   :  { %214 = vmatmul.mubr.bf16.gmra.mrb[8].mxu0 %v707_v18 }
  0x42   :  { %562 = vmatprep.mubr.msk.bf16.mxu0 %vm152_vm0, %v708_v19 }
  0x49   :  { %222 = vmatmul.mubr.bf16.gmra.mrb[12].mxu0 %v710_v20 }
 0x104   :  { %v831_v32 = vpop.f32.mrb[0].mxu0 }
 0x105   :  { %v251_v33 = vmul.f32 %v831_v32, %v831_v32  ;;  %v201_v34 = vpop.f32.mrb[1].mxu0  ;;  %v230_v36 = vsel %vm152_vm0, %v831_v32, 0.0 }
 0x106   :  { %v835_v35 = vpop.f32.mrb[2].mxu0 }
 0x107   :  { %v231_v37 = vsel %vm152_vm0, %v835_v35, 0.0  ;;  %v252_v38 = vmul.f32 %v835_v35, %v835_v35  ;;  %v204_v39 = vpop.f32.mrb[3].mxu0  ;;  %v259_v41 = vsel %vm152_vm0, %v251_v33, 0.0 }
 0x108   :  { %v232_v40 = vadd.f32 %v231_v37, %v230_v36 }
 0x109   :  { %v260_v42 = vsel %vm152_vm0, %v252_v38, 0.0 }
 0x10a   :  { %v261_v43 = vadd.f32 %v260_v42, %v259_v41 }
 0x10c   :  { %v845_v44 = vpop.f32.mrb[4].mxu0 }
 0x10d   :  { %v233_v45 = vsel %vm152_vm0, %v845_v44, 0.0  ;;  %v253_v46 = vmul.f32 %v845_v44, %v845_v44  ;;  %v209_v47 = vpop.f32.mrb[5].mxu0 }
 0x10e   :  { %v234_v48 = vadd.f32 %v233_v45, %v232_v40  ;;  %v851_v49 = vpop.f32.mrb[6].mxu0 }
 0x10f   :  { %v262_v50 = vsel %vm152_vm0, %v253_v46, 0.0  ;;  %v235_v51 = vsel %vm152_vm0, %v851_v49, 0.0  ;;  %v254_v52 = vmul.f32 %v851_v49, %v851_v49  ;;  %v212_v53 = vpop.f32.mrb[7].mxu0 }
 0x110   :  { %v263_v54 = vadd.f32 %v262_v50, %v261_v43  ;;  %v236_v55 = vadd.f32 %v235_v51, %v234_v48 }
 0x111   :  { %v264_v56 = vsel %vm152_vm0, %v254_v52, 0.0 }
 0x112   :  { %v265_v57 = vadd.f32 %v264_v56, %v263_v54 }
 0x114   :  { %v859_v58 = vpop.f32.mrb[8].mxu0 }
 0x115   :  { %v237_v59 = vsel %vm152_vm0, %v859_v58, 0.0  ;;  %v255_v60 = vmul.f32 %v859_v58, %v859_v58  ;;  %v217_v61 = vpop.f32.mrb[9].mxu0 }
 0x116   :  { %v238_v62 = vadd.f32 %v237_v59, %v236_v55  ;;  %v865_v63 = vpop.f32.mrb[10].mxu0 }
 0x117   :  { %v266_v0 = vsel %vm152_vm0, %v255_v60, 0.0  ;;  %v239_v1 = vsel %vm152_vm0, %v865_v63, 0.0  ;;  %v256_v2 = vmul.f32 %v865_v63, %v865_v63  ;;  %v220_v3 = vpop.f32.mrb[11].mxu0 }
 0x118   :  { %v267_v4 = vadd.f32 %v266_v0, %v265_v57  ;;  %v240_v5 = vadd.f32 %v239_v1, %v238_v62 }
 0x119   :  { %v268_v6 = vsel %vm152_vm0, %v256_v2, 0.0 }
 0x11a   :  { %v269_v7 = vadd.f32 %v268_v6, %v267_v4 }
 0x11c   :  { %v873_v8 = vpop.f32.mrb[12].mxu0 }
 0x11d   :  { %v241_v9 = vsel %vm152_vm0, %v873_v8, 0.0  ;;  %v257_v10 = vmul.f32 %v873_v8, %v873_v8  ;;  %v225_v11 = vpop.f32.mrb[13].mxu0 }
 0x11e   :  { %v242_v12 = vadd.f32 %v241_v9, %v240_v5  ;;  %v879_v13 = vpop.f32.mrb[14].mxu0 }
 0x11f   :  { %v270_v14 = vsel %vm152_vm0, %v257_v10, 0.0  ;;  %v243_v15 = vsel %vm152_vm0, %v879_v13, 0.0  ;;  %v258_v16 = vmul.f32 %v879_v13, %v879_v13  ;;  %v228_v17 = vpop.f32.mrb[15].mxu0 }
 0x120   :  { %v271_v18 = vadd.f32 %v270_v14, %v269_v7  ;;  %v244_v19 = vadd.f32 %v243_v15, %v242_v12 }
 0x121   :  { %v272_v20 = vsel %vm152_vm0, %v258_v16, 0.0 }
 0x122   :  { %v245_v21 = vrot.slane %v244_v19, 4  ;;  %v273_v23 = vadd.f32 %v272_v20, %v271_v18 }
 0x124   :  { %v246_v24 = vadd.f32 %v245_v21, %v244_v19  ;;  %v274_v33 = vrot.slane %v273_v23, 4 }
 0x126   :  { %v247_v28 = vrot.slane %v246_v24, 2  ;;  %v275_v36 = vadd.f32 %v274_v33, %v273_v23 }
 0x128   :  { %v248_v29 = vadd.f32 %v247_v28, %v246_v24  ;;  %v276_v38 = vrot.slane %v275_v36, 2 }
 0x12a   :  { %v249_v34 = vrot.slane %v248_v29, 1  ;;  %v277_v39 = vadd.f32 %v276_v38, %v275_v36 }
 0x12c   :  { %v250_v37 = vadd.f32 %v249_v34, %v248_v29  ;;  %v278_v40 = vrot.slane %v277_v39, 1 }
 0x12e   :  { %636 = vmatmul.mubr.msk.f32.vlgmr.msra.gmra.mrb[0].mxu1 %vm152_vm0, %v250_v37 }
 0x12f   :  { %671 = vmatpush3.bf16.msk.msra.mxu1 %vm803_vm3, %v715_v27  ;;  %654 = vmatprep.mubr.msk.f32.mxu1 %vm716_vm7, %v717_v31  ;;  %v279_v31 = vadd.f32 %v278_v40, %v277_v39 }
 0x130   :  { %672 = vmatprep.subr.bf16.mxu1 %v714_v25 }
 0x133   :  { %674 = vmatpush3.bf16.msk.msra.mxu1 %vm813_vm6, %v715_v27 }
 0x134   :  { %675 = vmatprep.subr.bf16.mxu1 %v714_v25 }
 0x137   :  { %677 = vmatpush3.bf16.msk.msra.mxu1 %vm803_vm3, %v715_v27 }
 0x138   :  { %678 = vmatprep.subr.bf16.mxu1 %v714_v25 }
 0x13b   :  { %680 = vmatpush3.bf16.msk.msra.mxu1 %vm813_vm6, %v715_v27  ;;  %v464_v27 = vsub.s32 0, %v798_v22 }
 0x13e   :  { %655 = vmatmul.mubr.msk.f32.vlgmr.msra.gmra.mrb[2].mxu1 %vm152_vm0, %v279_v31 }
 0x201   :  { %v368_v41 = vpop.f32.mrb[0].mxu1 }
 0x202   :  { %v372_v42 = vmul.f32 0.0078125, %v368_v41  ;;  %v637_v43 = vpop.f32.mrb[1].mxu1 }
 0x204   :  { %452 = vrot.lane.b32.xlu0 %v372_v42, %s718_s0  ;;  %v447_v47 = vmul.f32 %v372_v42, %v372_v42 }
 0x211   :  { %v442_v45 = vpop.f32.mrb[2].mxu1 }
 0x212   :  { %v446_v46 = vmul.f32 0.0078125, %v442_v45  ;;  %v656_v26 = vpop.f32.mrb[3].mxu1 }
 0x214   :  { %v448_v48 = vsub.f32 %v446_v46, %v447_v47 }
 0x216   :  { %v449_v50 = vadd.f32 1e-05, %v448_v48 }
 0x218   :  { %711 = vrsqrt.f32 %v449_v50 }
 0x222   :  { %v712_v25 = vpop.eup %711 }
 0x223   :  { %458 = vrot.lane.b32.xlu0 %v712_v25, %s718_s0 }
 0x276   :  { %v453_v30 = vpop.permute.xlu0 %452 }
 0x277   :  { %v456_v51 = vsel %vm455_vm8, %v372_v42, %v453_v30 }
 0x278   :  { %v465_v52 = vrot.slane %v456_v51, %v464_v27 }
 0x27a   :  { %v466_v54 = vsub.f32 %v831_v32, %v465_v52  ;;  %v467_v56 = vsub.f32 %v835_v35, %v465_v52  ;;  %v468_v57 = vsub.f32 %v845_v44, %v465_v52  ;;  %v469_v59 = vsub.f32 %v851_v49, %v465_v52 }
 0x27b   :  { %v470_v61 = vsub.f32 %v859_v58, %v465_v52  ;;  %v471_v62 = vsub.f32 %v865_v63, %v465_v52  ;;  %v472_v22 = vsub.f32 %v873_v8, %v465_v52  ;;  %v473_v0 = vsub.f32 %v879_v13, %v465_v52 }
 0x295   :  { %v459_v53 = vpop.permute.xlu0 %458 }
 0x296   :  { %v461_v55 = vsel %vm455_vm8, %v712_v25, %v459_v53 }
 0x297   :  { %v477_v60 = vrot.slane %v461_v55, %v464_v27 }
 0x299   :  { %v478_v1 = vmul.f32 %v477_v60, %v466_v54  ;;  %v479_v2 = vmul.f32 %v477_v60, %v467_v56  ;;  %v480_v32 = vmul.f32 %v477_v60, %v468_v57  ;;  %v481_v3 = vmul.f32 %v477_v60, %v469_v59 }
 0x29a   :  { %v482_v4 = vmul.f32 %v477_v60, %v470_v61  ;;  %v483_v5 = vmul.f32 %v477_v60, %v471_v62  ;;  %v484_v35 = vmul.f32 %v477_v60, %v472_v22  ;;  %v485_v6 = vmul.f32 %v477_v60, %v473_v0 }
 0x29b   :  { %v486_v44 = vmax.f32 %v478_v1, 0.0  ;;  %v487_v7 = vmax.f32 %v479_v2, 0.0  ;;  %v488_v49 = vmax.f32 %v480_v32, 0.0  ;;  %v489_v9 = vmax.f32 %v481_v3, 0.0 }
 0x29c   :  { %v490_v10 = vmax.f32 %v482_v4, 0.0  ;;  %v491_v58 = vmax.f32 %v483_v5, 0.0  ;;  %v492_v11 = vmax.f32 %v484_v35, 0.0  ;;  %v493_v63 = vmax.f32 %v485_v6, 0.0 }
 0x29d   :  { %v593_v12 = vpack.c.bf16 %v486_v44, %v486_v44  ;;  %v594_v8 = vpack.c.bf16 %v487_v7, %v487_v7  ;;  %v595_v14 = vpack.c.bf16 %v488_v49, %v488_v49  ;;  %v596_v13 = vpack.c.bf16 %v489_v9, %v489_v9 }
 0x29e   :  { %v597_v15 = vpack.c.bf16 %v490_v10, %v490_v10  ;;  %v598_v16 = vpack.c.bf16 %v491_v58, %v491_v58  ;;  %v599_v17 = vpack.c.bf16 %v492_v11, %v492_v11  ;;  %v600_v18 = vpack.c.bf16 %v493_v63, %v493_v63 }
 0x29f   :  { %527 = vst.msk [vmem:[%s949_s2] sm:$0xf] %vm526_vm9, %v593_v12  ;;  %528 = vst.msk [vmem:[%s949_s2 + $0x4] sm:$0xf] %vm526_vm9, %v594_v8 }
 0x2a0   :  { %529 = vst.msk [vmem:[%s949_s2 + $0x8] sm:$0xf] %vm526_vm9, %v595_v14  ;;  %530 = vst.msk [vmem:[%s949_s2 + $0xc] sm:$0xf] %vm526_vm9, %v596_v13 }
 0x2a1   :  { %531 = vst.msk [vmem:[%s949_s2 + $0x10] sm:$0xf] %vm526_vm9, %v597_v15  ;;  %532 = vst.msk [vmem:[%s949_s2 + $0x14] sm:$0xf] %vm526_vm9, %v598_v16 }
 0x2a2   :  { %533 = vst.msk [vmem:[%s949_s2 + $0x18] sm:$0xf] %vm526_vm9, %v599_v17  ;;  %534 = vst.msk [vmem:[%s949_s2 + $0x1c] sm:$0xf] %vm526_vm9, %v600_v18 }

// kernel: decoder_forward.9
= control target key start
LH: loop header
LB: loop body
LE: loop exit
PB: predicated region body
PF: predicated region fallthrough
CT: control target
= control target key end

     0   :  { %vm308_vm0 = vcmask 261120   ;;  %v618_v42 = vlaneseq  ;;  %v1285_v43 = vmov 0.0|0.0   ;;  %v1286_v48 = vmov 1.0|1.0   ;;  %s1290_s7 = smov 16   ;;  %s1291_s8 = smov 32   ;;  %s1708_s1 = inlined_call_operand.vmem [shape: bf16[288,64], index: 1, kind: input, shape index: {}]   ;;  %s1709_s0 = inlined_call_operand.vmem [shape: bf16[128,288], index: 0, kind: input, shape index: {}]   ;;  %s1710_s2 = inlined_call_operand.vmem [shape: bf16[128,64], index: 2, kind: output, shape index: {}]  }
   0x1   :  { %v1233_v0 = vld [vmem:[%s1708_s1 + $0x40] sm:$0xff]   ;;  %v1235_v2 = vld [vmem:[%s1708_s1 + $0x48] sm:$0xff]   ;;  %v1237_v4 = vld [vmem:[%s1708_s1 + $0x50] sm:$0xff]   ;;  %vm1287_vm4 = vmmov 0   ;;  %v1288_v49 = vmov 0.0   ;;  %vm527_vm5 = vcmask 523264  }
   0x2   :  { %v1234_v1 = vld [vmem:[%s1708_s1] sm:$0xff]   ;;  %1052 = vmatprep.subr.bf16.mxu0 %v1233_v0  ;;  %v1236_v3 = vld [vmem:[%s1708_s1 + $0x8] sm:$0xff]   ;;  %v1238_v5 = vld [vmem:[%s1708_s1 + $0x10] sm:$0xff]   ;;  %v1442_v44 = vshrl.u32 %v618_v42, 7  ;;  %v622_v45 = vand.u32 127, %v618_v42  ;;  %vm791_vm6 = vcmask 130048  }
   0x3   :  { %1053 = vmatpush3.bf16.msra.mxu0 %v1234_v1  ;;  %v1239_v6 = vld [vmem:[%s1708_s1 + $0x58] sm:$0xff]   ;;  %v1241_v8 = vld [vmem:[%s1708_s1 + $0x60] sm:$0xff]   ;;  %v1243_v11 = vld [vmem:[%s1708_s1 + $0x68] sm:$0xff]   ;;  %vm794_vm7 = vcmask 392192   ;;  %vm929_vm8 = vcmask 519168  }
   0x4   :  { %1054 = vmatprep.subr.bf16.mxu0 %v1235_v2  ;;  %v1240_v7 = vld [vmem:[%s1708_s1 + $0x18] sm:$0xff]   ;;  %v1247_v9 = vld [vmem:[%s1708_s1 + $0x80] sm:$0xff]   ;;  %v1244_v12 = vld [vmem:[%s1708_s1 + $0x28] sm:$0xff]   ;;  %v620_v46 = vadd.s32 8, %v1442_v44  ;;  %vm623_vm1 = vcmp.eq.s32.totalorder %v1442_v44, %v622_v45 }
   0x5   :  { %v1242_v10 = vld [vmem:[%s1708_s1 + $0x20] sm:$0xff]   ;;  %1144 = vmatprep.subr.bf16.mxu1 %v1247_v9  ;;  %v1250_v13 = vld [vmem:[%s1708_s1 + $0x88] sm:$0xff]   ;;  %v1245_v14 = vld [vmem:[%s1708_s1 + $0x70] sm:$0xff]  }
   0x6   :  { %1145 = vmatpush3.bf16.msra.mxu1 %v1247_v9  ;;  %v1253_v15 = vld [vmem:[%s1709_s0 + $0x4] ss:$12 sps:$4 sm:$0xff]   ;;  %v1254_v16 = vld [vmem:[%s1709_s0 + $0x8] ss:$12 sps:$4 sm:$0xff]   ;;  %v1255_v17 = vld [vmem:[%s1709_s0 + $0x20] ss:$12 sps:$4 sm:$0xff]   ;;  %vm624_vm2 = vcmp.eq.s32.totalorder %v620_v46, %v622_v45 }
   0x7   :  { %1055 = vmatpush3.bf16.msra.mxu0 %v1236_v3  ;;  %1146 = vmatprep.subr.bf16.mxu1 %v1250_v13  ;;  %v1246_v18 = vld [vmem:[%s1708_s1 + $0x30] sm:$0xff]   ;;  %v1248_v19 = vld [vmem:[%s1708_s1 + $0x78] sm:$0xff]   ;;  %v1251_v24 = vld [vmem:[%s1709_s0] ss:$12 sps:$4 sm:$0xff]  }
   0x8   :  { %1056 = vmatprep.subr.bf16.mxu0 %v1237_v4  ;;  %365 = vmatprep.mubr.bf16.mxu0 %v1253_v15  ;;  %v1262_v20 = vld [vmem:[%s1709_s0 + $0x38] ss:$12 sps:$4 sm:$0xff]   ;;  %v1263_v22 = vld [vmem:[%s1709_s0 + $0x50] ss:$12 sps:$4 sm:$0xff]   ;;  %v1270_v23 = vld [vmem:[%s1709_s0 + $0x68] ss:$12 sps:$4 sm:$0xff]  }
   0x9   :  { %1148 = vmatprep.mubr.msk.bf16.mxu1 %vm308_vm0, %v1254_v16  ;;  %v1249_v21 = vld [vmem:[%s1708_s1 + $0x38] sm:$0xff]   ;;  %v1271_v26 = vld [vmem:[%s1709_s0 + $0x80] ss:$12 sps:$4 sm:$0xff]   ;;  %v1266_v33 = vld [vmem:[%s1709_s0 + $0x48] ss:$12 sps:$4 sm:$0xff]  }
   0xa   :  { %1147 = vmatpush3.bf16.msra.mxu1 %v1250_v13  ;;  %v1256_v25 = vld [vmem:[%s1709_s0 + $0x1c] ss:$12 sps:$4 sm:$0xff]   ;;  %v1278_v27 = vld [vmem:[%s1709_s0 + $0x98] ss:$12 sps:$4 sm:$0xff]   ;;  %v1259_v29 = vld [vmem:[%s1709_s0 + $0x34] ss:$12 sps:$4 sm:$0xff]  }
   0xb   :  { %1057 = vmatpush3.bf16.msra.mxu0 %v1238_v5  ;;  %v1258_v28 = vld [vmem:[%s1709_s0 + $0x18] ss:$12 sps:$4 sm:$0xff]   ;;  %v1279_v30 = vld [vmem:[%s1709_s0 + $0xb0] ss:$12 sps:$4 sm:$0xff]   ;;  %v1269_v35 = vld [vmem:[%s1709_s0 + $0x60] ss:$12 sps:$4 sm:$0xff]   ;;  %1202 = vmatprep.subr.bf16.mxu1 %v1285_v43 }
   0xc   :  { %1058 = vmatprep.subr.bf16.mxu0 %v1239_v6  ;;  %v1261_v31 = vld [vmem:[%s1709_s0 + $0x30] ss:$12 sps:$4 sm:$0xff]   ;;  %v1264_v32 = vld [vmem:[%s1709_s0 + $0x4c] ss:$12 sps:$4 sm:$0xff]   ;;  %v1275_v38 = vld [vmem:[%s1709_s0 + $0x94] ss:$12 sps:$4 sm:$0xff]  }
   0xd   :  { %1149 = vmatmul.mubr.msk.bf16.vlgmr.msra.gmra.mrb[0].mxu1 %vm308_vm0, %v1255_v17  ;;  %v1267_v34 = vld [vmem:[%s1709_s0 + $0x64] ss:$12 sps:$4 sm:$0xff]   ;;  %v1272_v36 = vld [vmem:[%s1709_s0 + $0x7c] ss:$12 sps:$4 sm:$0xff]   ;;  %v1280_v40 = vld [vmem:[%s1709_s0 + $0xac] ss:$12 sps:$4 sm:$0xff]  }
   0xe   :  { %1152 = vmatprep.mubr.msk.bf16.mxu1 %vm308_vm0, %v1262_v20  ;;  %v1274_v37 = vld [vmem:[%s1709_s0 + $0x78] ss:$12 sps:$4 sm:$0xff]   ;;  %v1277_v39 = vld [vmem:[%s1709_s0 + $0x90] ss:$12 sps:$4 sm:$0xff]   ;;  %v1282_v41 = vld [vmem:[%s1709_s0 + $0xa8] ss:$12 sps:$4 sm:$0xff]  }
   0xf   :  { %1059 = vmatpush3.bf16.msra.mxu0 %v1240_v7  ;;  %vm1446_vm3 = vmpackc.low %vm624_vm2, %vm623_vm1  ;;  %s1289_s0 = smov 48  }
  0x10   :  { %1060 = vmatprep.subr.bf16.mxu0 %v1241_v8  ;;  %1204 = vmatpush3.bf16.msk.msra.mxu1 %vm1446_vm3, %v1286_v48 }
  0x11   :  { %1205 = vmatprep.subr.bf16.mxu1 %v1285_v43 }
  0x13   :  { %1061 = vmatpush3.bf16.msra.mxu0 %v1242_v10 }
  0x14   :  { %1062 = vmatprep.subr.bf16.mxu0 %v1243_v11  ;;  %1207 = vmatpush3.bf16.msk.msra.mxu1 %vm1446_vm3, %v1286_v48 }
  0x15   :  { %1153 = vmatmul.mubr.msk.bf16.gmra.mrb[4].mxu1 %vm308_vm0, %v1263_v22  ;;  %1208 = vmatprep.subr.bf16.mxu1 %v1285_v43 }
  0x16   :  { %1156 = vmatprep.mubr.msk.bf16.mxu1 %vm308_vm0, %v1270_v23 }
  0x17   :  { %1063 = vmatpush3.bf16.msra.mxu0 %v1244_v12 }
  0x18   :  { %1064 = vmatprep.subr.bf16.mxu0 %v1245_v14  ;;  %1210 = vmatpush3.bf16.msk.msra.mxu1 %vm1446_vm3, %v1286_v48 }
  0x19   :  { %1211 = vmatprep.subr.bf16.mxu1 %v1285_v43 }
  0x1b   :  { %1065 = vmatpush3.bf16.msra.mxu0 %v1246_v18 }
  0x1c   :  { %1066 = vmatprep.subr.bf16.mxu0 %v1248_v19  ;;  %1213 = vmatpush3.bf16.msk.msra.mxu1 %vm1446_vm3, %v1286_v48 }
  0x1d   :  { %1157 = vmatmul.mubr.msk.bf16.gmra.mrb[8].mxu1 %vm308_vm0, %v1271_v26  ;;  %1214 = vmatprep.subr.bf16.mxu1 %v1285_v43 }
  0x1e   :  { %1160 = vmatprep.mubr.msk.bf16.mxu1 %vm308_vm0, %v1278_v27 }
  0x1f   :  { %1067 = vmatpush3.bf16.msra.mxu0 %v1249_v21 }
  0x22   :  { %366 = vmatmul.mubr.bf16.vlgmr.msra.gmra.mrb[0].mxu0 %v1251_v24 }
  0x23   :  { %373 = vmatprep.mubr.bf16.mxu0 %v1256_v25 }
  0x25   :  { %1161 = vmatmul.mubr.msk.bf16.gmra.mrb[12].mxu1 %vm308_vm0, %v1279_v30 }
  0x26   :  { %1180 = vmatprep.mubr.msk.f32.mxu1 %vm1287_vm4, %v1288_v49 }
  0x2a   :  { %374 = vmatmul.mubr.bf16.gmra.mrb[4].mxu0 %v1258_v28 }
  0x2b   :  { %381 = vmatprep.mubr.bf16.mxu0 %v1259_v29 }
  0x32   :  { %382 = vmatmul.mubr.bf16.gmra.mrb[8].mxu0 %v1261_v31 }
  0x33   :  { %389 = vmatprep.mubr.bf16.mxu0 %v1264_v32 }
  0x3a   :  { %390 = vmatmul.mubr.bf16.gmra.mrb[12].mxu0 %v1266_v33 }
  0x3b   :  { %397 = vmatprep.mubr.bf16.mxu0 %v1267_v34 }
  0x42   :  { %398 = vmatmul.mubr.bf16.gmra.mrb[16].mxu0 %v1269_v35 }
  0x43   :  { %405 = vmatprep.mubr.bf16.mxu0 %v1272_v36 }
  0x4a   :  { %406 = vmatmul.mubr.bf16.gmra.mrb[20].mxu0 %v1274_v37 }
  0x4b   :  { %413 = vmatprep.mubr.bf16.mxu0 %v1275_v38 }
  0x52   :  { %414 = vmatmul.mubr.bf16.gmra.mrb[24].mxu0 %v1277_v39 }
  0x53   :  { %421 = vmatprep.mubr.bf16.mxu0 %v1280_v40 }
  0x5a   :  { %422 = vmatmul.mubr.bf16.gmra.mrb[28].mxu0 %v1282_v41 }
  0xe0   :  { %v1150_v50 = vpop.f32.mrb[0].mxu1 }
  0xe1   :  { %v464_v51 = vpop.f32.mrb[1].mxu1 }
  0xe2   :  { %v1151_v52 = vpop.f32.mrb[2].mxu1 }
  0xe3   :  { %v467_v53 = vpop.f32.mrb[3].mxu1 }
  0xe8   :  { %v1154_v54 = vpop.f32.mrb[4].mxu1 }
  0xe9   :  { %v480_v55 = vpop.f32.mrb[5].mxu1 }
  0xea   :  { %v1155_v57 = vpop.f32.mrb[6].mxu1 }
  0xeb   :  { %v483_v59 = vpop.f32.mrb[7].mxu1 }
  0xf0   :  { %v1472_v2 = vpop.f32.mrb[8].mxu1 }
  0xf1   :  { %v1474_v3 = vpop.f32.mrb[9].mxu1 }
  0xf2   :  { %v1476_v5 = vpop.f32.mrb[10].mxu1 }
  0xf3   :  { %v1478_v7 = vpop.f32.mrb[11].mxu1 }
  0xf5   :  { %v1068_v56 = vpop.f32.mrb[0].mxu0 }
  0xf6   :  { %v1069_v58 = vpop.f32.mrb[1].mxu0 }
  0xf7   :  { %v1070_v60 = vadd.f32 %v1069_v58, %v1068_v56  ;;  %v1071_v61 = vpop.f32.mrb[2].mxu0 }
  0xf8   :  { %v1072_v62 = vpop.f32.mrb[3].mxu0  ;;  %v1484_v14 = vpop.f32.mrb[12].mxu1 }
  0xf9   :  { %v1073_v63 = vadd.f32 %v1072_v62, %v1071_v61  ;;  %v1468_v0 = vadd.f32 %v1070_v60, %v464_v51  ;;  %v1486_v15 = vpop.f32.mrb[13].mxu1 }
  0xfa   :  { %v1488_v17 = vpop.f32.mrb[14].mxu1 }
  0xfb   :  { %v1470_v1 = vadd.f32 %v1073_v63, %v467_v53  ;;  %v1490_v19 = vpop.f32.mrb[15].mxu1  ;;  %v565_v26 = vmul.f32 %v1468_v0, %v1468_v0  ;;  %v528_v30 = vsel %vm527_vm5, %v1468_v0, 0.0 }
  0xfd   :  { %v1074_v4 = vpop.f32.mrb[4].mxu0  ;;  %v566_v23 = vmul.f32 %v1470_v1, %v1470_v1  ;;  %v529_v27 = vsel %vm527_vm5, %v1470_v1, 0.0  ;;  %v581_v36 = vsel %vm527_vm5, %v565_v26, 0.0 }
  0xfe   :  { %v1075_v6 = vpop.f32.mrb[5].mxu0  ;;  %v530_v34 = vadd.f32 %v529_v27, %v528_v30 }
  0xff   :  { %v1076_v8 = vadd.f32 %v1075_v6, %v1074_v4  ;;  %v1077_v9 = vpop.f32.mrb[6].mxu0  ;;  %v582_v31 = vsel %vm527_vm5, %v566_v23, 0.0 }
 0x100   :  { %v1078_v10 = vpop.f32.mrb[7].mxu0  ;;  %v583_v41 = vadd.f32 %v582_v31, %v581_v36 }
 0x101   :  { %v1480_v11 = vadd.f32 %v1150_v50, %v1076_v8  ;;  %v1079_v12 = vadd.f32 %v1078_v10, %v1077_v9 }
 0x103   :  { %v1482_v13 = vadd.f32 %v1151_v52, %v1079_v12  ;;  %v567_v28 = vmul.f32 %v1480_v11, %v1480_v11  ;;  %v531_v32 = vsel %vm527_vm5, %v1480_v11, 0.0 }
 0x104   :  { %v532_v42 = vadd.f32 %v531_v32, %v530_v34 }
 0x105   :  { %v1080_v16 = vpop.f32.mrb[8].mxu0  ;;  %v584_v37 = vsel %vm527_vm5, %v567_v28, 0.0  ;;  %v568_v38 = vmul.f32 %v1482_v13, %v1482_v13  ;;  %v533_v46 = vsel %vm527_vm5, %v1482_v13, 0.0 }
 0x106   :  { %v1081_v18 = vpop.f32.mrb[9].mxu0  ;;  %v585_v53 = vadd.f32 %v584_v37, %v583_v41 }
 0x107   :  { %v1082_v20 = vadd.f32 %v1081_v18, %v1080_v16  ;;  %v1083_v21 = vpop.f32.mrb[10].mxu0 }
 0x108   :  { %v1084_v22 = vpop.f32.mrb[11].mxu0 }
 0x109   :  { %v1085_v24 = vadd.f32 %v1084_v22, %v1083_v21  ;;  %v1494_v25 = vadd.f32 %v1082_v20, %v480_v55  ;;  %v586_v55 = vsel %vm527_vm5, %v568_v38, 0.0 }
 0x10a   :  { %v587_v4 = vadd.f32 %v586_v55, %v585_v53 }
 0x10b   :  { %v1502_v29 = vadd.f32 %v1085_v24, %v483_v59  ;;  %v569_v50 = vmul.f32 %v1494_v25, %v1494_v25  ;;  %v535_v56 = vsel %vm527_vm5, %v1494_v25, 0.0  ;;  %v534_v59 = vadd.f32 %v533_v46, %v532_v42 }
 0x10d   :  { %v1086_v33 = vpop.f32.mrb[12].mxu0  ;;  %v588_v60 = vsel %vm527_vm5, %v569_v50, 0.0  ;;  %v570_v61 = vmul.f32 %v1502_v29, %v1502_v29  ;;  %v536_v63 = vadd.f32 %v535_v56, %v534_v59  ;;  %v537_v6 = vsel %vm527_vm5, %v1502_v29, 0.0 }
 0x10e   :  { %v1087_v35 = vpop.f32.mrb[13].mxu0 }
 0x10f   :  { %v1088_v39 = vadd.f32 %v1087_v35, %v1086_v33  ;;  %v1089_v40 = vpop.f32.mrb[14].mxu0  ;;  %v590_v16 = vsel %vm527_vm5, %v570_v61, 0.0  ;;  %v538_v22 = vadd.f32 %v537_v6, %v536_v63 }
 0x110   :  { %v1090_v45 = vpop.f32.mrb[15].mxu0 }
 0x111   :  { %v1517_v51 = vadd.f32 %v1154_v54, %v1088_v39  ;;  %v1091_v52 = vadd.f32 %v1090_v45, %v1089_v40 }
 0x113   :  { %v1522_v58 = vadd.f32 %v1155_v57, %v1091_v52  ;;  %v571_v8 = vmul.f32 %v1517_v51, %v1517_v51  ;;  %v589_v57 = vadd.f32 %v588_v60, %v587_v4  ;;  %v539_v18 = vsel %vm527_vm5, %v1517_v51, 0.0 }
 0x114   :  { %v540_v28 = vadd.f32 %v539_v18, %v538_v22 }
 0x115   :  { %v1092_v62 = vpop.f32.mrb[16].mxu0  ;;  %v592_v23 = vsel %vm527_vm5, %v571_v8, 0.0  ;;  %v572_v24 = vmul.f32 %v1522_v58, %v1522_v58  ;;  %v591_v27 = vadd.f32 %v590_v16, %v589_v57  ;;  %v541_v30 = vsel %vm527_vm5, %v1522_v58, 0.0 }
 0x116   :  { %v1093_v54 = vpop.f32.mrb[17].mxu0 }
 0x117   :  { %v1094_v9 = vadd.f32 %v1093_v54, %v1092_v62  ;;  %v1095_v10 = vpop.f32.mrb[18].mxu0  ;;  %v594_v34 = vsel %vm527_vm5, %v572_v24, 0.0 }
 0x118   :  { %v1096_v12 = vpop.f32.mrb[19].mxu0 }
 0x119   :  { %v1097_v20 = vadd.f32 %v1096_v12, %v1095_v10  ;;  %v1535_v21 = vadd.f32 %v1094_v9, %v1474_v3  ;;  %v593_v3 = vadd.f32 %v592_v23, %v591_v27 }
 0x11b   :  { %v1541_v26 = vadd.f32 %v1097_v20, %v1478_v7  ;;  %v573_v31 = vmul.f32 %v1535_v21, %v1535_v21  ;;  %v543_v35 = vsel %vm527_vm5, %v1535_v21, 0.0  ;;  %v542_v7 = vadd.f32 %v541_v30, %v540_v28 }
 0x11c   :  { %v595_v46 = vadd.f32 %v594_v34, %v593_v3 }
 0x11d   :  { %v1098_v32 = vpop.f32.mrb[20].mxu0  ;;  %v596_v39 = vsel %vm527_vm5, %v573_v31, 0.0  ;;  %v574_v40 = vmul.f32 %v1541_v26, %v1541_v26  ;;  %v544_v45 = vadd.f32 %v543_v35, %v542_v7  ;;  %v545_v50 = vsel %vm527_vm5, %v1541_v26, 0.0 }
 0x11e   :  { %v1099_v33 = vpop.f32.mrb[21].mxu0  ;;  %v597_v55 = vadd.f32 %v596_v39, %v595_v46 }
 0x11f   :  { %v1100_v36 = vadd.f32 %v1099_v33, %v1098_v32  ;;  %v1101_v37 = vpop.f32.mrb[22].mxu0  ;;  %v598_v56 = vsel %vm527_vm5, %v574_v40, 0.0  ;;  %v546_v60 = vadd.f32 %v545_v50, %v544_v45 }
 0x120   :  { %v1102_v38 = vpop.f32.mrb[23].mxu0  ;;  %v599_v6 = vadd.f32 %v598_v56, %v597_v55 }
 0x121   :  { %v1554_v41 = vadd.f32 %v1472_v2, %v1100_v36  ;;  %v1103_v42 = vadd.f32 %v1102_v38, %v1101_v37 }
 0x123   :  { %v575_v52 = vmul.f32 %v1554_v41, %v1554_v41  ;;  %v1561_v53 = vadd.f32 %v1476_v5, %v1103_v42  ;;  %v547_v59 = vsel %vm527_vm5, %v1554_v41, 0.0 }
 0x124   :  { %v548_v8 = vadd.f32 %v547_v59, %v546_v60 }
 0x125   :  { %v1104_v2 = vpop.f32.mrb[24].mxu0  ;;  %v600_v62 = vsel %vm527_vm5, %v575_v52, 0.0  ;;  %v576_v63 = vmul.f32 %v1561_v53, %v1561_v53  ;;  %v549_v9 = vsel %vm527_vm5, %v1561_v53, 0.0 }
 0x126   :  { %v1105_v61 = vpop.f32.mrb[25].mxu0  ;;  %v601_v12 = vadd.f32 %v600_v62, %v599_v6  ;;  %v550_v23 = vadd.f32 %v549_v9, %v548_v8 }
 0x127   :  { %v1106_v4 = vadd.f32 %v1105_v61, %v1104_v2  ;;  %v1107_v54 = vpop.f32.mrb[26].mxu0  ;;  %v602_v16 = vsel %vm527_vm5, %v576_v63, 0.0 }
 0x128   :  { %v1108_v5 = vpop.f32.mrb[27].mxu0  ;;  %v603_v30 = vadd.f32 %v602_v16, %v601_v12 }
 0x129   :  { %v1109_v10 = vadd.f32 %v1108_v5, %v1107_v54  ;;  %v1572_v57 = vadd.f32 %v1106_v4, %v1486_v15 }
 0x12b   :  { %v551_v18 = vsel %vm527_vm5, %v1572_v57, 0.0  ;;  %v577_v20 = vmul.f32 %v1572_v57, %v1572_v57  ;;  %v1580_v22 = vadd.f32 %v1109_v10, %v1490_v19 }
 0x12c   :  { %v552_v28 = vadd.f32 %v551_v18, %v550_v23 }
 0x12d   :  { %v604_v24 = vsel %vm527_vm5, %v577_v20, 0.0  ;;  %v578_v27 = vmul.f32 %v1580_v22, %v1580_v22  ;;  %v1110_v15 = vpop.f32.mrb[28].mxu0  ;;  %v553_v32 = vsel %vm527_vm5, %v1580_v22, 0.0 }
 0x12e   :  { %v1111_v31 = vpop.f32.mrb[29].mxu0  ;;  %v605_v34 = vadd.f32 %v604_v24, %v603_v30  ;;  %v554_v7 = vadd.f32 %v553_v32, %v552_v28 }
 0x12f   :  { %v1112_v3 = vadd.f32 %v1111_v31, %v1110_v15  ;;  %v1113_v33 = vpop.f32.mrb[30].mxu0  ;;  %v606_v19 = vsel %vm527_vm5, %v578_v27, 0.0  ;;  %v811_v31 = vsub.s32 0, %v1442_v44 }
 0x130   :  { %v1114_v35 = vpop.f32.mrb[31].mxu0  ;;  %v607_v42 = vadd.f32 %v606_v19, %v605_v34 }
 0x131   :  { %v1589_v36 = vadd.f32 %v1484_v14, %v1112_v3  ;;  %v1115_v37 = vadd.f32 %v1114_v35, %v1113_v33 }
 0x133   :  { %v555_v38 = vsel %vm527_vm5, %v1589_v36, 0.0  ;;  %v579_v39 = vmul.f32 %v1589_v36, %v1589_v36  ;;  %v1596_v40 = vadd.f32 %v1488_v17, %v1115_v37 }
 0x134   :  { %v556_v45 = vadd.f32 %v555_v38, %v554_v7 }
 0x135   :  { %v608_v46 = vsel %vm527_vm5, %v579_v39, 0.0  ;;  %v557_v50 = vsel %vm527_vm5, %v1596_v40, 0.0  ;;  %v580_v14 = vmul.f32 %v1596_v40, %v1596_v40 }
 0x136   :  { %v609_v52 = vadd.f32 %v608_v46, %v607_v42  ;;  %v558_v55 = vadd.f32 %v557_v50, %v556_v45 }
 0x137   :  { %v610_v56 = vsel %vm527_vm5, %v580_v14, 0.0 }
 0x138   :  { %v559_v59 = vrot.slane %v558_v55, 4  ;;  %v611_v60 = vadd.f32 %v610_v56, %v609_v52 }
 0x13a   :  { %v560_v2 = vadd.f32 %v559_v59, %v558_v55  ;;  %v612_v62 = vrot.slane %v611_v60, 4 }
 0x13c   :  { %v561_v61 = vrot.slane %v560_v2, 2  ;;  %v613_v54 = vadd.f32 %v612_v62, %v611_v60 }
 0x13e   :  { %v562_v17 = vadd.f32 %v561_v61, %v560_v2  ;;  %v614_v6 = vrot.slane %v613_v54, 2 }
 0x140   :  { %v563_v63 = vrot.slane %v562_v17, 1  ;;  %v615_v8 = vadd.f32 %v614_v6, %v613_v54 }
 0x142   :  { %v564_v4 = vadd.f32 %v563_v63, %v562_v17  ;;  %v616_v5 = vrot.slane %v615_v8, 1 }
 0x144   :  { %1181 = vmatmul.mubr.msk.f32.vlgmr.msra.gmra.mrb[16].mxu1 %vm527_vm5, %v564_v4 }
 0x145   :  { %1216 = vmatpush3.bf16.msk.msra.mxu1 %vm1446_vm3, %v1286_v48  ;;  %1199 = vmatprep.mubr.msk.f32.mxu1 %vm1287_vm4, %v1288_v49  ;;  %v617_v49 = vadd.f32 %v616_v5, %v615_v8 }
 0x146   :  { %1217 = vmatprep.subr.bf16.mxu1 %v1285_v43 }
 0x149   :  { %1219 = vmatpush3.bf16.msk.msra.mxu1 %vm1446_vm3, %v1286_v48 }
 0x14a   :  { %1220 = vmatprep.subr.bf16.mxu1 %v1285_v43 }
 0x14d   :  { %1222 = vmatpush3.bf16.msk.msra.mxu1 %vm1446_vm3, %v1286_v48 }
 0x14e   :  { %1223 = vmatprep.subr.bf16.mxu1 %v1285_v43 }
 0x151   :  { %1225 = vmatpush3.bf16.msk.msra.mxu1 %vm1446_vm3, %v1286_v48 }
 0x154   :  { %1200 = vmatmul.mubr.msk.f32.vlgmr.msra.gmra.mrb[18].mxu1 %vm527_vm5, %v617_v49 }
 0x217   :  { %v698_v9 = vpop.f32.mrb[16].mxu1 }
 0x218   :  { %v702_v10 = vmul.f32 0.001953125, %v698_v9  ;;  %v1182_v12 = vpop.f32.mrb[17].mxu1 }
 0x21a   :  { %788 = vrot.lane.b32.xlu1 %v702_v10, %s1289_s0  ;;  %782 = vrot.lane.b32.xlu0 %v702_v10, %s1290_s7  ;;  %v777_v43 = vmul.f32 %v702_v10, %v702_v10 }
 0x21e   :  { %785 = vrot.lane.b32.xlu0 %v702_v10, %s1291_s8 }
 0x227   :  { %v772_v16 = vpop.f32.mrb[18].mxu1 }
 0x228   :  { %v776_v18 = vmul.f32 0.001953125, %v772_v16  ;;  %v1201_v20 = vpop.f32.mrb[19].mxu1 }
 0x22a   :  { %v778_v23 = vsub.f32 %v776_v18, %v777_v43 }
 0x22c   :  { %v779_v24 = vadd.f32 1e-05, %v778_v23 }
 0x22e   :  { %1283 = vrsqrt.f32 %v779_v24 }
 0x238   :  { %v1284_v47 = vpop.eup %1283 }
 0x239   :  { %800 = vrot.lane.b32.xlu0 %v1284_v47, %s1291_s8  ;;  %797 = vrot.lane.b32.xlu1 %v1284_v47, %s1290_s7 }
 0x23d   :  { %803 = vrot.lane.b32.xlu1 %v1284_v47, %s1289_s0 }
 0x28c   :  { %v783_v48 = vpop.permute.xlu0 %782  ;;  %v789_v30 = vpop.permute.xlu1 %788 }
 0x28d   :  { %v792_v15 = vsel %vm791_vm6, %v702_v10, %v783_v48 }
 0x290   :  { %v786_v27 = vpop.permute.xlu0 %785 }
 0x291   :  { %v793_v28 = vsel %vm308_vm0, %v792_v15, %v786_v27 }
 0x292   :  { %v795_v32 = vsel %vm794_vm7, %v793_v28, %v789_v30 }
 0x293   :  { %v812_v3 = vrot.slane %v795_v32, %v811_v31 }
 0x295   :  { %v813_v19 = vsub.f32 %v1468_v0, %v812_v3  ;;  %v814_v37 = vsub.f32 %v1470_v1, %v812_v3  ;;  %v815_v7 = vsub.f32 %v1480_v11, %v812_v3  ;;  %v816_v39 = vsub.f32 %v1482_v13, %v812_v3 }
 0x296   :  { %v817_v42 = vsub.f32 %v1494_v25, %v812_v3  ;;  %v818_v44 = vsub.f32 %v1502_v29, %v812_v3  ;;  %v819_v46 = vsub.f32 %v1517_v51, %v812_v3  ;;  %v820_v50 = vsub.f32 %v1522_v58, %v812_v3 }
 0x297   :  { %v821_v14 = vsub.f32 %v1535_v21, %v812_v3  ;;  %v822_v1 = vsub.f32 %v1541_v26, %v812_v3  ;;  %v823_v11 = vsub.f32 %v1554_v41, %v812_v3  ;;  %v824_v52 = vsub.f32 %v1561_v53, %v812_v3 }
 0x298   :  { %v825_v25 = vsub.f32 %v1572_v57, %v812_v3  ;;  %v826_v29 = vsub.f32 %v1580_v22, %v812_v3  ;;  %v827_v55 = vsub.f32 %v1589_v36, %v812_v3  ;;  %v828_v51 = vsub.f32 %v1596_v40, %v812_v3 }
 0x2ab   :  { %v798_v33 = vpop.permute.xlu1 %797  ;;  %v801_v34 = vpop.permute.xlu0 %800 }
 0x2ac   :  { %v806_v35 = vsel %vm791_vm6, %v1284_v47, %v798_v33 }
 0x2ad   :  { %v807_v38 = vsel %vm308_vm0, %v806_v35, %v801_v34 }
 0x2af   :  { %v804_v45 = vpop.permute.xlu1 %803 }
 0x2b0   :  { %v808_v0 = vsel %vm794_vm7, %v807_v38, %v804_v45 }
 0x2b1   :  { %v832_v13 = vrot.slane %v808_v0, %v811_v31 }
 0x2b3   :  { %v833_v58 = vmul.f32 %v832_v13, %v813_v19  ;;  %v834_v21 = vmul.f32 %v832_v13, %v814_v37  ;;  %v835_v56 = vmul.f32 %v832_v13, %v815_v7  ;;  %v836_v59 = vmul.f32 %v832_v13, %v816_v39 }
 0x2b4   :  { %v837_v2 = vmul.f32 %v832_v13, %v817_v42  ;;  %v838_v26 = vmul.f32 %v832_v13, %v818_v44  ;;  %v839_v60 = vmul.f32 %v832_v13, %v819_v46  ;;  %v840_v41 = vmul.f32 %v832_v13, %v820_v50 }
 0x2b5   :  { %v841_v61 = vmul.f32 %v832_v13, %v821_v14  ;;  %v842_v53 = vmul.f32 %v832_v13, %v822_v1  ;;  %v843_v17 = vmul.f32 %v832_v13, %v823_v11  ;;  %v844_v62 = vmul.f32 %v832_v13, %v824_v52 }
 0x2b6   :  { %v845_v57 = vmul.f32 %v832_v13, %v825_v25  ;;  %v846_v63 = vmul.f32 %v832_v13, %v826_v29  ;;  %v847_v22 = vmul.f32 %v832_v13, %v827_v55  ;;  %v848_v4 = vmul.f32 %v832_v13, %v828_v51 }
 0x2b7   :  { %v849_v36 = vmax.f32 %v833_v58, 0.0  ;;  %v850_v54 = vmax.f32 %v834_v21, 0.0  ;;  %v851_v40 = vmax.f32 %v835_v56, 0.0  ;;  %v852_v6 = vmax.f32 %v836_v59, 0.0 }
 0x2b8   :  { %v853_v8 = vmax.f32 %v837_v2, 0.0  ;;  %v854_v5 = vmax.f32 %v838_v26, 0.0  ;;  %v855_v49 = vmax.f32 %v839_v60, 0.0  ;;  %v856_v9 = vmax.f32 %v840_v41, 0.0 }
 0x2b9   :  { %v857_v10 = vmax.f32 %v841_v61, 0.0  ;;  %v858_v12 = vmax.f32 %v842_v53, 0.0  ;;  %v859_v16 = vmax.f32 %v843_v17, 0.0  ;;  %v860_v18 = vmax.f32 %v844_v62, 0.0 }
 0x2ba   :  { %v861_v43 = vmax.f32 %v845_v57, 0.0  ;;  %v862_v20 = vmax.f32 %v846_v63, 0.0  ;;  %v863_v23 = vmax.f32 %v847_v22, 0.0  ;;  %v864_v24 = vmax.f32 %v848_v4, 0.0 }
 0x2bb   :  { %v1036_v47 = vpack.c.bf16 %v849_v36, %v849_v36  ;;  %v1037_v48 = vpack.c.bf16 %v850_v54, %v850_v54  ;;  %v1038_v27 = vpack.c.bf16 %v851_v40, %v851_v40  ;;  %v1039_v15 = vpack.c.bf16 %v852_v6, %v852_v6 }
 0x2bc   :  { %v1040_v28 = vpack.c.bf16 %v853_v8, %v853_v8  ;;  %v1041_v30 = vpack.c.bf16 %v854_v5, %v854_v5  ;;  %v1042_v31 = vpack.c.bf16 %v855_v49, %v855_v49  ;;  %v1043_v32 = vpack.c.bf16 %v856_v9, %v856_v9 }
 0x2bd   :  { %v1044_v3 = vpack.c.bf16 %v857_v10, %v857_v10  ;;  %v1045_v33 = vpack.c.bf16 %v858_v12, %v858_v12  ;;  %v1046_v34 = vpack.c.bf16 %v859_v16, %v859_v16  ;;  %v1047_v35 = vpack.c.bf16 %v860_v18, %v860_v18  ;;  %930 = vst.msk [vmem:[%s1710_s2] sm:$0xf] %vm929_vm8, %v1036_v47 }
 0x2be   :  { %931 = vst.msk [vmem:[%s1710_s2 + $0x4] sm:$0xf] %vm929_vm8, %v1037_v48  ;;  %932 = vst.msk [vmem:[%s1710_s2 + $0x8] sm:$0xf] %vm929_vm8, %v1038_v27  ;;  %v1048_v19 = vpack.c.bf16 %v861_v43, %v861_v43  ;;  %v1049_v37 = vpack.c.bf16 %v862_v20, %v862_v20  ;;  %v1050_v7 = vpack.c.bf16 %v863_v23, %v863_v23 }
 0x2bf   :  { %933 = vst.msk [vmem:[%s1710_s2 + $0xc] sm:$0xf] %vm929_vm8, %v1039_v15  ;;  %v1051_v38 = vpack.c.bf16 %v864_v24, %v864_v24  ;;  %934 = vst.msk [vmem:[%s1710_s2 + $0x10] sm:$0xf] %vm929_vm8, %v1040_v28 }
 0x2c0   :  { %935 = vst.msk [vmem:[%s1710_s2 + $0x14] sm:$0xf] %vm929_vm8, %v1041_v30  ;;  %936 = vst.msk [vmem:[%s1710_s2 + $0x18] sm:$0xf] %vm929_vm8, %v1042_v31 }
 0x2c1   :  { %937 = vst.msk [vmem:[%s1710_s2 + $0x1c] sm:$0xf] %vm929_vm8, %v1043_v32  ;;  %938 = vst.msk [vmem:[%s1710_s2 + $0x20] sm:$0xf] %vm929_vm8, %v1044_v3 }
 0x2c2   :  { %939 = vst.msk [vmem:[%s1710_s2 + $0x24] sm:$0xf] %vm929_vm8, %v1045_v33  ;;  %940 = vst.msk [vmem:[%s1710_s2 + $0x28] sm:$0xf] %vm929_vm8, %v1046_v34 }
 0x2c3   :  { %941 = vst.msk [vmem:[%s1710_s2 + $0x2c] sm:$0xf] %vm929_vm8, %v1047_v35  ;;  %942 = vst.msk [vmem:[%s1710_s2 + $0x30] sm:$0xf] %vm929_vm8, %v1048_v19 }
 0x2c4   :  { %943 = vst.msk [vmem:[%s1710_s2 + $0x34] sm:$0xf] %vm929_vm8, %v1049_v37  ;;  %944 = vst.msk [vmem:[%s1710_s2 + $0x38] sm:$0xf] %vm929_vm8, %v1050_v7 }
 0x2c5   :  { %945 = vst.msk [vmem:[%s1710_s2 + $0x3c] sm:$0xf] %vm929_vm8, %v1051_v38 }

// kernel: decoder_forward.10
= control target key start
LH: loop header
LB: loop body
LE: loop exit
PB: predicated region body
PF: predicated region fallthrough
CT: control target
= control target key end

     0   :  { %v2286_v0 = vmov 0   ;;  %vm436_vm0 = vcmask 130048   ;;  %vm822_vm3 = vcmask 261120   ;;  %vm2289_vm4 = vmmov 0   ;;  %s2293_s11 = smov 16   ;;  %s4076_s1 = inlined_call_operand.vmem [shape: bf16[144,32], index: 1, kind: input, shape index: {}]   ;;  %s4077_s0 = inlined_call_operand.vmem [shape: bf16[512,144], index: 0, kind: input, shape index: {}]   ;;  %s4078_s2 = inlined_call_operand.vmem [shape: bf16[512,32], index: 2, kind: output, shape index: {}]  }
   0x1   :  { %533 = vmatprep.subr.bf16.mxu0 %v2286_v0  ;;  %v2179_v1 = vld [vmem:[%s4076_s1] sm:$0xff]   ;;  %2153 = vmatprep.subr.bf16.mxu1 %v2286_v0  ;;  %v2180_v2 = vld [vmem:[%s4076_s1 + $0x8] sm:$0xff]   ;;  %v2181_v3 = vld [vmem:[%s4076_s1 + $0x10] sm:$0xff]   ;;  %vm1322_vm5 = vcmask 64512   ;;  %vm1325_vm6 = vcmask 195584   ;;  %vm1796_vm7 = vcmask 257024  }
   0x2   :  { %534 = vmatpush1.bf16.msra.mxu0 %v2179_v1  ;;  %2162 = vmatpush1.bf16.msra.mxu1 %v2179_v1  ;;  %v2182_v4 = vld [vmem:[%s4076_s1 + $0x18] sm:$0xff]   ;;  %v2190_v5 = vld [vmem:[%s4077_s0 + $0x4] ss:$8 sps:$4 sm:$0xff]   ;;  %v2185_v8 = vld [vmem:[%s4076_s1 + $0x30] sm:$0xff]  }
   0x3   :  { %535 = vmatprep.subr.bf16.mxu0 %v2286_v0  ;;  %2154 = vmatprep.subr.bf16.mxu1 %v2286_v0  ;;  %v2183_v6 = vld [vmem:[%s4076_s1 + $0x20] sm:$0xff]   ;;  %v2184_v7 = vld [vmem:[%s4076_s1 + $0x28] sm:$0xff]   ;;  %v2220_v9 = vld [vmem:[%s4077_s0 + $0x114] ss:$8 sps:$4 sm:$0xff]  }
   0x4   :  { %1938 = vmatprep.mubr.msk.bf16.mxu0 %vm436_vm0, %v2190_v5  ;;  %1955 = vmatprep.mubr.msk.bf16.mxu1 %vm436_vm0, %v2220_v9  ;;  %v2186_v10 = vld [vmem:[%s4076_s1 + $0x38] sm:$0xff]   ;;  %v2187_v11 = vld [vmem:[%s4076_s1 + $0x40] sm:$0xff]   ;;  %s2292_s1 = smov 8  }
   0x5   :  { %v2188_v12 = vld [vmem:[%s4077_s0] ss:$8 sps:$4 sm:$0xff]   ;;  %v2191_v13 = vld [vmem:[%s4077_s0 + $0x14] ss:$8 sps:$4 sm:$0xff]   ;;  %v2218_v14 = vld [vmem:[%s4077_s0 + $0x110] ss:$8 sps:$4 sm:$0xff]  }
   0x6   :  { %536 = vmatpush1.bf16.msra.mxu0 %v2180_v2  ;;  %2163 = vmatpush1.bf16.msra.mxu1 %v2180_v2  ;;  %v2224_v15 = vld [vmem:[%s4077_s0 + $0x124] ss:$8 sps:$4 sm:$0xff]   ;;  %v2193_v16 = vld [vmem:[%s4077_s0 + $0x10] ss:$8 sps:$4 sm:$0xff]   ;;  %v2226_v18 = vld [vmem:[%s4077_s0 + $0x120] ss:$8 sps:$4 sm:$0xff]  }
   0x7   :  { %537 = vmatprep.subr.bf16.mxu0 %v2286_v0  ;;  %2155 = vmatprep.subr.bf16.mxu1 %v2286_v0  ;;  %v2194_v17 = vld [vmem:[%s4077_s0 + $0x24] ss:$8 sps:$4 sm:$0xff]   ;;  %v2230_v19 = vld [vmem:[%s4077_s0 + $0x134] ss:$8 sps:$4 sm:$0xff]   ;;  %v2196_v20 = vld [vmem:[%s4077_s0 + $0x20] ss:$8 sps:$4 sm:$0xff]  }
   0x8   :  { %v2197_v21 = vld [vmem:[%s4077_s0 + $0x34] ss:$8 sps:$4 sm:$0xff]   ;;  %v2232_v22 = vld [vmem:[%s4077_s0 + $0x130] ss:$8 sps:$4 sm:$0xff]   ;;  %v2236_v23 = vld [vmem:[%s4077_s0 + $0x144] ss:$8 sps:$4 sm:$0xff]  }
   0x9   :  { %v2199_v24 = vld [vmem:[%s4077_s0 + $0x30] ss:$8 sps:$4 sm:$0xff]   ;;  %v2238_v25 = vld [vmem:[%s4077_s0 + $0x140] ss:$8 sps:$4 sm:$0xff]   ;;  %v2200_v26 = vld [vmem:[%s4077_s0 + $0x44] ss:$8 sps:$4 sm:$0xff]  }
   0xa   :  { %538 = vmatpush1.bf16.msra.mxu0 %v2181_v3  ;;  %2164 = vmatpush1.bf16.msra.mxu1 %v2181_v3  ;;  %v2242_v27 = vld [vmem:[%s4077_s0 + $0x154] ss:$8 sps:$4 sm:$0xff]   ;;  %v2202_v28 = vld [vmem:[%s4077_s0 + $0x40] ss:$8 sps:$4 sm:$0xff]   ;;  %v2244_v29 = vld [vmem:[%s4077_s0 + $0x150] ss:$8 sps:$4 sm:$0xff]  }
   0xb   :  { %539 = vmatprep.subr.bf16.mxu0 %v2286_v0  ;;  %2156 = vmatprep.subr.bf16.mxu1 %v2286_v0  ;;  %v2203_v30 = vld [vmem:[%s4077_s0 + $0x54] ss:$8 sps:$4 sm:$0xff]   ;;  %v2248_v31 = vld [vmem:[%s4077_s0 + $0x164] ss:$8 sps:$4 sm:$0xff]   ;;  %v2205_v32 = vld [vmem:[%s4077_s0 + $0x50] ss:$8 sps:$4 sm:$0xff]  }
   0xc   :  { %v2250_v33 = vld [vmem:[%s4077_s0 + $0x160] ss:$8 sps:$4 sm:$0xff]   ;;  %v2206_v34 = vld [vmem:[%s4077_s0 + $0x64] ss:$8 sps:$4 sm:$0xff]   ;;  %v2254_v35 = vld [vmem:[%s4077_s0 + $0x174] ss:$8 sps:$4 sm:$0xff]  }
   0xd   :  { %v2208_v36 = vld [vmem:[%s4077_s0 + $0x60] ss:$8 sps:$4 sm:$0xff]   ;;  %v2256_v37 = vld [vmem:[%s4077_s0 + $0x170] ss:$8 sps:$4 sm:$0xff]   ;;  %v2209_v38 = vld [vmem:[%s4077_s0 + $0x74] ss:$8 sps:$4 sm:$0xff]  }
   0xe   :  { %540 = vmatpush1.bf16.msra.mxu0 %v2182_v4  ;;  %2165 = vmatpush1.bf16.msra.mxu1 %v2182_v4  ;;  %v2260_v39 = vld [vmem:[%s4077_s0 + $0x184] ss:$8 sps:$4 sm:$0xff]   ;;  %v2211_v40 = vld [vmem:[%s4077_s0 + $0x70] ss:$8 sps:$4 sm:$0xff]   ;;  %v2262_v41 = vld [vmem:[%s4077_s0 + $0x180] ss:$8 sps:$4 sm:$0xff]  }
   0xf   :  { %541 = vmatprep.subr.bf16.mxu0 %v2286_v0  ;;  %2157 = vmatprep.subr.bf16.mxu1 %v2286_v0  ;;  %v2212_v42 = vld [vmem:[%s4077_s0 + $0x84] ss:$8 sps:$4 sm:$0xff]   ;;  %v2263_v43 = vld [vmem:[%s4077_s0 + $0x194] ss:$8 sps:$4 sm:$0xff]   ;;  %v2214_v44 = vld [vmem:[%s4077_s0 + $0x80] ss:$8 sps:$4 sm:$0xff]  }
  0x10   :  { %v2265_v45 = vld [vmem:[%s4077_s0 + $0x190] ss:$8 sps:$4 sm:$0xff]   ;;  %v2215_v46 = vld [vmem:[%s4077_s0 + $0x94] ss:$8 sps:$4 sm:$0xff]   ;;  %v2266_v47 = vld [vmem:[%s4077_s0 + $0x1a4] ss:$8 sps:$4 sm:$0xff]  }
  0x11   :  { %v2217_v48 = vld [vmem:[%s4077_s0 + $0x90] ss:$8 sps:$4 sm:$0xff]   ;;  %v2268_v49 = vld [vmem:[%s4077_s0 + $0x1a0] ss:$8 sps:$4 sm:$0xff]   ;;  %v2221_v50 = vld [vmem:[%s4077_s0 + $0xa4] ss:$8 sps:$4 sm:$0xff]  }
  0x12   :  { %542 = vmatpush1.bf16.msra.mxu0 %v2183_v6  ;;  %2166 = vmatpush1.bf16.msra.mxu1 %v2183_v6  ;;  %v2269_v51 = vld [vmem:[%s4077_s0 + $0x1b4] ss:$8 sps:$4 sm:$0xff]   ;;  %v2223_v52 = vld [vmem:[%s4077_s0 + $0xa0] ss:$8 sps:$4 sm:$0xff]   ;;  %v2271_v53 = vld [vmem:[%s4077_s0 + $0x1b0] ss:$8 sps:$4 sm:$0xff]  }
  0x13   :  { %543 = vmatprep.subr.bf16.mxu0 %v2286_v0  ;;  %2158 = vmatprep.subr.bf16.mxu1 %v2286_v0  ;;  %v2227_v54 = vld [vmem:[%s4077_s0 + $0xb4] ss:$8 sps:$4 sm:$0xff]   ;;  %v2272_v55 = vld [vmem:[%s4077_s0 + $0x1c4] ss:$8 sps:$4 sm:$0xff]   ;;  %v2229_v56 = vld [vmem:[%s4077_s0 + $0xb0] ss:$8 sps:$4 sm:$0xff]  }
  0x14   :  { %v2274_v57 = vld [vmem:[%s4077_s0 + $0x1c0] ss:$8 sps:$4 sm:$0xff]   ;;  %v2233_v58 = vld [vmem:[%s4077_s0 + $0xc4] ss:$8 sps:$4 sm:$0xff]   ;;  %v2275_v59 = vld [vmem:[%s4077_s0 + $0x1d4] ss:$8 sps:$4 sm:$0xff]  }
  0x15   :  { %v2235_v60 = vld [vmem:[%s4077_s0 + $0xc0] ss:$8 sps:$4 sm:$0xff]   ;;  %v2277_v61 = vld [vmem:[%s4077_s0 + $0x1d0] ss:$8 sps:$4 sm:$0xff]   ;;  %v2239_v62 = vld [vmem:[%s4077_s0 + $0xd4] ss:$8 sps:$4 sm:$0xff]  }
  0x16   :  { %544 = vmatpush1.bf16.msra.mxu0 %v2184_v7  ;;  %2167 = vmatpush1.bf16.msra.mxu1 %v2184_v7  ;;  %v2278_v63 = vld [vmem:[%s4077_s0 + $0x1e4] ss:$8 sps:$4 sm:$0xff]   ;;  %v2280_v1 = vld [vmem:[%s4077_s0 + $0x1e0] ss:$8 sps:$4 sm:$0xff]   ;;  %v2281_v3 = vld [vmem:[%s4077_s0 + $0x1f4] ss:$8 sps:$4 sm:$0xff]  }
  0x17   :  { %545 = vmatprep.subr.bf16.mxu0 %v2286_v0  ;;  %2159 = vmatprep.subr.bf16.mxu1 %v2286_v0  ;;  %v2245_v2 = vld [vmem:[%s4077_s0 + $0xe4] ss:$8 sps:$4 sm:$0xff]   ;;  %v2247_v4 = vld [vmem:[%s4077_s0 + $0xe0] ss:$8 sps:$4 sm:$0xff]   ;;  %v2283_v5 = vld [vmem:[%s4077_s0 + $0x1f0] ss:$8 sps:$4 sm:$0xff]  }
  0x18   :  { %v2251_v6 = vld [vmem:[%s4077_s0 + $0xf4] ss:$8 sps:$4 sm:$0xff]   ;;  %v2253_v7 = vld [vmem:[%s4077_s0 + $0xf0] ss:$8 sps:$4 sm:$0xff]   ;;  %v2259_v9 = vld [vmem:[%s4077_s0 + $0x100] ss:$8 sps:$4 sm:$0xff]  }
  0x1a   :  { %546 = vmatpush1.bf16.msra.mxu0 %v2185_v8  ;;  %2168 = vmatpush1.bf16.msra.mxu1 %v2185_v8  ;;  %v2257_v8 = vld [vmem:[%s4077_s0 + $0x104] ss:$8 sps:$4 sm:$0xff]  }
  0x1b   :  { %547 = vmatprep.subr.bf16.mxu0 %v2286_v0  ;;  %2160 = vmatprep.subr.bf16.mxu1 %v2286_v0 }
  0x1e   :  { %548 = vmatpush1.bf16.msra.mxu0 %v2186_v10  ;;  %2169 = vmatpush1.bf16.msra.mxu1 %v2186_v10  ;;  %v1153_v10 = vlaneseq }
  0x1f   :  { %549 = vmatprep.subr.bf16.mxu0 %v2286_v0  ;;  %2161 = vmatprep.subr.bf16.mxu1 %v2286_v0  ;;  %v2241_v0 = vld [vmem:[%s4077_s0 + $0xd0] ss:$8 sps:$4 sm:$0xff]   ;;  %s2291_s0 = smov 24  }
  0x22   :  { %550 = vmatpush1.bf16.msra.mxu0 %v2187_v11  ;;  %2170 = vmatpush1.bf16.msra.mxu1 %v2187_v11  ;;  %v4079_v11 = vmov 0.0|0.0  }
  0x23   :  { %2141 = vmatprep.subr.bf16.mxu1 %v4079_v11 }
  0x25   :  { %566 = vmatmul.mubr.bf16.vlgmr.msra.gmra.mrb[0].mxu0 %v2188_v12  ;;  %702 = vmatmul.mubr.bf16.vlgmr.msra.gmra.mrb[0].mxu1 %v2218_v14  ;;  %v2561_v12 = vshrl.u32 %v1153_v10, 7 }
  0x26   :  { %1939 = vmatprep.mubr.msk.bf16.mxu0 %vm436_vm0, %v2191_v13  ;;  %1956 = vmatprep.mubr.msk.bf16.mxu1 %vm436_vm0, %v2224_v15  ;;  %v1156_v13 = vand.u32 127, %v1153_v10  ;;  %v4081_v15 = vmov 1.0|1.0  }
  0x28   :  { %vm1157_vm1 = vcmp.eq.s32.totalorder %v2561_v12, %v1156_v13 }
  0x29   :  { %vm2564_vm2 = vmpackc.low %vm1157_vm1, %vm1157_vm1 }
  0x2a   :  { %2143 = vmatpush3.bf16.msk.msra.mxu1 %vm2564_vm2, %v4081_v15 }
  0x2b   :  { %2144 = vmatprep.subr.bf16.mxu1 %v4079_v11 }
  0x2d   :  { %574 = vmatmul.mubr.bf16.gmra.mrb[4].mxu0 %v2193_v16  ;;  %710 = vmatmul.mubr.bf16.gmra.mrb[4].mxu1 %v2226_v18 }
  0x2e   :  { %1940 = vmatprep.mubr.msk.bf16.mxu0 %vm436_vm0, %v2194_v17  ;;  %1957 = vmatprep.mubr.msk.bf16.mxu1 %vm436_vm0, %v2230_v19 }
  0x2f   :  { %2146 = vmatpush3.bf16.msk.msra.mxu1 %vm2564_vm2, %v4081_v15 }
  0x30   :  { %2147 = vmatprep.subr.bf16.mxu1 %v4079_v11 }
  0x35   :  { %582 = vmatmul.mubr.bf16.gmra.mrb[8].mxu0 %v2196_v20  ;;  %718 = vmatmul.mubr.bf16.gmra.mrb[8].mxu1 %v2232_v22 }
  0x36   :  { %1941 = vmatprep.mubr.msk.bf16.mxu0 %vm436_vm0, %v2197_v21  ;;  %1958 = vmatprep.mubr.msk.bf16.mxu1 %vm436_vm0, %v2236_v23 }
  0x3d   :  { %590 = vmatmul.mubr.bf16.gmra.mrb[12].mxu0 %v2199_v24  ;;  %726 = vmatmul.mubr.bf16.gmra.mrb[12].mxu1 %v2238_v25 }
  0x3e   :  { %1942 = vmatprep.mubr.msk.bf16.mxu0 %vm436_vm0, %v2200_v26  ;;  %1959 = vmatprep.mubr.msk.bf16.mxu1 %vm436_vm0, %v2242_v27 }
  0x45   :  { %598 = vmatmul.mubr.bf16.gmra.mrb[16].mxu0 %v2202_v28  ;;  %734 = vmatmul.mubr.bf16.gmra.mrb[16].mxu1 %v2244_v29 }
  0x46   :  { %1943 = vmatprep.mubr.msk.bf16.mxu0 %vm436_vm0, %v2203_v30  ;;  %1960 = vmatprep.mubr.msk.bf16.mxu1 %vm436_vm0, %v2248_v31 }
  0x4d   :  { %606 = vmatmul.mubr.bf16.gmra.mrb[20].mxu0 %v2205_v32  ;;  %742 = vmatmul.mubr.bf16.gmra.mrb[20].mxu1 %v2250_v33 }
  0x4e   :  { %1944 = vmatprep.mubr.msk.bf16.mxu0 %vm436_vm0, %v2206_v34  ;;  %1961 = vmatprep.mubr.msk.bf16.mxu1 %vm436_vm0, %v2254_v35 }
  0x55   :  { %614 = vmatmul.mubr.bf16.gmra.mrb[24].mxu0 %v2208_v36  ;;  %750 = vmatmul.mubr.bf16.gmra.mrb[24].mxu1 %v2256_v37 }
  0x56   :  { %1945 = vmatprep.mubr.msk.bf16.mxu0 %vm436_vm0, %v2209_v38  ;;  %1962 = vmatprep.mubr.msk.bf16.mxu1 %vm436_vm0, %v2260_v39 }
  0x5d   :  { %622 = vmatmul.mubr.bf16.gmra.mrb[28].mxu0 %v2211_v40  ;;  %758 = vmatmul.mubr.bf16.gmra.mrb[28].mxu1 %v2262_v41 }
  0x5e   :  { %1946 = vmatprep.mubr.msk.bf16.mxu0 %vm436_vm0, %v2212_v42  ;;  %1963 = vmatprep.mubr.msk.bf16.mxu1 %vm436_vm0, %v2263_v43 }
  0x65   :  { %630 = vmatmul.mubr.bf16.gmra.mrb[32].mxu0 %v2214_v44  ;;  %766 = vmatmul.mubr.bf16.gmra.mrb[32].mxu1 %v2265_v45 }
  0x66   :  { %1947 = vmatprep.mubr.msk.bf16.mxu0 %vm436_vm0, %v2215_v46  ;;  %1964 = vmatprep.mubr.msk.bf16.mxu1 %vm436_vm0, %v2266_v47 }
  0x6d   :  { %638 = vmatmul.mubr.bf16.gmra.mrb[36].mxu0 %v2217_v48  ;;  %774 = vmatmul.mubr.bf16.gmra.mrb[36].mxu1 %v2268_v49 }
  0x6e   :  { %1948 = vmatprep.mubr.msk.bf16.mxu0 %vm436_vm0, %v2221_v50  ;;  %1965 = vmatprep.mubr.msk.bf16.mxu1 %vm436_vm0, %v2269_v51 }
  0x75   :  { %646 = vmatmul.mubr.bf16.gmra.mrb[40].mxu0 %v2223_v52  ;;  %782 = vmatmul.mubr.bf16.gmra.mrb[40].mxu1 %v2271_v53 }
  0x76   :  { %1949 = vmatprep.mubr.msk.bf16.mxu0 %vm436_vm0, %v2227_v54  ;;  %1966 = vmatprep.mubr.msk.bf16.mxu1 %vm436_vm0, %v2272_v55 }
  0x7d   :  { %654 = vmatmul.mubr.bf16.gmra.mrb[44].mxu0 %v2229_v56  ;;  %790 = vmatmul.mubr.bf16.gmra.mrb[44].mxu1 %v2274_v57 }
  0x7e   :  { %1950 = vmatprep.mubr.msk.bf16.mxu0 %vm436_vm0, %v2233_v58  ;;  %1967 = vmatprep.mubr.msk.bf16.mxu1 %vm436_vm0, %v2275_v59 }
  0x85   :  { %662 = vmatmul.mubr.bf16.gmra.mrb[48].mxu0 %v2235_v60  ;;  %798 = vmatmul.mubr.bf16.gmra.mrb[48].mxu1 %v2277_v61 }
  0x86   :  { %1951 = vmatprep.mubr.msk.bf16.mxu0 %vm436_vm0, %v2239_v62  ;;  %1968 = vmatprep.mubr.msk.bf16.mxu1 %vm436_vm0, %v2278_v63 }
  0x8d   :  { %670 = vmatmul.mubr.bf16.gmra.mrb[52].mxu0 %v2241_v0  ;;  %806 = vmatmul.mubr.bf16.gmra.mrb[52].mxu1 %v2280_v1 }
  0x8e   :  { %1952 = vmatprep.mubr.msk.bf16.mxu0 %vm436_vm0, %v2245_v2  ;;  %1969 = vmatprep.mubr.msk.bf16.mxu1 %vm436_vm0, %v2281_v3 }
  0x95   :  { %678 = vmatmul.mubr.bf16.gmra.mrb[56].mxu0 %v2247_v4  ;;  %814 = vmatmul.mubr.bf16.gmra.mrb[56].mxu1 %v2283_v5 }
  0x96   :  { %1953 = vmatprep.mubr.msk.bf16.mxu0 %vm436_vm0, %v2251_v6 }
  0x9d   :  { %686 = vmatmul.mubr.bf16.gmra.mrb[60].mxu0 %v2253_v7 }
  0x9e   :  { %1954 = vmatprep.mubr.msk.bf16.mxu0 %vm436_vm0, %v2257_v8 }
  0xa5   :  { %694 = vmatmul.mubr.bf16.gmra.mrb[64].mxu0 %v2259_v9 }
  0xf8   :  { %v2576_v16 = vpop.f32.mrb[0].mxu0  ;;  %v2578_v17 = vpop.f32.mrb[0].mxu1 }
  0xf9   :  { %v956_v18 = vmul.f32 %v2576_v16, %v2576_v16  ;;  %v569_v19 = vpop.f32.mrb[1].mxu0  ;;  %v705_v20 = vpop.f32.mrb[1].mxu1  ;;  %v823_v23 = vsel %vm822_vm3, %v2576_v16, 0.0 }
  0xfa   :  { %v2582_v21 = vpop.f32.mrb[2].mxu0  ;;  %v2584_v22 = vpop.f32.mrb[2].mxu1 }
  0xfb   :  { %v824_v24 = vsel %vm822_vm3, %v2582_v21, 0.0  ;;  %v957_v25 = vmul.f32 %v2582_v21, %v2582_v21  ;;  %v572_v26 = vpop.f32.mrb[3].mxu0  ;;  %v708_v27 = vpop.f32.mrb[3].mxu1  ;;  %v1020_v29 = vsel %vm822_vm3, %v956_v18, 0.0 }
  0xfc   :  { %v825_v28 = vadd.f32 %v824_v24, %v823_v23 }
  0xfd   :  { %v1021_v30 = vsel %vm822_vm3, %v957_v25, 0.0 }
  0xfe   :  { %v1022_v31 = vadd.f32 %v1021_v30, %v1020_v29 }
 0x100   :  { %v2594_v32 = vpop.f32.mrb[4].mxu0  ;;  %v2596_v33 = vpop.f32.mrb[4].mxu1 }
 0x101   :  { %v826_v34 = vsel %vm822_vm3, %v2594_v32, 0.0  ;;  %v958_v35 = vmul.f32 %v2594_v32, %v2594_v32  ;;  %v577_v36 = vpop.f32.mrb[5].mxu0  ;;  %v713_v37 = vpop.f32.mrb[5].mxu1 }
 0x102   :  { %v827_v38 = vadd.f32 %v826_v34, %v825_v28  ;;  %v2602_v39 = vpop.f32.mrb[6].mxu0  ;;  %v2604_v40 = vpop.f32.mrb[6].mxu1 }
 0x103   :  { %v1023_v41 = vsel %vm822_vm3, %v958_v35, 0.0  ;;  %v828_v42 = vsel %vm822_vm3, %v2602_v39, 0.0  ;;  %v959_v43 = vmul.f32 %v2602_v39, %v2602_v39  ;;  %v580_v44 = vpop.f32.mrb[7].mxu0  ;;  %v716_v45 = vpop.f32.mrb[7].mxu1 }
 0x104   :  { %v1024_v46 = vadd.f32 %v1023_v41, %v1022_v31  ;;  %v829_v47 = vadd.f32 %v828_v42, %v827_v38 }
 0x105   :  { %v1025_v48 = vsel %vm822_vm3, %v959_v43, 0.0 }
 0x106   :  { %v1026_v49 = vadd.f32 %v1025_v48, %v1024_v46 }
 0x108   :  { %v2612_v50 = vpop.f32.mrb[8].mxu0  ;;  %v2614_v51 = vpop.f32.mrb[8].mxu1 }
 0x109   :  { %v830_v52 = vsel %vm822_vm3, %v2612_v50, 0.0  ;;  %v960_v53 = vmul.f32 %v2612_v50, %v2612_v50  ;;  %v585_v54 = vpop.f32.mrb[9].mxu0  ;;  %v721_v55 = vpop.f32.mrb[9].mxu1 }
 0x10a   :  { %v831_v56 = vadd.f32 %v830_v52, %v829_v47  ;;  %v2620_v57 = vpop.f32.mrb[10].mxu0  ;;  %v2622_v58 = vpop.f32.mrb[10].mxu1 }
 0x10b   :  { %v1027_v59 = vsel %vm822_vm3, %v960_v53, 0.0  ;;  %v832_v60 = vsel %vm822_vm3, %v2620_v57, 0.0  ;;  %v961_v61 = vmul.f32 %v2620_v57, %v2620_v57  ;;  %v588_v62 = vpop.f32.mrb[11].mxu0  ;;  %v724_v63 = vpop.f32.mrb[11].mxu1 }
 0x10c   :  { %v1028_v0 = vadd.f32 %v1027_v59, %v1026_v49  ;;  %v833_v1 = vadd.f32 %v832_v60, %v831_v56 }
 0x10d   :  { %v1029_v2 = vsel %vm822_vm3, %v961_v61, 0.0 }
 0x10e   :  { %v1030_v3 = vadd.f32 %v1029_v2, %v1028_v0 }
 0x110   :  { %v2630_v4 = vpop.f32.mrb[12].mxu0  ;;  %v2632_v5 = vpop.f32.mrb[12].mxu1 }
 0x111   :  { %v834_v6 = vsel %vm822_vm3, %v2630_v4, 0.0  ;;  %v962_v7 = vmul.f32 %v2630_v4, %v2630_v4  ;;  %v593_v8 = vpop.f32.mrb[13].mxu0  ;;  %v729_v9 = vpop.f32.mrb[13].mxu1 }
 0x112   :  { %v835_v10 = vadd.f32 %v834_v6, %v833_v1  ;;  %v2638_v13 = vpop.f32.mrb[14].mxu0  ;;  %v2640_v18 = vpop.f32.mrb[14].mxu1 }
 0x113   :  { %v1031_v19 = vsel %vm822_vm3, %v962_v7, 0.0  ;;  %v836_v20 = vsel %vm822_vm3, %v2638_v13, 0.0  ;;  %v963_v23 = vmul.f32 %v2638_v13, %v2638_v13  ;;  %v596_v24 = vpop.f32.mrb[15].mxu0  ;;  %v732_v25 = vpop.f32.mrb[15].mxu1 }
 0x114   :  { %v1032_v26 = vadd.f32 %v1031_v19, %v1030_v3  ;;  %v837_v27 = vadd.f32 %v836_v20, %v835_v10 }
 0x115   :  { %v1033_v28 = vsel %vm822_vm3, %v963_v23, 0.0 }
 0x116   :  { %v1034_v29 = vadd.f32 %v1033_v28, %v1032_v26 }
 0x118   :  { %v2648_v30 = vpop.f32.mrb[16].mxu0  ;;  %v2650_v31 = vpop.f32.mrb[16].mxu1 }
 0x119   :  { %v838_v34 = vsel %vm822_vm3, %v2648_v30, 0.0  ;;  %v964_v35 = vmul.f32 %v2648_v30, %v2648_v30  ;;  %v601_v36 = vpop.f32.mrb[17].mxu0  ;;  %v737_v37 = vpop.f32.mrb[17].mxu1 }
 0x11a   :  { %v839_v38 = vadd.f32 %v838_v34, %v837_v27  ;;  %v2656_v41 = vpop.f32.mrb[18].mxu0  ;;  %v2658_v42 = vpop.f32.mrb[18].mxu1 }
 0x11b   :  { %v1035_v43 = vsel %vm822_vm3, %v964_v35, 0.0  ;;  %v840_v44 = vsel %vm822_vm3, %v2656_v41, 0.0  ;;  %v965_v45 = vmul.f32 %v2656_v41, %v2656_v41  ;;  %v604_v46 = vpop.f32.mrb[19].mxu0  ;;  %v740_v47 = vpop.f32.mrb[19].mxu1 }
 0x11c   :  { %v1036_v48 = vadd.f32 %v1035_v43, %v1034_v29  ;;  %v841_v49 = vadd.f32 %v840_v44, %v839_v38 }
 0x11d   :  { %v1037_v52 = vsel %vm822_vm3, %v965_v45, 0.0 }
 0x11e   :  { %v1038_v53 = vadd.f32 %v1037_v52, %v1036_v48 }
 0x120   :  { %v2666_v54 = vpop.f32.mrb[20].mxu0  ;;  %v2668_v55 = vpop.f32.mrb[20].mxu1 }
 0x121   :  { %v842_v56 = vsel %vm822_vm3, %v2666_v54, 0.0  ;;  %v966_v59 = vmul.f32 %v2666_v54, %v2666_v54  ;;  %v609_v60 = vpop.f32.mrb[21].mxu0  ;;  %v745_v61 = vpop.f32.mrb[21].mxu1 }
 0x122   :  { %v843_v62 = vadd.f32 %v842_v56, %v841_v49  ;;  %v2674_v63 = vpop.f32.mrb[22].mxu0  ;;  %v2676_v0 = vpop.f32.mrb[22].mxu1 }
 0x123   :  { %v1039_v1 = vsel %vm822_vm3, %v966_v59, 0.0  ;;  %v844_v2 = vsel %vm822_vm3, %v2674_v63, 0.0  ;;  %v967_v3 = vmul.f32 %v2674_v63, %v2674_v63  ;;  %v612_v6 = vpop.f32.mrb[23].mxu0  ;;  %v748_v7 = vpop.f32.mrb[23].mxu1 }
 0x124   :  { %v1040_v8 = vadd.f32 %v1039_v1, %v1038_v53  ;;  %v845_v9 = vadd.f32 %v844_v2, %v843_v62 }
 0x125   :  { %v1041_v10 = vsel %vm822_vm3, %v967_v3, 0.0 }
 0x126   :  { %v1042_v19 = vadd.f32 %v1041_v10, %v1040_v8 }
 0x128   :  { %v2684_v20 = vpop.f32.mrb[24].mxu0  ;;  %v2686_v23 = vpop.f32.mrb[24].mxu1 }
 0x129   :  { %v846_v24 = vsel %vm822_vm3, %v2684_v20, 0.0  ;;  %v968_v25 = vmul.f32 %v2684_v20, %v2684_v20  ;;  %v617_v26 = vpop.f32.mrb[25].mxu0  ;;  %v753_v27 = vpop.f32.mrb[25].mxu1 }
 0x12a   :  { %v847_v28 = vadd.f32 %v846_v24, %v845_v9  ;;  %v2692_v29 = vpop.f32.mrb[26].mxu0  ;;  %v2694_v34 = vpop.f32.mrb[26].mxu1 }
 0x12b   :  { %v1043_v35 = vsel %vm822_vm3, %v968_v25, 0.0  ;;  %v848_v36 = vsel %vm822_vm3, %v2692_v29, 0.0  ;;  %v969_v37 = vmul.f32 %v2692_v29, %v2692_v29  ;;  %v620_v38 = vpop.f32.mrb[27].mxu0  ;;  %v756_v43 = vpop.f32.mrb[27].mxu1 }
 0x12c   :  { %v1044_v44 = vadd.f32 %v1043_v35, %v1042_v19  ;;  %v849_v45 = vadd.f32 %v848_v36, %v847_v28 }
 0x12d   :  { %v1045_v46 = vsel %vm822_vm3, %v969_v37, 0.0 }
 0x12e   :  { %v1046_v47 = vadd.f32 %v1045_v46, %v1044_v44 }
 0x130   :  { %v2702_v48 = vpop.f32.mrb[28].mxu0  ;;  %v2704_v49 = vpop.f32.mrb[28].mxu1 }
 0x131   :  { %4162 = vst [vmem:[#allocation2_spill] sm:$0xff] %v2702_v48  ;;  %v850_v52 = vsel %vm822_vm3, %v2702_v48, 0.0  ;;  %v970_v53 = vmul.f32 %v2702_v48, %v2702_v48  ;;  %v625_v56 = vpop.f32.mrb[29].mxu0  ;;  %v761_v59 = vpop.f32.mrb[29].mxu1 }
 0x132   :  { %v851_v60 = vadd.f32 %v850_v52, %v849_v45  ;;  %v2710_v61 = vpop.f32.mrb[30].mxu0  ;;  %v2712_v62 = vpop.f32.mrb[30].mxu1 }
 0x133   :  { %4163 = vst [vmem:[#allocation3_spill] sm:$0xff] %v2710_v61  ;;  %v1047_v1 = vsel %vm822_vm3, %v970_v53, 0.0  ;;  %v852_v2 = vsel %vm822_vm3, %v2710_v61, 0.0  ;;  %v971_v3 = vmul.f32 %v2710_v61, %v2710_v61  ;;  %v628_v6 = vpop.f32.mrb[31].mxu0  ;;  %v764_v7 = vpop.f32.mrb[31].mxu1 }
 0x134   :  { %v1048_v8 = vadd.f32 %v1047_v1, %v1046_v47  ;;  %v853_v9 = vadd.f32 %v852_v2, %v851_v60 }
 0x135   :  { %v1049_v10 = vsel %vm822_vm3, %v971_v3, 0.0 }
 0x136   :  { %v1050_v19 = vadd.f32 %v1049_v10, %v1048_v8 }
 0x138   :  { %v2720_v24 = vpop.f32.mrb[32].mxu0  ;;  %v2722_v25 = vpop.f32.mrb[32].mxu1 }
 0x139   :  { %4164 = vst [vmem:[#allocation4_spill] sm:$0xff] %v2720_v24  ;;  %4165 = vst [vmem:[#allocation5_spill] sm:$0xff] %v2722_v25  ;;  %v854_v26 = vsel %vm822_vm3, %v2720_v24, 0.0  ;;  %v972_v27 = vmul.f32 %v2720_v24, %v2720_v24  ;;  %v633_v28 = vpop.f32.mrb[33].mxu0  ;;  %v769_v35 = vpop.f32.mrb[33].mxu1 }
 0x13a   :  { %v855_v36 = vadd.f32 %v854_v26, %v853_v9  ;;  %v2728_v37 = vpop.f32.mrb[34].mxu0  ;;  %v2730_v38 = vpop.f32.mrb[34].mxu1 }
 0x13b   :  { %4166 = vst [vmem:[#allocation6_spill] sm:$0xff] %v2728_v37  ;;  %4167 = vst [vmem:[#allocation7_spill] sm:$0xff] %v2730_v38  ;;  %v1051_v43 = vsel %vm822_vm3, %v972_v27, 0.0  ;;  %v856_v44 = vsel %vm822_vm3, %v2728_v37, 0.0  ;;  %v973_v45 = vmul.f32 %v2728_v37, %v2728_v37  ;;  %v636_v46 = vpop.f32.mrb[35].mxu0  ;;  %v772_v47 = vpop.f32.mrb[35].mxu1 }
 0x13c   :  { %v1052_v52 = vadd.f32 %v1051_v43, %v1050_v19  ;;  %v857_v53 = vadd.f32 %v856_v44, %v855_v36  ;;  %v4080_v46 = vmov 0.0  }
 0x13d   :  { %v1053_v56 = vsel %vm822_vm3, %v973_v45, 0.0  ;;  %2127 = vmatprep.mubr.msk.f32.mxu1 %vm2289_vm4, %v4080_v46 }
 0x13e   :  { %v1054_v59 = vadd.f32 %v1053_v56, %v1052_v52 }
 0x140   :  { %v2738_v60 = vpop.f32.mrb[36].mxu0  ;;  %v2740_v1 = vpop.f32.mrb[36].mxu1 }
 0x141   :  { %4168 = vst [vmem:[#allocation8_spill] sm:$0xff] %v2738_v60  ;;  %4169 = vst [vmem:[#allocation9_spill] sm:$0xff] %v2740_v1  ;;  %v858_v2 = vsel %vm822_vm3, %v2738_v60, 0.0  ;;  %v974_v3 = vmul.f32 %v2738_v60, %v2738_v60  ;;  %v641_v6 = vpop.f32.mrb[37].mxu0  ;;  %v777_v7 = vpop.f32.mrb[37].mxu1 }
 0x142   :  { %v859_v8 = vadd.f32 %v858_v2, %v857_v53  ;;  %v2746_v9 = vpop.f32.mrb[38].mxu0  ;;  %v2748_v10 = vpop.f32.mrb[38].mxu1 }
 0x143   :  { %4170 = vst [vmem:[#allocation10_spill] sm:$0xff] %v2746_v9  ;;  %4171 = vst [vmem:[#allocation11_spill] sm:$0xff] %v2748_v10  ;;  %v1055_v19 = vsel %vm822_vm3, %v974_v3, 0.0  ;;  %v860_v26 = vsel %vm822_vm3, %v2746_v9, 0.0  ;;  %v975_v27 = vmul.f32 %v2746_v9, %v2746_v9  ;;  %v644_v28 = vpop.f32.mrb[39].mxu0  ;;  %v780_v35 = vpop.f32.mrb[39].mxu1 }
 0x144   :  { %v1056_v36 = vadd.f32 %v1055_v19, %v1054_v59  ;;  %v861_v43 = vadd.f32 %v860_v26, %v859_v8 }
 0x145   :  { %v1057_v44 = vsel %vm822_vm3, %v975_v27, 0.0 }
 0x146   :  { %v1058_v45 = vadd.f32 %v1057_v44, %v1056_v36 }
 0x148   :  { %v2758_v47 = vpop.f32.mrb[40].mxu0  ;;  %v2760_v52 = vpop.f32.mrb[40].mxu1 }
 0x149   :  { %4172 = vst [vmem:[#allocation12_spill] sm:$0xff] %v2758_v47  ;;  %v862_v53 = vsel %vm822_vm3, %v2758_v47, 0.0  ;;  %v976_v56 = vmul.f32 %v2758_v47, %v2758_v47  ;;  %v649_v59 = vpop.f32.mrb[41].mxu0  ;;  %v785_v2 = vpop.f32.mrb[41].mxu1 }
 0x14a   :  { %v863_v3 = vadd.f32 %v862_v53, %v861_v43  ;;  %v2766_v6 = vpop.f32.mrb[42].mxu0  ;;  %v2768_v7 = vpop.f32.mrb[42].mxu1 }
 0x14b   :  { %4173 = vst [vmem:[#allocation13_spill] sm:$0xff] %v2766_v6  ;;  %4174 = vst [vmem:[#allocation14_spill] sm:$0xff] %v2768_v7  ;;  %v1059_v8 = vsel %vm822_vm3, %v976_v56, 0.0  ;;  %v864_v19 = vsel %vm822_vm3, %v2766_v6, 0.0  ;;  %v977_v26 = vmul.f32 %v2766_v6, %v2766_v6  ;;  %v652_v27 = vpop.f32.mrb[43].mxu0  ;;  %v788_v28 = vpop.f32.mrb[43].mxu1 }
 0x14c   :  { %v1060_v35 = vadd.f32 %v1059_v8, %v1058_v45  ;;  %v865_v36 = vadd.f32 %v864_v19, %v863_v3 }
 0x14d   :  { %v1061_v44 = vsel %vm822_vm3, %v977_v26, 0.0 }
 0x14e   :  { %v1062_v59 = vadd.f32 %v1061_v44, %v1060_v35 }
 0x150   :  { %v2776_v43 = vpop.f32.mrb[44].mxu0  ;;  %v2778_v53 = vpop.f32.mrb[44].mxu1 }
 0x151   :  { %4175 = vst [vmem:[#allocation15_spill] sm:$0xff] %v2776_v43  ;;  %4176 = vst [vmem:[#allocation16_spill] sm:$0xff] %v2778_v53  ;;  %v866_v56 = vsel %vm822_vm3, %v2776_v43, 0.0  ;;  %v978_v2 = vmul.f32 %v2776_v43, %v2776_v43  ;;  %v657_v11 = vpop.f32.mrb[45].mxu0  ;;  %v793_v46 = vpop.f32.mrb[45].mxu1 }
 0x152   :  { %v867_v15 = vadd.f32 %v866_v56, %v865_v36  ;;  %v2784_v27 = vpop.f32.mrb[46].mxu0  ;;  %v2786_v45 = vpop.f32.mrb[46].mxu1 }
 0x153   :  { %4177 = vst [vmem:[#allocation17_spill] sm:$0xff] %v2784_v27  ;;  %4178 = vst [vmem:[#allocation18_spill] sm:$0xff] %v2786_v45  ;;  %v1063_v3 = vsel %vm822_vm3, %v978_v2, 0.0  ;;  %v868_v8 = vsel %vm822_vm3, %v2784_v27, 0.0  ;;  %v979_v19 = vmul.f32 %v2784_v27, %v2784_v27  ;;  %v660_v26 = vpop.f32.mrb[47].mxu0  ;;  %v796_v28 = vpop.f32.mrb[47].mxu1 }
 0x154   :  { %v1064_v35 = vadd.f32 %v1063_v3, %v1062_v59  ;;  %v869_v44 = vadd.f32 %v868_v8, %v867_v15 }
 0x155   :  { %v1065_v11 = vsel %vm822_vm3, %v979_v19, 0.0 }
 0x156   :  { %v1066_v46 = vadd.f32 %v1065_v11, %v1064_v35 }
 0x158   :  { %v2794_v36 = vpop.f32.mrb[48].mxu0  ;;  %v2796_v56 = vpop.f32.mrb[48].mxu1 }
 0x159   :  { %4179 = vst [vmem:[#allocation19_spill] sm:$0xff] %v2794_v36  ;;  %4180 = vst [vmem:[#allocation20_spill] sm:$0xff] %v2796_v56  ;;  %v870_v2 = vsel %vm822_vm3, %v2794_v36, 0.0  ;;  %v980_v43 = vmul.f32 %v2794_v36, %v2794_v36  ;;  %v665_v6 = vpop.f32.mrb[49].mxu0  ;;  %v801_v47 = vpop.f32.mrb[49].mxu1 }
 0x15a   :  { %v871_v27 = vadd.f32 %v870_v2, %v869_v44  ;;  %v2802_v26 = vpop.f32.mrb[50].mxu0  ;;  %v2804_v59 = vpop.f32.mrb[50].mxu1 }
 0x15b   :  { %4181 = vst [vmem:[#allocation21_spill] sm:$0xff] %v2802_v26  ;;  %4182 = vst [vmem:[#allocation22_spill] sm:$0xff] %v2804_v59  ;;  %v1067_v15 = vsel %vm822_vm3, %v980_v43, 0.0  ;;  %v872_v3 = vsel %vm822_vm3, %v2802_v26, 0.0  ;;  %v981_v8 = vmul.f32 %v2802_v26, %v2802_v26  ;;  %v668_v19 = vpop.f32.mrb[51].mxu0  ;;  %v804_v28 = vpop.f32.mrb[51].mxu1 }
 0x15c   :  { %v1068_v35 = vadd.f32 %v1067_v15, %v1066_v46  ;;  %v873_v11 = vadd.f32 %v872_v3, %v871_v27 }
 0x15d   :  { %v1069_v6 = vsel %vm822_vm3, %v981_v8, 0.0 }
 0x15e   :  { %v1070_v47 = vadd.f32 %v1069_v6, %v1068_v35 }
 0x160   :  { %v2812_v44 = vpop.f32.mrb[52].mxu0  ;;  %v2814_v2 = vpop.f32.mrb[52].mxu1 }
 0x161   :  { %4183 = vst [vmem:[#allocation23_spill] sm:$0xff] %v2812_v44  ;;  %4184 = vst [vmem:[#allocation24_spill] sm:$0xff] %v2814_v2  ;;  %v874_v43 = vsel %vm822_vm3, %v2812_v44, 0.0  ;;  %v982_v36 = vmul.f32 %v2812_v44, %v2812_v44  ;;  %v673_v9 = vpop.f32.mrb[53].mxu0  ;;  %v809_v60 = vpop.f32.mrb[53].mxu1 }
 0x162   :  { %v875_v26 = vadd.f32 %v874_v43, %v873_v11  ;;  %v2820_v19 = vpop.f32.mrb[54].mxu0  ;;  %v2822_v46 = vpop.f32.mrb[54].mxu1 }
 0x163   :  { %4185 = vst [vmem:[#allocation25_spill] sm:$0xff] %v2820_v19  ;;  %4186 = vst [vmem:[#allocation26_spill] sm:$0xff] %v2822_v46  ;;  %v1071_v27 = vsel %vm822_vm3, %v982_v36, 0.0  ;;  %v876_v15 = vsel %vm822_vm3, %v2820_v19, 0.0  ;;  %v983_v3 = vmul.f32 %v2820_v19, %v2820_v19  ;;  %v676_v8 = vpop.f32.mrb[55].mxu0  ;;  %v812_v28 = vpop.f32.mrb[55].mxu1 }
 0x164   :  { %v1072_v35 = vadd.f32 %v1071_v27, %v1070_v47  ;;  %v877_v6 = vadd.f32 %v876_v15, %v875_v26 }
 0x165   :  { %v1073_v9 = vsel %vm822_vm3, %v983_v3, 0.0 }
 0x166   :  { %v1074_v60 = vadd.f32 %v1073_v9, %v1072_v35 }
 0x168   :  { %v2830_v11 = vpop.f32.mrb[56].mxu0  ;;  %v2832_v43 = vpop.f32.mrb[56].mxu1 }
 0x169   :  { %4187 = vst [vmem:[#allocation27_spill] sm:$0xff] %v2830_v11  ;;  %4188 = vst [vmem:[#allocation28_spill] sm:$0xff] %v2832_v43  ;;  %v878_v36 = vsel %vm822_vm3, %v2830_v11, 0.0  ;;  %v984_v44 = vmul.f32 %v2830_v11, %v2830_v11  ;;  %v681_v37 = vpop.f32.mrb[57].mxu0  ;;  %v817_v24 = vpop.f32.mrb[57].mxu1 }
 0x16a   :  { %v879_v19 = vadd.f32 %v878_v36, %v877_v6  ;;  %v2838_v8 = vpop.f32.mrb[58].mxu0  ;;  %v2840_v47 = vpop.f32.mrb[58].mxu1 }
 0x16b   :  { %v1075_v26 = vsel %vm822_vm3, %v984_v44, 0.0  ;;  %v880_v27 = vsel %vm822_vm3, %v2838_v8, 0.0  ;;  %v985_v15 = vmul.f32 %v2838_v8, %v2838_v8  ;;  %v684_v3 = vpop.f32.mrb[59].mxu0  ;;  %v820_v28 = vpop.f32.mrb[59].mxu1 }
 0x16c   :  { %v1076_v35 = vadd.f32 %v1075_v26, %v1074_v60  ;;  %v881_v9 = vadd.f32 %v880_v27, %v879_v19 }
 0x16d   :  { %v1077_v37 = vsel %vm822_vm3, %v985_v15, 0.0 }
 0x16e   :  { %v1078_v24 = vadd.f32 %v1077_v37, %v1076_v35 }
 0x170   :  { %v2848_v6 = vpop.f32.mrb[60].mxu0 }
 0x171   :  { %4189 = vst [vmem:[#allocation29_spill] sm:$0xff] %v2848_v6  ;;  %v882_v36 = vsel %vm822_vm3, %v2848_v6, 0.0  ;;  %v986_v44 = vmul.f32 %v2848_v6, %v2848_v6  ;;  %v689_v11 = vpop.f32.mrb[61].mxu0 }
 0x172   :  { %v883_v61 = vadd.f32 %v882_v36, %v881_v9  ;;  %v2854_v48 = vpop.f32.mrb[62].mxu0 }
 0x173   :  { %4190 = vst [vmem:[#allocation30_spill] sm:$0xff] %v2854_v48  ;;  %v1079_v3 = vsel %vm822_vm3, %v986_v44, 0.0  ;;  %v884_v19 = vsel %vm822_vm3, %v2854_v48, 0.0  ;;  %v987_v60 = vmul.f32 %v2854_v48, %v2854_v48  ;;  %v692_v26 = vpop.f32.mrb[63].mxu0  ;;  %v892_v48 = vsel %vm822_vm3, %v2584_v22, 0.0 }
 0x174   :  { %v1080_v27 = vadd.f32 %v1079_v3, %v1078_v24  ;;  %v885_v15 = vadd.f32 %v884_v19, %v883_v61  ;;  %v990_v26 = vmul.f32 %v2578_v17, %v2578_v17 }
 0x175   :  { %v1081_v28 = vsel %vm822_vm3, %v987_v60, 0.0 }
 0x176   :  { %v1082_v35 = vadd.f32 %v1081_v28, %v1080_v27  ;;  %v890_v28 = vsel %vm822_vm3, %v2578_v17, 0.0 }
 0x178   :  { %v2862_v37 = vpop.f32.mrb[64].mxu0 }
 0x179   :  { %4191 = vst [vmem:[#allocation31_spill] sm:$0xff] %v2862_v37  ;;  %v886_v11 = vsel %vm822_vm3, %v2862_v37, 0.0  ;;  %v988_v9 = vmul.f32 %v2862_v37, %v2862_v37  ;;  %v697_v36 = vpop.f32.mrb[65].mxu0 }
 0x17a   :  { %v887_v44 = vadd.f32 %v886_v11, %v885_v15  ;;  %v2868_v6 = vpop.f32.mrb[66].mxu0  ;;  %v991_v15 = vmul.f32 %v2584_v22, %v2584_v22 }
 0x17b   :  { %4192 = vst [vmem:[#allocation32_spill] sm:$0xff] %v2868_v6  ;;  %v1083_v61 = vsel %vm822_vm3, %v988_v9, 0.0  ;;  %v888_v24 = vsel %vm822_vm3, %v2868_v6, 0.0  ;;  %v989_v3 = vmul.f32 %v2868_v6, %v2868_v6  ;;  %v700_v19 = vpop.f32.mrb[67].mxu0  ;;  %v1087_v9 = vsel %vm822_vm3, %v990_v26, 0.0 }
 0x17c   :  { %v1084_v60 = vadd.f32 %v1083_v61, %v1082_v35  ;;  %v889_v27 = vadd.f32 %v888_v24, %v887_v44  ;;  %v992_v19 = vmul.f32 %v2596_v33, %v2596_v33  ;;  %v1089_v61 = vsel %vm822_vm3, %v991_v15, 0.0 }
 0x17d   :  { %v1085_v11 = vsel %vm822_vm3, %v989_v3, 0.0  ;;  %v894_v24 = vsel %vm822_vm3, %v2596_v33, 0.0  ;;  %v993_v3 = vmul.f32 %v2604_v40, %v2604_v40 }
 0x17e   :  { %v891_v36 = vadd.f32 %v890_v28, %v889_v27  ;;  %v1086_v37 = vadd.f32 %v1085_v11, %v1084_v60  ;;  %v1091_v26 = vsel %vm822_vm3, %v992_v19, 0.0  ;;  %v896_v28 = vsel %vm822_vm3, %v2604_v40, 0.0 }
 0x17f   :  { %v994_v11 = vmul.f32 %v2614_v51, %v2614_v51  ;;  %v1093_v15 = vsel %vm822_vm3, %v993_v3, 0.0 }
 0x180   :  { %v893_v35 = vadd.f32 %v892_v48, %v891_v36  ;;  %v1088_v44 = vadd.f32 %v1087_v9, %v1086_v37  ;;  %v898_v36 = vsel %vm822_vm3, %v2614_v51, 0.0  ;;  %v995_v9 = vmul.f32 %v2622_v58, %v2622_v58 }
 0x181   :  { %v1095_v19 = vsel %vm822_vm3, %v994_v11, 0.0 }
 0x182   :  { %v895_v27 = vadd.f32 %v894_v24, %v893_v35  ;;  %v1090_v60 = vadd.f32 %v1089_v61, %v1088_v44  ;;  %v900_v61 = vsel %vm822_vm3, %v2622_v58, 0.0  ;;  %v996_v24 = vmul.f32 %v2632_v5, %v2632_v5 }
 0x183   :  { %v1097_v3 = vsel %vm822_vm3, %v995_v9, 0.0 }
 0x184   :  { %v897_v48 = vadd.f32 %v896_v28, %v895_v27  ;;  %v1092_v37 = vadd.f32 %v1091_v26, %v1090_v60  ;;  %v902_v26 = vsel %vm822_vm3, %v2632_v5, 0.0  ;;  %v997_v28 = vmul.f32 %v2640_v18, %v2640_v18 }
 0x185   :  { %v1099_v11 = vsel %vm822_vm3, %v996_v24, 0.0 }
 0x186   :  { %v899_v35 = vadd.f32 %v898_v36, %v897_v48  ;;  %v1094_v44 = vadd.f32 %v1093_v15, %v1092_v37  ;;  %v904_v15 = vsel %vm822_vm3, %v2640_v18, 0.0  ;;  %v998_v36 = vmul.f32 %v2650_v31, %v2650_v31 }
 0x187   :  { %v1101_v9 = vsel %vm822_vm3, %v997_v28, 0.0 }
 0x188   :  { %v901_v27 = vadd.f32 %v900_v61, %v899_v35  ;;  %v1096_v60 = vadd.f32 %v1095_v19, %v1094_v44  ;;  %v906_v19 = vsel %vm822_vm3, %v2650_v31, 0.0  ;;  %v999_v61 = vmul.f32 %v2658_v42, %v2658_v42 }
 0x189   :  { %v1103_v24 = vsel %vm822_vm3, %v998_v36, 0.0 }
 0x18a   :  { %v903_v48 = vadd.f32 %v902_v26, %v901_v27  ;;  %v1098_v37 = vadd.f32 %v1097_v3, %v1096_v60  ;;  %v908_v3 = vsel %vm822_vm3, %v2658_v42, 0.0  ;;  %v1000_v26 = vmul.f32 %v2668_v55, %v2668_v55 }
 0x18b   :  { %v1105_v28 = vsel %vm822_vm3, %v999_v61, 0.0 }
 0x18c   :  { %v1100_v35 = vadd.f32 %v1099_v11, %v1098_v37  ;;  %v905_v44 = vadd.f32 %v904_v15, %v903_v48  ;;  %v910_v11 = vsel %vm822_vm3, %v2668_v55, 0.0  ;;  %v1001_v15 = vmul.f32 %v2676_v0, %v2676_v0 }
 0x18d   :  { %v1107_v36 = vsel %vm822_vm3, %v1000_v26, 0.0 }
 0x18e   :  { %v907_v27 = vadd.f32 %v906_v19, %v905_v44  ;;  %v1102_v60 = vadd.f32 %v1101_v9, %v1100_v35  ;;  %v912_v9 = vsel %vm822_vm3, %v2676_v0, 0.0  ;;  %v1002_v19 = vmul.f32 %v2686_v23, %v2686_v23 }
 0x18f   :  { %v1109_v61 = vsel %vm822_vm3, %v1001_v15, 0.0 }
 0x190   :  { %v909_v37 = vadd.f32 %v908_v3, %v907_v27  ;;  %v1104_v48 = vadd.f32 %v1103_v24, %v1102_v60  ;;  %v914_v24 = vsel %vm822_vm3, %v2686_v23, 0.0  ;;  %v1003_v3 = vmul.f32 %v2694_v34, %v2694_v34 }
 0x191   :  { %v1111_v26 = vsel %vm822_vm3, %v1002_v19, 0.0 }
 0x192   :  { %v911_v44 = vadd.f32 %v910_v11, %v909_v37  ;;  %v1106_v35 = vadd.f32 %v1105_v28, %v1104_v48  ;;  %v916_v28 = vsel %vm822_vm3, %v2694_v34, 0.0  ;;  %v1004_v11 = vmul.f32 %v2704_v49, %v2704_v49 }
 0x193   :  { %v1113_v15 = vsel %vm822_vm3, %v1003_v3, 0.0 }
 0x194   :  { %v913_v27 = vadd.f32 %v912_v9, %v911_v44  ;;  %v1108_v60 = vadd.f32 %v1107_v36, %v1106_v35  ;;  %v918_v36 = vsel %vm822_vm3, %v2704_v49, 0.0  ;;  %v1005_v9 = vmul.f32 %v2712_v62, %v2712_v62 }
 0x195   :  { %v1115_v19 = vsel %vm822_vm3, %v1004_v11, 0.0 }
 0x196   :  { %v915_v37 = vadd.f32 %v914_v24, %v913_v27  ;;  %v1110_v48 = vadd.f32 %v1109_v61, %v1108_v60  ;;  %v920_v61 = vsel %vm822_vm3, %v2712_v62, 0.0  ;;  %v1006_v24 = vmul.f32 %v2722_v25, %v2722_v25 }
 0x197   :  { %v1117_v3 = vsel %vm822_vm3, %v1005_v9, 0.0 }
 0x198   :  { %v917_v44 = vadd.f32 %v916_v28, %v915_v37  ;;  %v1112_v35 = vadd.f32 %v1111_v26, %v1110_v48  ;;  %v922_v26 = vsel %vm822_vm3, %v2722_v25, 0.0  ;;  %v1007_v28 = vmul.f32 %v2730_v38, %v2730_v38  ;;  %v4220_v25 = vld [vmem:[#allocation26_spill] sm:$0xff] }
 0x199   :  { %v1119_v11 = vsel %vm822_vm3, %v1006_v24, 0.0 }
 0x19a   :  { %v919_v27 = vadd.f32 %v918_v36, %v917_v44  ;;  %v1114_v60 = vadd.f32 %v1113_v15, %v1112_v35  ;;  %v924_v15 = vsel %vm822_vm3, %v2730_v38, 0.0  ;;  %v1008_v36 = vmul.f32 %v2740_v1, %v2740_v1 }
 0x19b   :  { %v1121_v9 = vsel %vm822_vm3, %v1007_v28, 0.0  ;;  %v4218_v38 = vsub.s32 0, %v2561_v12 }
 0x19c   :  { %v921_v37 = vadd.f32 %v920_v61, %v919_v27  ;;  %v1116_v48 = vadd.f32 %v1115_v19, %v1114_v60  ;;  %v926_v19 = vsel %vm822_vm3, %v2740_v1, 0.0  ;;  %v1009_v61 = vmul.f32 %v2748_v10, %v2748_v10 }
 0x19d   :  { %v1123_v24 = vsel %vm822_vm3, %v1008_v36, 0.0 }
 0x19e   :  { %v1118_v44 = vadd.f32 %v1117_v3, %v1116_v48  ;;  %v923_v35 = vadd.f32 %v922_v26, %v921_v37  ;;  %v928_v3 = vsel %vm822_vm3, %v2748_v10, 0.0  ;;  %v1010_v26 = vmul.f32 %v2760_v52, %v2760_v52 }
 0x19f   :  { %v1125_v28 = vsel %vm822_vm3, %v1009_v61, 0.0 }
 0x1a0   :  { %v1120_v27 = vadd.f32 %v1119_v11, %v1118_v44  ;;  %v925_v60 = vadd.f32 %v924_v15, %v923_v35  ;;  %v930_v11 = vsel %vm822_vm3, %v2760_v52, 0.0  ;;  %v1011_v15 = vmul.f32 %v2768_v7, %v2768_v7 }
 0x1a1   :  { %v1127_v36 = vsel %vm822_vm3, %v1010_v26, 0.0 }
 0x1a2   :  { %v1122_v48 = vadd.f32 %v1121_v9, %v1120_v27  ;;  %v927_v37 = vadd.f32 %v926_v19, %v925_v60  ;;  %v932_v9 = vsel %vm822_vm3, %v2768_v7, 0.0  ;;  %v1012_v19 = vmul.f32 %v2778_v53, %v2778_v53 }
 0x1a3   :  { %v1129_v61 = vsel %vm822_vm3, %v1011_v15, 0.0 }
 0x1a4   :  { %v1124_v44 = vadd.f32 %v1123_v24, %v1122_v48  ;;  %v929_v35 = vadd.f32 %v928_v3, %v927_v37  ;;  %v934_v24 = vsel %vm822_vm3, %v2778_v53, 0.0  ;;  %v1013_v3 = vmul.f32 %v2786_v45, %v2786_v45 }
 0x1a5   :  { %v1131_v26 = vsel %vm822_vm3, %v1012_v19, 0.0 }
 0x1a6   :  { %v1126_v27 = vadd.f32 %v1125_v28, %v1124_v44  ;;  %v931_v60 = vadd.f32 %v930_v11, %v929_v35  ;;  %v936_v28 = vsel %vm822_vm3, %v2786_v45, 0.0  ;;  %v1014_v11 = vmul.f32 %v2796_v56, %v2796_v56 }
 0x1a7   :  { %v1133_v15 = vsel %vm822_vm3, %v1013_v3, 0.0 }
 0x1a8   :  { %v1128_v48 = vadd.f32 %v1127_v36, %v1126_v27  ;;  %v933_v37 = vadd.f32 %v932_v9, %v931_v60  ;;  %v938_v36 = vsel %vm822_vm3, %v2796_v56, 0.0  ;;  %v1015_v9 = vmul.f32 %v2804_v59, %v2804_v59 }
 0x1a9   :  { %v1135_v19 = vsel %vm822_vm3, %v1014_v11, 0.0 }
 0x1aa   :  { %v1130_v44 = vadd.f32 %v1129_v61, %v1128_v48  ;;  %v935_v35 = vadd.f32 %v934_v24, %v933_v37  ;;  %v940_v61 = vsel %vm822_vm3, %v2804_v59, 0.0  ;;  %v1016_v24 = vmul.f32 %v2814_v2, %v2814_v2 }
 0x1ab   :  { %v1137_v3 = vsel %vm822_vm3, %v1015_v9, 0.0 }
 0x1ac   :  { %v1132_v27 = vadd.f32 %v1131_v26, %v1130_v44  ;;  %v937_v60 = vadd.f32 %v936_v28, %v935_v35  ;;  %v942_v26 = vsel %vm822_vm3, %v2814_v2, 0.0  ;;  %v1017_v28 = vmul.f32 %v2822_v46, %v2822_v46 }
 0x1ad   :  { %v1019_v2 = vmul.f32 %v2840_v47, %v2840_v47 }
 0x1ae   :  { %v1134_v48 = vadd.f32 %v1133_v15, %v1132_v27  ;;  %v939_v37 = vadd.f32 %v938_v36, %v937_v60  ;;  %v1018_v27 = vmul.f32 %v2832_v43, %v2832_v43  ;;  %v1139_v15 = vsel %vm822_vm3, %v1016_v24, 0.0 }
 0x1af   :  { %v944_v36 = vsel %vm822_vm3, %v2822_v46, 0.0  ;;  %v948_v24 = vsel %vm822_vm3, %v2840_v47, 0.0 }
 0x1b0   :  { %v1136_v44 = vadd.f32 %v1135_v19, %v1134_v48  ;;  %v941_v35 = vadd.f32 %v940_v61, %v939_v37  ;;  %v946_v48 = vsel %vm822_vm3, %v2832_v43, 0.0  ;;  %v1141_v19 = vsel %vm822_vm3, %v1017_v28, 0.0 }
 0x1b1   :  { %v1143_v61 = vsel %vm822_vm3, %v1018_v27, 0.0 }
 0x1b2   :  { %v1138_v11 = vadd.f32 %v1137_v3, %v1136_v44  ;;  %v943_v60 = vadd.f32 %v942_v26, %v941_v35  ;;  %v1145_v26 = vsel %vm822_vm3, %v1019_v2, 0.0 }
 0x1b4   :  { %v1140_v9 = vadd.f32 %v1139_v15, %v1138_v11  ;;  %v945_v37 = vadd.f32 %v944_v36, %v943_v60 }
 0x1b6   :  { %v1142_v59 = vadd.f32 %v1141_v19, %v1140_v9  ;;  %v947_v44 = vadd.f32 %v946_v48, %v945_v37  ;;  %v4193_v48 = vmov 1.0|1.0   ;;  %v4195_v9 = vmov 0.0|0.0  }
 0x1b8   :  { %v1144_v35 = vadd.f32 %v1143_v61, %v1142_v59  ;;  %v949_v3 = vadd.f32 %v948_v24, %v947_v44  ;;  %v4194_v59 = vmov 0.0  }
 0x1ba   :  { %v950_v46 = vrot.slane %v949_v3, 4  ;;  %v1146_v43 = vadd.f32 %v1145_v26, %v1144_v35 }
 0x1bc   :  { %v951_v11 = vadd.f32 %v950_v46, %v949_v3  ;;  %v1147_v60 = vrot.slane %v1146_v43, 4 }
 0x1be   :  { %v952_v15 = vrot.slane %v951_v11, 2  ;;  %v1148_v28 = vadd.f32 %v1147_v60, %v1146_v43 }
 0x1c0   :  { %v953_v36 = vadd.f32 %v952_v15, %v951_v11  ;;  %v1149_v27 = vrot.slane %v1148_v28, 2  ;;  %v4133_v15 = vsub.s32 0, %v2561_v12 }
 0x1c2   :  { %v954_v56 = vrot.slane %v953_v36, 1  ;;  %v1150_v53 = vadd.f32 %v1149_v27, %v1148_v28 }
 0x1c4   :  { %v955_v45 = vadd.f32 %v954_v56, %v953_v36  ;;  %v1151_v2 = vrot.slane %v1150_v53, 1 }
 0x1c6   :  { %2128 = vmatmul.mubr.msk.f32.vlgmr.msra.gmra.mrb[60].mxu1 %vm822_vm3, %v955_v45  ;;  %v1152_v46 = vadd.f32 %v1151_v2, %v1150_v53  ;;  %v4212_v2 = vld [vmem:[#allocation30_spill] sm:$0xff] }
 0x1c7   :  { %2149 = vmatpush3.bf16.msk.msra.mxu1 %vm2564_vm2, %v4193_v48  ;;  %2138 = vmatprep.mubr.msk.f32.mxu1 %vm2289_vm4, %v4194_v59  ;;  %v4213_v59 = vld [vmem:[#allocation31_spill] sm:$0xff] }
 0x1c8   :  { %2150 = vmatprep.subr.bf16.mxu1 %v4195_v9  ;;  %v4211_v9 = vld [vmem:[#allocation29_spill] sm:$0xff] }
 0x1cb   :  { %2152 = vmatpush3.bf16.msk.msra.mxu1 %vm2564_vm2, %v4193_v48 }
 0x1ce   :  { %2139 = vmatmul.mubr.msk.f32.vlgmr.msra.gmra.mrb[62].mxu1 %vm822_vm3, %v1152_v46  ;;  %v4219_v46 = vld [vmem:[#allocation24_spill] sm:$0xff] }
 0x299   :  { %v1229_v56 = vpop.f32.mrb[60].mxu1 }
 0x29a   :  { %v1233_v43 = vmul.f32 0.00048828125, %v1229_v56  ;;  %v2129_v45 = vpop.f32.mrb[61].mxu1 }
 0x29b   :  { %v4208_v45 = vld [vmem:[#allocation23_spill] sm:$0xff] }
 0x29c   :  { %1319 = vrot.lane.b32.xlu1 %v1233_v43, %s2291_s0  ;;  %1313 = vrot.lane.b32.xlu0 %v1233_v43, %s2292_s1  ;;  %v1308_v61 = vmul.f32 %v1233_v43, %v1233_v43 }
 0x2a0   :  { %1316 = vrot.lane.b32.xlu0 %v1233_v43, %s2293_s11 }
 0x2a1   :  { %v1303_v37 = vpop.f32.mrb[62].mxu1 }
 0x2a2   :  { %v1307_v19 = vmul.f32 0.00048828125, %v1303_v37  ;;  %v2140_v44 = vpop.f32.mrb[63].mxu1 }
 0x2a3   :  { %v4201_v44 = vld [vmem:[#allocation10_spill] sm:$0xff] }
 0x2a4   :  { %v1309_v24 = vsub.f32 %v1307_v19, %v1308_v61  ;;  %v4200_v61 = vld [vmem:[#allocation8_spill] sm:$0xff] }
 0x2a6   :  { %v1310_v35 = vadd.f32 1e-05, %v1309_v24  ;;  %v4202_v24 = vld [vmem:[#allocation12_spill] sm:$0xff] }
 0x2a8   :  { %2284 = vrsqrt.f32 %v1310_v35  ;;  %v4196_v35 = vld [vmem:[#allocation2_spill] sm:$0xff] }
 0x2b2   :  { %v2285_v14 = vpop.eup %2284 }
 0x2b3   :  { %1331 = vrot.lane.b32.xlu0 %v2285_v14, %s2293_s11  ;;  %1328 = vrot.lane.b32.xlu1 %v2285_v14, %s2292_s1 }
 0x2b7   :  { %1334 = vrot.lane.b32.xlu1 %v2285_v14, %s2291_s0 }
 0x30e   :  { %v1314_v53 = vpop.permute.xlu0 %1313  ;;  %v1320_v60 = vpop.permute.xlu1 %1319 }
 0x30f   :  { %v1323_v3 = vsel %vm1322_vm5, %v1233_v43, %v1314_v53  ;;  %v4203_v53 = vld [vmem:[#allocation13_spill] sm:$0xff] }
 0x310   :  { %v4209_v43 = vld [vmem:[#allocation25_spill] sm:$0xff] }
 0x312   :  { %v1317_v26 = vpop.permute.xlu0 %1316 }
 0x313   :  { %v1324_v11 = vsel %vm436_vm0, %v1323_v3, %v1317_v26  ;;  %v4197_v3 = vld [vmem:[#allocation3_spill] sm:$0xff] }
 0x314   :  { %v1326_v28 = vsel %vm1325_vm6, %v1324_v11, %v1320_v60  ;;  %v4198_v11 = vld [vmem:[#allocation4_spill] sm:$0xff]  ;;  %v4204_v26 = vld [vmem:[#allocation15_spill] sm:$0xff] }
 0x315   :  { %v3043_v36 = vrot.slane %v1326_v28, %v4133_v15  ;;  %v4199_v28 = vld [vmem:[#allocation6_spill] sm:$0xff] }
 0x317   :  { %v4222_v1 = vsub.f32 %v2576_v16, %v3043_v36  ;;  %v4223_v12 = vsub.f32 %v2582_v21, %v3043_v36  ;;  %v4225_v37 = vsub.f32 %v2602_v39, %v3043_v36 }
 0x325   :  { %v1329_v56 = vpop.permute.xlu1 %1328  ;;  %v1332_v48 = vpop.permute.xlu0 %1331 }
 0x326   :  { %v1337_v6 = vsel %vm1322_vm5, %v2285_v14, %v1329_v56  ;;  %v4216_v14 = vld [vmem:[#allocation20_spill] sm:$0xff]  ;;  %v4217_v56 = vld [vmem:[#allocation22_spill] sm:$0xff] }
 0x327   :  { %v1338_v19 = vsel %vm436_vm0, %v1337_v6, %v1332_v48  ;;  %v4215_v48 = vld [vmem:[#allocation18_spill] sm:$0xff] }
 0x329   :  { %v1335_v27 = vpop.permute.xlu1 %1334 }
 0x32a   :  { %v1339_v6 = vsel %vm1325_vm6, %v1338_v19, %v1335_v27  ;;  %v4221_v27 = vld [vmem:[#allocation28_spill] sm:$0xff] }
 0x32b   :  { %v3170_v15 = vrot.slane %v1339_v6, %v4218_v38  ;;  %v4224_v6 = vsub.f32 %v2594_v32, %v3043_v36 }
 0x32d   :  { %v3184_v10 = vmul.f32 %v3170_v15, %v4222_v1  ;;  %v3190_v38 = vmul.f32 %v3170_v15, %v4223_v12  ;;  %v3196_v19 = vmul.f32 %v3170_v15, %v4224_v6  ;;  %v3202_v16 = vmul.f32 %v3170_v15, %v4225_v37 }
 0x32e   :  { %v4226_v1 = vsub.f32 %v2612_v50, %v3043_v36  ;;  %v4227_v12 = vsub.f32 %v2620_v57, %v3043_v36  ;;  %v4228_v6 = vsub.f32 %v2630_v4, %v3043_v36  ;;  %v4229_v37 = vsub.f32 %v2638_v13, %v3043_v36 }
 0x330   :  { %v3208_v21 = vmul.f32 %v3170_v15, %v4226_v1  ;;  %v3214_v32 = vmul.f32 %v3170_v15, %v4227_v12  ;;  %v3220_v39 = vmul.f32 %v3170_v15, %v4228_v6  ;;  %v3226_v50 = vmul.f32 %v3170_v15, %v4229_v37 }
 0x331   :  { %v4230_v1 = vsub.f32 %v2648_v30, %v3043_v36  ;;  %v4231_v12 = vsub.f32 %v2656_v41, %v3043_v36  ;;  %v4232_v6 = vsub.f32 %v2666_v54, %v3043_v36  ;;  %v4233_v37 = vsub.f32 %v2674_v63, %v3043_v36 }
 0x333   :  { %v3232_v57 = vmul.f32 %v3170_v15, %v4230_v1  ;;  %v3238_v4 = vmul.f32 %v3170_v15, %v4231_v12  ;;  %v3244_v13 = vmul.f32 %v3170_v15, %v4232_v6  ;;  %v3250_v30 = vmul.f32 %v3170_v15, %v4233_v37 }
 0x334   :  { %v4234_v1 = vsub.f32 %v2684_v20, %v3043_v36  ;;  %v4235_v12 = vsub.f32 %v2692_v29, %v3043_v36  ;;  %v4236_v6 = vsub.f32 %v4196_v35, %v3043_v36  ;;  %v4237_v37 = vsub.f32 %v4197_v3, %v3043_v36 }
 0x336   :  { %v3256_v41 = vmul.f32 %v3170_v15, %v4234_v1  ;;  %v3262_v54 = vmul.f32 %v3170_v15, %v4235_v12  ;;  %v3268_v63 = vmul.f32 %v3170_v15, %v4236_v6  ;;  %v3274_v20 = vmul.f32 %v3170_v15, %v4237_v37 }
 0x337   :  { %v4238_v1 = vsub.f32 %v4198_v11, %v3043_v36  ;;  %v4239_v12 = vsub.f32 %v4199_v28, %v3043_v36  ;;  %v4240_v6 = vsub.f32 %v4200_v61, %v3043_v36  ;;  %v4241_v37 = vsub.f32 %v4201_v44, %v3043_v36 }
 0x339   :  { %v3280_v29 = vmul.f32 %v3170_v15, %v4238_v1  ;;  %v3286_v35 = vmul.f32 %v3170_v15, %v4239_v12  ;;  %v3292_v3 = vmul.f32 %v3170_v15, %v4240_v6  ;;  %v3298_v11 = vmul.f32 %v3170_v15, %v4241_v37  ;;  %v4247_v37 = vld [vmem:[#allocation17_spill] sm:$0xff] }
 0x33a   :  { %v4243_v1 = vsub.f32 %v4202_v24, %v3043_v36  ;;  %v4244_v12 = vsub.f32 %v4203_v53, %v3043_v36  ;;  %v4246_v6 = vsub.f32 %v4204_v26, %v3043_v36  ;;  %v4248_v60 = vsub.f32 %v4247_v37, %v3043_v36 }
 0x33b   :  { %4242 = vst [vmem:[#allocation2_spill] sm:$0xff] %v3298_v11 }
 0x33c   :  { %v3304_v28 = vmul.f32 %v3170_v15, %v4243_v1  ;;  %v3310_v61 = vmul.f32 %v3170_v15, %v4244_v12  ;;  %v3316_v44 = vmul.f32 %v3170_v15, %v4246_v6  ;;  %v3322_v24 = vmul.f32 %v3170_v15, %v4248_v60  ;;  %v4249_v1 = vld [vmem:[#allocation19_spill] sm:$0xff]  ;;  %v4252_v12 = vld [vmem:[#allocation21_spill] sm:$0xff] }
 0x33d   :  { %v4250_v7 = vsub.f32 %v4249_v1, %v3043_v36  ;;  %v4254_v6 = vsub.f32 %v4208_v45, %v3043_v36  ;;  %v4255_v60 = vsub.f32 %v4209_v43, %v3043_v36 }
 0x33e   :  { %4245 = vst [vmem:[#allocation3_spill] sm:$0xff] %v3310_v61  ;;  %v4253_v61 = vsub.f32 %v4252_v12, %v3043_v36 }
 0x33f   :  { %v3328_v53 = vmul.f32 %v3170_v15, %v4250_v7  ;;  %v3340_v37 = vmul.f32 %v3170_v15, %v4254_v6  ;;  %v3346_v1 = vmul.f32 %v3170_v15, %v4255_v60  ;;  %v4256_v7 = vld [vmem:[#allocation27_spill] sm:$0xff]  ;;  %v4260_v6 = vsub.f32 %v4211_v9, %v3043_v36 }
 0x340   :  { %v3334_v26 = vmul.f32 %v3170_v15, %v4253_v61  ;;  %v4258_v61 = vsub.f32 %v2838_v8, %v3043_v36  ;;  %v4261_v60 = vsub.f32 %v4212_v2, %v3043_v36 }
 0x341   :  { %4251 = vst [vmem:[#allocation4_spill] sm:$0xff] %v3328_v53  ;;  %v4257_v53 = vsub.f32 %v4256_v7, %v3043_v36  ;;  %v3364_v43 = vmul.f32 %v3170_v15, %v4260_v6  ;;  %v4265_v6 = vsub.f32 %v2578_v17, %v3043_v36 }
 0x342   :  { %v3358_v45 = vmul.f32 %v3170_v15, %v4258_v61  ;;  %v3370_v7 = vmul.f32 %v3170_v15, %v4261_v60  ;;  %v4263_v61 = vld [vmem:[#allocation32_spill] sm:$0xff]  ;;  %v4266_v60 = vsub.f32 %v2584_v22, %v3043_v36 }
 0x343   :  { %v3352_v12 = vmul.f32 %v3170_v15, %v4257_v53  ;;  %v4262_v53 = vsub.f32 %v4213_v59, %v3043_v36  ;;  %v3388_v2 = vmul.f32 %v3170_v15, %v4265_v6  ;;  %v4272_v6 = vsub.f32 %v2614_v51, %v3043_v36 }
 0x344   :  { %4259 = vst [vmem:[#allocation6_spill] sm:$0xff] %v3358_v45  ;;  %v4264_v45 = vsub.f32 %v4263_v61, %v3043_v36  ;;  %v3394_v59 = vmul.f32 %v3170_v15, %v4266_v60  ;;  %v4274_v60 = vsub.f32 %v2622_v58, %v3043_v36 }
 0x345   :  { %v3376_v8 = vmul.f32 %v3170_v15, %v4262_v53  ;;  %v4268_v53 = vsub.f32 %v2596_v33, %v3043_v36  ;;  %v3412_v22 = vmul.f32 %v3170_v15, %v4272_v6  ;;  %v4279_v6 = vsub.f32 %v2650_v31, %v3043_v36 }
 0x346   :  { %v3382_v9 = vmul.f32 %v3170_v15, %v4264_v45  ;;  %4267 = vst [vmem:[#allocation8_spill] sm:$0xff] %v3394_v59  ;;  %v4270_v45 = vsub.f32 %v2604_v40, %v3043_v36  ;;  %v3418_v33 = vmul.f32 %v3170_v15, %v4274_v60  ;;  %v4280_v60 = vsub.f32 %v2658_v42, %v3043_v36 }
 0x347   :  { %v3400_v61 = vmul.f32 %v3170_v15, %v4268_v53  ;;  %4273 = vst [vmem:[#allocation13_spill] sm:$0xff] %v3412_v22  ;;  %v4275_v53 = vsub.f32 %v2632_v5, %v3043_v36  ;;  %v3436_v58 = vmul.f32 %v3170_v15, %v4279_v6  ;;  %v4283_v6 = vsub.f32 %v2686_v23, %v3043_v36 }
 0x348   :  { %v3406_v17 = vmul.f32 %v3170_v15, %v4270_v45  ;;  %v4277_v45 = vsub.f32 %v2640_v18, %v3043_v36  ;;  %v3442_v5 = vmul.f32 %v3170_v15, %v4280_v60  ;;  %v4285_v60 = vsub.f32 %v2694_v34, %v3043_v36 }
 0x349   :  { %4269 = vst [vmem:[#allocation10_spill] sm:$0xff] %v3400_v61  ;;  %v3424_v40 = vmul.f32 %v3170_v15, %v4275_v53  ;;  %v4281_v53 = vsub.f32 %v2668_v55, %v3043_v36  ;;  %v3460_v42 = vmul.f32 %v3170_v15, %v4283_v6  ;;  %v4291_v6 = vld [vmem:[#allocation5_spill] sm:$0xff] }
 0x34a   :  { %4271 = vst [vmem:[#allocation12_spill] sm:$0xff] %v3406_v17  ;;  %v3430_v51 = vmul.f32 %v3170_v15, %v4277_v45  ;;  %v4282_v45 = vsub.f32 %v2676_v0, %v3043_v36  ;;  %v3466_v55 = vmul.f32 %v3170_v15, %v4285_v60  ;;  %v4294_v60 = vld [vmem:[#allocation7_spill] sm:$0xff] }
 0x34b   :  { %4276 = vst [vmem:[#allocation15_spill] sm:$0xff] %v3424_v40  ;;  %v3448_v18 = vmul.f32 %v3170_v15, %v4281_v53  ;;  %4284 = vst [vmem:[#allocation25_spill] sm:$0xff] %v3460_v42  ;;  %v4287_v53 = vsub.f32 %v2704_v49, %v3043_v36  ;;  %v4292_v42 = vsub.f32 %v4291_v6, %v3043_v36 }
 0x34c   :  { %4278 = vst [vmem:[#allocation23_spill] sm:$0xff] %v3430_v51  ;;  %v3454_v31 = vmul.f32 %v3170_v15, %v4282_v45  ;;  %4286 = vst [vmem:[#allocation29_spill] sm:$0xff] %v3466_v55  ;;  %v4289_v45 = vsub.f32 %v2712_v62, %v3043_v36  ;;  %v4295_v55 = vsub.f32 %v4294_v60, %v3043_v36 }
 0x34d   :  { %v3472_v0 = vmul.f32 %v3170_v15, %v4287_v53  ;;  %v3484_v34 = vmul.f32 %v3170_v15, %v4292_v42  ;;  %v4297_v53 = vld [vmem:[#allocation9_spill] sm:$0xff]  ;;  %v4302_v42 = vsub.f32 %v2760_v52, %v3043_v36 }
 0x34e   :  { %v3478_v23 = vmul.f32 %v3170_v15, %v4289_v45  ;;  %v3490_v49 = vmul.f32 %v3170_v15, %v4295_v55  ;;  %v4300_v45 = vld [vmem:[#allocation11_spill] sm:$0xff]  ;;  %v4303_v55 = vld [vmem:[#allocation14_spill] sm:$0xff] }
 0x34f   :  { %4288 = vst [vmem:[#allocation30_spill] sm:$0xff] %v3472_v0  ;;  %4293 = vst [vmem:[#allocation18_spill] sm:$0xff] %v3484_v34  ;;  %v4298_v0 = vsub.f32 %v4297_v53, %v3043_v36  ;;  %v3508_v60 = vmul.f32 %v3170_v15, %v4302_v42  ;;  %v4308_v42 = vsub.f32 %v4216_v14, %v3043_v36 }
 0x350   :  { %4290 = vst [vmem:[#allocation31_spill] sm:$0xff] %v3478_v23  ;;  %4296 = vst [vmem:[#allocation20_spill] sm:$0xff] %v3490_v49  ;;  %v4301_v23 = vsub.f32 %v4300_v45, %v3043_v36  ;;  %v4304_v49 = vsub.f32 %v4303_v55, %v3043_v36 }
 0x351   :  { %v3496_v62 = vmul.f32 %v3170_v15, %v4298_v0  ;;  %v4305_v0 = vld [vmem:[#allocation16_spill] sm:$0xff]  ;;  %v3532_v55 = vmul.f32 %v3170_v15, %v4308_v42  ;;  %v4314_v42 = vsub.f32 %v4221_v27, %v3043_v36 }
 0x352   :  { %v3502_v6 = vmul.f32 %v3170_v15, %v4301_v23  ;;  %v3514_v53 = vmul.f32 %v3170_v15, %v4304_v49  ;;  %v4307_v23 = vsub.f32 %v4215_v48, %v3043_v36  ;;  %v4309_v49 = vsub.f32 %v4217_v56, %v3043_v36  ;;  %v4320_v59 = vld [vmem:[#allocation25_spill] sm:$0xff] }
 0x353   :  { %4299 = vst [vmem:[#allocation22_spill] sm:$0xff] %v3496_v62  ;;  %v4306_v62 = vsub.f32 %v4305_v0, %v3043_v36  ;;  %v3556_v56 = vmul.f32 %v3170_v15, %v4314_v42  ;;  %v4321_v61 = vld [vmem:[#allocation29_spill] sm:$0xff]  ;;  %v4330_v42 = vmax.f32 %v3190_v38, 0.0  ;;  %v4335_v38 = vmax.f32 %v3220_v39, 0.0 }
 0x354   :  { %v3526_v52 = vmul.f32 %v3170_v15, %v4307_v23  ;;  %v3538_v0 = vmul.f32 %v3170_v15, %v4309_v49  ;;  %v4312_v23 = vsub.f32 %v4220_v25, %v3043_v36  ;;  %v4316_v49 = vsub.f32 %v2840_v47, %v3043_v36 }
 0x355   :  { %v3520_v45 = vmul.f32 %v3170_v15, %v4306_v62  ;;  %v4310_v62 = vsub.f32 %v4219_v46, %v3043_v36  ;;  %4315 = vst [vmem:[#allocation28_spill] sm:$0xff] %v3556_v56  ;;  %v4328_v40 = vmov %v3556_v56  ;;  %v2046_v56 = vpack.c.bf16 %v4330_v42, %v4330_v42 }
 0x356   :  { %v3550_v14 = vmul.f32 %v3170_v15, %v4312_v23  ;;  %v3562_v46 = vmul.f32 %v3170_v15, %v4316_v49  ;;  %v4322_v17 = vld [vmem:[#allocation30_spill] sm:$0xff]  ;;  %v4331_v47 = vmax.f32 %v3196_v19, 0.0  ;;  %v4332_v36 = vmax.f32 %v3202_v16, 0.0 }
 0x357   :  { %v3544_v48 = vmul.f32 %v3170_v15, %v4310_v62  ;;  %v4318_v62 = vld [vmem:[#allocation4_spill] sm:$0xff]  ;;  %v4319_v15 = vld [vmem:[#allocation6_spill] sm:$0xff]  ;;  %v4333_v25 = vmax.f32 %v3208_v21, 0.0  ;;  %v2051_v42 = vpack.c.bf16 %v4335_v38, %v4335_v38  ;;  %v4336_v19 = vmax.f32 %v3226_v50, 0.0  ;;  %1798 = vst.msk [vmem:[%s4078_s2 + $0x4] sm:$0xf] %vm1796_vm7, %v2046_v56 }
 0x358   :  { %4313 = vst [vmem:[#allocation26_spill] sm:$0xff] %v3550_v14  ;;  %v4327_v34 = vmov %v3550_v14  ;;  %v4329_v14 = vmax.f32 %v3184_v10, 0.0  ;;  %v2047_v11 = vpack.c.bf16 %v4331_v47, %v4331_v47  ;;  %v2048_v49 = vpack.c.bf16 %v4332_v36, %v4332_v36 }
 0x359   :  { %4311 = vst [vmem:[#allocation24_spill] sm:$0xff] %v3544_v48  ;;  %v4317_v48 = vld [vmem:[#allocation3_spill] sm:$0xff]  ;;  %v2049_v23 = vpack.c.bf16 %v4333_v25, %v4333_v25  ;;  %v4334_v10 = vmax.f32 %v3214_v32, 0.0  ;;  %v2052_v47 = vpack.c.bf16 %v4336_v19, %v4336_v19  ;;  %v4337_v16 = vmax.f32 %v3232_v57, 0.0  ;;  %1803 = vst.msk [vmem:[%s4078_s2 + $0x18] sm:$0xf] %vm1796_vm7, %v2051_v42 }
 0x35a   :  { %v4325_v51 = vld [vmem:[#allocation22_spill] sm:$0xff]  ;;  %v2045_v27 = vpack.c.bf16 %v4329_v14, %v4329_v14  ;;  %v4338_v21 = vmax.f32 %v3238_v4, 0.0  ;;  %v4339_v32 = vmax.f32 %v3244_v13, 0.0  ;;  %v4340_v39 = vmax.f32 %v3250_v30, 0.0  ;;  %1799 = vst.msk [vmem:[%s4078_s2 + $0x8] sm:$0xf] %vm1796_vm7, %v2047_v11 }
 0x35b   :  { %v2050_v14 = vpack.c.bf16 %v4334_v10, %v4334_v10  ;;  %v2053_v36 = vpack.c.bf16 %v4337_v16, %v4337_v16  ;;  %1800 = vst.msk [vmem:[%s4078_s2 + $0xc] sm:$0xf] %vm1796_vm7, %v2048_v49  ;;  %v4341_v50 = vmax.f32 %v3256_v41, 0.0  ;;  %v4342_v4 = vmax.f32 %v3262_v54, 0.0  ;;  %1801 = vst.msk [vmem:[%s4078_s2 + $0x10] sm:$0xf] %vm1796_vm7, %v2049_v23 }
 0x35c   :  { %v2054_v25 = vpack.c.bf16 %v4338_v21, %v4338_v21  ;;  %v2055_v10 = vpack.c.bf16 %v4339_v32, %v4339_v32  ;;  %v2056_v38 = vpack.c.bf16 %v4340_v39, %v4340_v39  ;;  %1797 = vst.msk [vmem:[%s4078_s2] sm:$0xf] %vm1796_vm7, %v2045_v27  ;;  %v4343_v30 = vmax.f32 %v3268_v63, 0.0  ;;  %1804 = vst.msk [vmem:[%s4078_s2 + $0x1c] sm:$0xf] %vm1796_vm7, %v2052_v47 }
 0x35d   :  { %v2057_v57 = vpack.c.bf16 %v4341_v50, %v4341_v50  ;;  %v2058_v13 = vpack.c.bf16 %v4342_v4, %v4342_v4  ;;  %v4344_v27 = vmax.f32 %v3274_v20, 0.0  ;;  %1802 = vst.msk [vmem:[%s4078_s2 + $0x14] sm:$0xf] %vm1796_vm7, %v2050_v14  ;;  %v4345_v41 = vmax.f32 %v3280_v29, 0.0  ;;  %v4348_v14 = vld [vmem:[#allocation2_spill] sm:$0xff] }
 0x35e   :  { %v2059_v56 = vpack.c.bf16 %v4343_v30, %v4343_v30  ;;  %v4346_v63 = vmax.f32 %v3286_v35, 0.0  ;;  %v4347_v23 = vmax.f32 %v3292_v3, 0.0  ;;  %v4349_v19 = vmax.f32 %v4348_v14, 0.0  ;;  %1805 = vst.msk [vmem:[%s4078_s2 + $0x20] sm:$0xf] %vm1796_vm7, %v2053_v36 }
 0x35f   :  { %v2060_v11 = vpack.c.bf16 %v4344_v27, %v4344_v27  ;;  %v2061_v54 = vpack.c.bf16 %v4345_v41, %v4345_v41  ;;  %1806 = vst.msk [vmem:[%s4078_s2 + $0x24] sm:$0xf] %vm1796_vm7, %v2054_v25  ;;  %1807 = vst.msk [vmem:[%s4078_s2 + $0x28] sm:$0xf] %vm1796_vm7, %v2055_v10  ;;  %v4350_v29 = vmax.f32 %v3304_v28, 0.0  ;;  %v4351_v3 = vmax.f32 %v4317_v48, 0.0 }
 0x360   :  { %v4326_v22 = vld [vmem:[#allocation24_spill] sm:$0xff]  ;;  %v2062_v20 = vpack.c.bf16 %v4346_v63, %v4346_v63  ;;  %v2063_v49 = vpack.c.bf16 %v4347_v23, %v4347_v23  ;;  %v2064_v42 = vpack.c.bf16 %v4349_v19, %v4349_v19  ;;  %1808 = vst.msk [vmem:[%s4078_s2 + $0x2c] sm:$0xf] %vm1796_vm7, %v2056_v38  ;;  %v4352_v16 = vmax.f32 %v3316_v44, 0.0  ;;  %1809 = vst.msk [vmem:[%s4078_s2 + $0x30] sm:$0xf] %vm1796_vm7, %v2057_v57 }
 0x361   :  { %v2065_v35 = vpack.c.bf16 %v4350_v29, %v4350_v29  ;;  %v2066_v47 = vpack.c.bf16 %v4351_v3, %v4351_v3  ;;  %v4353_v21 = vmax.f32 %v3322_v24, 0.0  ;;  %1810 = vst.msk [vmem:[%s4078_s2 + $0x34] sm:$0xf] %vm1796_vm7, %v2058_v13  ;;  %1811 = vst.msk [vmem:[%s4078_s2 + $0x38] sm:$0xf] %vm1796_vm7, %v2059_v56  ;;  %v4354_v28 = vmax.f32 %v4318_v62, 0.0 }
 0x362   :  { %v2067_v36 = vpack.c.bf16 %v4352_v16, %v4352_v16  ;;  %1812 = vst.msk [vmem:[%s4078_s2 + $0x3c] sm:$0xf] %vm1796_vm7, %v2060_v11  ;;  %v4355_v24 = vmax.f32 %v3334_v26, 0.0  ;;  %v4356_v32 = vmax.f32 %v3340_v37, 0.0  ;;  %v4357_v39 = vmax.f32 %v3346_v1, 0.0  ;;  %v4365_v27 = vld [vmem:[#allocation8_spill] sm:$0xff] }
 0x363   :  { %v2068_v25 = vpack.c.bf16 %v4353_v21, %v4353_v21  ;;  %v2069_v44 = vpack.c.bf16 %v4354_v28, %v4354_v28  ;;  %1813 = vst.msk [vmem:[%s4078_s2 + $0x40] sm:$0xf] %vm1796_vm7, %v2061_v54  ;;  %1814 = vst.msk [vmem:[%s4078_s2 + $0x44] sm:$0xf] %vm1796_vm7, %v2062_v20  ;;  %v4358_v26 = vmax.f32 %v3352_v12, 0.0  ;;  %v4359_v1 = vmax.f32 %v4319_v15, 0.0 }
 0x364   :  { %v2070_v48 = vpack.c.bf16 %v4355_v24, %v4355_v24  ;;  %v2071_v10 = vpack.c.bf16 %v4356_v32, %v4356_v32  ;;  %v2072_v38 = vpack.c.bf16 %v4357_v39, %v4357_v39  ;;  %1815 = vst.msk [vmem:[%s4078_s2 + $0x48] sm:$0xf] %vm1796_vm7, %v2063_v49  ;;  %1816 = vst.msk [vmem:[%s4078_s2 + $0x4c] sm:$0xf] %vm1796_vm7, %v2064_v42  ;;  %v4360_v50 = vmax.f32 %v3364_v43, 0.0  ;;  %v4369_v54 = vld [vmem:[#allocation12_spill] sm:$0xff] }
 0x365   :  { %v2073_v37 = vpack.c.bf16 %v4358_v26, %v4358_v26  ;;  %v2074_v62 = vpack.c.bf16 %v4359_v1, %v4359_v1  ;;  %v4361_v4 = vmax.f32 %v3370_v7, 0.0  ;;  %1817 = vst.msk [vmem:[%s4078_s2 + $0x50] sm:$0xf] %vm1796_vm7, %v2065_v35  ;;  %1818 = vst.msk [vmem:[%s4078_s2 + $0x54] sm:$0xf] %vm1796_vm7, %v2066_v47  ;;  %v4362_v12 = vmax.f32 %v3376_v8, 0.0 }
 0x366   :  { %v2075_v57 = vpack.c.bf16 %v4360_v50, %v4360_v50  ;;  %1819 = vst.msk [vmem:[%s4078_s2 + $0x58] sm:$0xf] %vm1796_vm7, %v2067_v36  ;;  %1820 = vst.msk [vmem:[%s4078_s2 + $0x5c] sm:$0xf] %vm1796_vm7, %v2068_v25  ;;  %v4363_v7 = vmax.f32 %v3382_v9, 0.0  ;;  %v4364_v30 = vmax.f32 %v3388_v2, 0.0 }
 0x367   :  { %v2076_v13 = vpack.c.bf16 %v4361_v4, %v4361_v4  ;;  %v2077_v43 = vpack.c.bf16 %v4362_v12, %v4362_v12  ;;  %v4366_v11 = vmax.f32 %v4365_v27, 0.0  ;;  %1821 = vst.msk [vmem:[%s4078_s2 + $0x60] sm:$0xf] %vm1796_vm7, %v2069_v44  ;;  %1822 = vst.msk [vmem:[%s4078_s2 + $0x64] sm:$0xf] %vm1796_vm7, %v2070_v48  ;;  %v4367_v8 = vld [vmem:[#allocation10_spill] sm:$0xff] }
 0x368   :  { %v2078_v15 = vpack.c.bf16 %v4363_v7, %v4363_v7  ;;  %v2079_v56 = vpack.c.bf16 %v4364_v30, %v4364_v30  ;;  %1823 = vst.msk [vmem:[%s4078_s2 + $0x68] sm:$0xf] %vm1796_vm7, %v2071_v10  ;;  %1824 = vst.msk [vmem:[%s4078_s2 + $0x6c] sm:$0xf] %vm1796_vm7, %v2072_v38  ;;  %v4368_v9 = vmax.f32 %v4367_v8, 0.0  ;;  %v4370_v63 = vmax.f32 %v4369_v54, 0.0 }
 0x369   :  { %v2080_v41 = vpack.c.bf16 %v4366_v11, %v4366_v11  ;;  %v4371_v23 = vld [vmem:[#allocation13_spill] sm:$0xff]  ;;  %v4373_v19 = vmax.f32 %v3418_v33, 0.0  ;;  %1825 = vst.msk [vmem:[%s4078_s2 + $0x70] sm:$0xf] %vm1796_vm7, %v2073_v37  ;;  %1826 = vst.msk [vmem:[%s4078_s2 + $0x74] sm:$0xf] %vm1796_vm7, %v2074_v62 }
 0x36a   :  { %v2081_v2 = vpack.c.bf16 %v4368_v9, %v4368_v9  ;;  %v2082_v20 = vpack.c.bf16 %v4370_v63, %v4370_v63  ;;  %v4372_v49 = vmax.f32 %v4371_v23, 0.0  ;;  %1827 = vst.msk [vmem:[%s4078_s2 + $0x78] sm:$0xf] %vm1796_vm7, %v2075_v57  ;;  %1828 = vst.msk [vmem:[%s4078_s2 + $0x7c] sm:$0xf] %vm1796_vm7, %v2076_v13  ;;  %v4374_v33 = vld [vmem:[#allocation15_spill] sm:$0xff] }
 0x36b   :  { %v2084_v42 = vpack.c.bf16 %v4373_v19, %v4373_v19  ;;  %v4375_v29 = vmax.f32 %v4374_v33, 0.0  ;;  %v4376_v3 = vld [vmem:[#allocation23_spill] sm:$0xff]  ;;  %v4378_v36 = vmax.f32 %v3436_v58, 0.0  ;;  %v4379_v25 = vmax.f32 %v3442_v5, 0.0  ;;  %1829 = vst.msk [vmem:[%s4078_s2 + $0x80] sm:$0xf] %vm1796_vm7, %v2077_v43 }
 0x36c   :  { %v2083_v14 = vpack.c.bf16 %v4372_v49, %v4372_v49  ;;  %v4377_v47 = vmax.f32 %v4376_v3, 0.0  ;;  %1830 = vst.msk [vmem:[%s4078_s2 + $0x84] sm:$0xf] %vm1796_vm7, %v2078_v15  ;;  %1831 = vst.msk [vmem:[%s4078_s2 + $0x88] sm:$0xf] %vm1796_vm7, %v2079_v56  ;;  %v4380_v58 = vmax.f32 %v3448_v18, 0.0 }
 0x36d   :  { %v2085_v35 = vpack.c.bf16 %v4375_v29, %v4375_v29  ;;  %v2087_v21 = vpack.c.bf16 %v4378_v36, %v4378_v36  ;;  %v2088_v28 = vpack.c.bf16 %v4379_v25, %v4379_v25  ;;  %1832 = vst.msk [vmem:[%s4078_s2 + $0x8c] sm:$0xf] %vm1796_vm7, %v2080_v41  ;;  %v4381_v44 = vmax.f32 %v3454_v31, 0.0  ;;  %1833 = vst.msk [vmem:[%s4078_s2 + $0x90] sm:$0xf] %vm1796_vm7, %v2081_v2  ;;  %v4385_v18 = vld [vmem:[#allocation31_spill] sm:$0xff] }
 0x36e   :  { %v2086_v16 = vpack.c.bf16 %v4377_v47, %v4377_v47  ;;  %v2089_v5 = vpack.c.bf16 %v4380_v58, %v4380_v58  ;;  %v4382_v48 = vmax.f32 %v4320_v59, 0.0  ;;  %v4383_v10 = vmax.f32 %v4321_v61, 0.0  ;;  %1834 = vst.msk [vmem:[%s4078_s2 + $0x94] sm:$0xf] %vm1796_vm7, %v2082_v20  ;;  %1835 = vst.msk [vmem:[%s4078_s2 + $0x98] sm:$0xf] %vm1796_vm7, %v2083_v14 }
 0x36f   :  { %v2090_v24 = vpack.c.bf16 %v4381_v44, %v4381_v44  ;;  %1836 = vst.msk [vmem:[%s4078_s2 + $0x9c] sm:$0xf] %vm1796_vm7, %v2084_v42  ;;  %v4384_v59 = vmax.f32 %v4322_v17, 0.0  ;;  %v4386_v31 = vmax.f32 %v4385_v18, 0.0  ;;  %v4387_v26 = vld [vmem:[#allocation18_spill] sm:$0xff]  ;;  %v4389_v62 = vld [vmem:[#allocation20_spill] sm:$0xff] }
 0x370   :  { %v2091_v32 = vpack.c.bf16 %v4382_v48, %v4382_v48  ;;  %v2092_v39 = vpack.c.bf16 %v4383_v10, %v4383_v10  ;;  %v4388_v37 = vmax.f32 %v4387_v26, 0.0  ;;  %v4390_v50 = vmax.f32 %v4389_v62, 0.0  ;;  %1837 = vst.msk [vmem:[%s4078_s2 + $0xa0] sm:$0xf] %vm1796_vm7, %v2085_v35  ;;  %1838 = vst.msk [vmem:[%s4078_s2 + $0xa4] sm:$0xf] %vm1796_vm7, %v2086_v16 }
 0x371   :  { %v2093_v61 = vpack.c.bf16 %v4384_v59, %v4384_v59  ;;  %v2094_v38 = vpack.c.bf16 %v4386_v31, %v4386_v31  ;;  %1839 = vst.msk [vmem:[%s4078_s2 + $0xa8] sm:$0xf] %vm1796_vm7, %v2087_v21  ;;  %1840 = vst.msk [vmem:[%s4078_s2 + $0xac] sm:$0xf] %vm1796_vm7, %v2088_v28  ;;  %v4391_v17 = vmax.f32 %v4325_v51, 0.0  ;;  %v4392_v13 = vmax.f32 %v3502_v6, 0.0 }
 0x372   :  { %v2095_v1 = vpack.c.bf16 %v4388_v37, %v4388_v37  ;;  %v2096_v57 = vpack.c.bf16 %v4390_v50, %v4390_v50  ;;  %v4393_v43 = vmax.f32 %v3508_v60, 0.0  ;;  %v4394_v15 = vmax.f32 %v3514_v53, 0.0  ;;  %1841 = vst.msk [vmem:[%s4078_s2 + $0xb0] sm:$0xf] %vm1796_vm7, %v2089_v5  ;;  %1842 = vst.msk [vmem:[%s4078_s2 + $0xb4] sm:$0xf] %vm1796_vm7, %v2090_v24 }
 0x373   :  { %v2097_v4 = vpack.c.bf16 %v4391_v17, %v4391_v17  ;;  %v2098_v12 = vpack.c.bf16 %v4392_v13, %v4392_v13  ;;  %1843 = vst.msk [vmem:[%s4078_s2 + $0xb8] sm:$0xf] %vm1796_vm7, %v2091_v32  ;;  %1844 = vst.msk [vmem:[%s4078_s2 + $0xbc] sm:$0xf] %vm1796_vm7, %v2092_v39  ;;  %v4395_v51 = vmax.f32 %v3520_v45, 0.0  ;;  %v4396_v60 = vmax.f32 %v3526_v52, 0.0 }
 0x374   :  { %v2099_v7 = vpack.c.bf16 %v4393_v43, %v4393_v43  ;;  %v2100_v30 = vpack.c.bf16 %v4394_v15, %v4394_v15  ;;  %v4397_v56 = vmax.f32 %v3532_v55, 0.0  ;;  %v4398_v11 = vmax.f32 %v3538_v0, 0.0  ;;  %1845 = vst.msk [vmem:[%s4078_s2 + $0xc0] sm:$0xf] %vm1796_vm7, %v2093_v61  ;;  %1846 = vst.msk [vmem:[%s4078_s2 + $0xc4] sm:$0xf] %vm1796_vm7, %v2094_v38 }
 0x375   :  { %v2101_v6 = vpack.c.bf16 %v4395_v51, %v4395_v51  ;;  %v2102_v53 = vpack.c.bf16 %v4396_v60, %v4396_v60  ;;  %1847 = vst.msk [vmem:[%s4078_s2 + $0xc8] sm:$0xf] %vm1796_vm7, %v2095_v1  ;;  %1848 = vst.msk [vmem:[%s4078_s2 + $0xcc] sm:$0xf] %vm1796_vm7, %v2096_v57  ;;  %v4399_v45 = vmax.f32 %v4326_v22, 0.0  ;;  %v4400_v55 = vmax.f32 %v4327_v34, 0.0 }
 0x376   :  { %v2103_v27 = vpack.c.bf16 %v4397_v56, %v4397_v56  ;;  %v2104_v41 = vpack.c.bf16 %v4398_v11, %v4398_v11  ;;  %v4401_v8 = vmax.f32 %v4328_v40, 0.0  ;;  %v4402_v2 = vmax.f32 %v3562_v46, 0.0  ;;  %1849 = vst.msk [vmem:[%s4078_s2 + $0xd0] sm:$0xf] %vm1796_vm7, %v2097_v4  ;;  %1850 = vst.msk [vmem:[%s4078_s2 + $0xd4] sm:$0xf] %vm1796_vm7, %v2098_v12 }
 0x377   :  { %v2105_v52 = vpack.c.bf16 %v4399_v45, %v4399_v45  ;;  %v2106_v0 = vpack.c.bf16 %v4400_v55, %v4400_v55  ;;  %1851 = vst.msk [vmem:[%s4078_s2 + $0xd8] sm:$0xf] %vm1796_vm7, %v2099_v7  ;;  %1852 = vst.msk [vmem:[%s4078_s2 + $0xdc] sm:$0xf] %vm1796_vm7, %v2100_v30 }
 0x378   :  { %v2107_v9 = vpack.c.bf16 %v4401_v8, %v4401_v8  ;;  %v2108_v54 = vpack.c.bf16 %v4402_v2, %v4402_v2  ;;  %1853 = vst.msk [vmem:[%s4078_s2 + $0xe0] sm:$0xf] %vm1796_vm7, %v2101_v6  ;;  %1854 = vst.msk [vmem:[%s4078_s2 + $0xe4] sm:$0xf] %vm1796_vm7, %v2102_v53 }
 0x379   :  { %1855 = vst.msk [vmem:[%s4078_s2 + $0xe8] sm:$0xf] %vm1796_vm7, %v2103_v27  ;;  %1856 = vst.msk [vmem:[%s4078_s2 + $0xec] sm:$0xf] %vm1796_vm7, %v2104_v41 }
 0x37a   :  { %1857 = vst.msk [vmem:[%s4078_s2 + $0xf0] sm:$0xf] %vm1796_vm7, %v2105_v52  ;;  %1858 = vst.msk [vmem:[%s4078_s2 + $0xf4] sm:$0xf] %vm1796_vm7, %v2106_v0 }
 0x37b   :  { %1859 = vst.msk [vmem:[%s4078_s2 + $0xf8] sm:$0xf] %vm1796_vm7, %v2107_v9  ;;  %1860 = vst.msk [vmem:[%s4078_s2 + $0xfc] sm:$0xf] %vm1796_vm7, %v2108_v54 }

// kernel: decoder_forward.11
= control target key start
LH: loop header
LB: loop body
LE: loop exit
PB: predicated region body
PF: predicated region fallthrough
CT: control target
= control target key end

     0   :  { %v993_v3 = vmov 0   ;;  %vm458_vm0 = vcmask 1043456   ;;  %vm454_vm1 = vcmask 588800   ;;  %s1303_s1 = inlined_call_operand.vmem [shape: bf16[72,2048], index: 1, kind: input, shape index: {}]   ;;  %s1304_s0 = inlined_call_operand.vmem [shape: bf16[4,72], index: 0, kind: input, shape index: {}]   ;;  %s1305_s2 = inlined_call_operand.vmem [shape: f32[4,1], index: 2, kind: input, shape index: {}]   ;;  %s1306_s3 = inlined_call_operand.vmem [shape: f32[4,2048], index: 3, kind: output, shape index: {}]  }
   0x1   :  { %v16_v0 = vld [vmem:[%s1303_s1] sm:$0xff]  ;;  %v17_v2 = vld [vmem:[%s1303_s1 + $0x8] sm:$0xff]  ;;  %539 = vmatprep.mubr.bf16.mxu0 %v993_v3  ;;  %580 = vmatprep.mubr.bf16.mxu1 %v993_v3  ;;  %v18_v39 = vld [vmem:[%s1303_s1 + $0x10] sm:$0xff] }
   0x2   :  { %v24_v1 = vld [vmem:[%s1303_s1 + $0x40] sm:$0xff]  ;;  %v25_v5 = vld [vmem:[%s1303_s1 + $0x48] sm:$0xff]  ;;  %976 = vset.pattern.permute.xlu0 %v993_v3  ;;  %v26_v40 = vld [vmem:[%s1303_s1 + $0x50] sm:$0xff] }
   0x3   :  { %v880_v4 = vcombine.high %v16_v0, %v24_v1  ;;  %v879_v6 = vcombine.low %v16_v0, %v24_v1  ;;  %v32_v7 = vld [vmem:[%s1303_s1 + $0x80] sm:$0xff]  ;;  %v882_v9 = vcombine.high %v17_v2, %v25_v5  ;;  %v881_v10 = vcombine.low %v17_v2, %v25_v5  ;;  %v33_v12 = vld [vmem:[%s1303_s1 + $0x88] sm:$0xff]  ;;  %v19_v41 = vld [vmem:[%s1303_s1 + $0x18] sm:$0xff] }
   0x4   :  { %v40_v8 = vld [vmem:[%s1303_s1 + $0xc0] sm:$0xff]  ;;  %v41_v13 = vld [vmem:[%s1303_s1 + $0xc8] sm:$0xff]  ;;  %v27_v42 = vld [vmem:[%s1303_s1 + $0x58] sm:$0xff]  ;;  %v884_v44 = vcombine.high %v18_v39, %v26_v40  ;;  %v883_v52 = vcombine.low %v18_v39, %v26_v40 }
   0x5   :  { %v896_v11 = vcombine.high %v32_v7, %v40_v8  ;;  %v48_v14 = vld [vmem:[%s1303_s1 + $0x100] sm:$0xff]  ;;  %507 = vmatprep.subr.bf16.mxu0 %v880_v4  ;;  %v898_v15 = vcombine.high %v33_v12, %v41_v13  ;;  %v49_v17 = vld [vmem:[%s1303_s1 + $0x108] sm:$0xff]  ;;  %548 = vmatprep.subr.bf16.mxu1 %v882_v9  ;;  %v895_v19 = vcombine.low %v32_v7, %v40_v8  ;;  %v34_v47 = vld [vmem:[%s1303_s1 + $0x90] sm:$0xff] }
   0x6   :  { %v56_v16 = vld [vmem:[%s1303_s1 + $0x140] sm:$0xff]  ;;  %v57_v18 = vld [vmem:[%s1303_s1 + $0x148] sm:$0xff]  ;;  %508 = vmatpush1.bf16.msra.mxu0 %v879_v6  ;;  %549 = vmatpush1.bf16.msra.mxu1 %v881_v10  ;;  %v897_v20 = vcombine.low %v33_v12, %v41_v13  ;;  %v886_v46 = vcombine.high %v19_v41, %v27_v42  ;;  %v42_v48 = vld [vmem:[%s1303_s1 + $0xd0] sm:$0xff]  ;;  %v885_v53 = vcombine.low %v19_v41, %v27_v42 }
   0x7   :  { %509 = vmatprep.subr.bf16.mxu0 %v896_v11  ;;  %v912_v21 = vcombine.high %v48_v14, %v56_v16  ;;  %550 = vmatprep.subr.bf16.mxu1 %v898_v15  ;;  %v914_v22 = vcombine.high %v49_v17, %v57_v18  ;;  %v64_v23 = vld [vmem:[%s1303_s1 + $0x180] sm:$0xff]  ;;  %v65_v25 = vld [vmem:[%s1303_s1 + $0x188] sm:$0xff]  ;;  %v911_v27 = vcombine.low %v48_v14, %v56_v16  ;;  %v35_v49 = vld [vmem:[%s1303_s1 + $0x98] sm:$0xff] }
   0x8   :  { %v72_v24 = vld [vmem:[%s1303_s1 + $0x1c0] sm:$0xff]  ;;  %v73_v26 = vld [vmem:[%s1303_s1 + $0x1c8] sm:$0xff]  ;;  %v913_v28 = vcombine.low %v49_v17, %v57_v18  ;;  %v43_v50 = vld [vmem:[%s1303_s1 + $0xd8] sm:$0xff]  ;;  %v900_v54 = vcombine.high %v34_v47, %v42_v48  ;;  %v899_v60 = vcombine.low %v34_v47, %v42_v48 }
   0x9   :  { %v928_v29 = vcombine.high %v64_v23, %v72_v24  ;;  %v930_v30 = vcombine.high %v65_v25, %v73_v26  ;;  %v80_v31 = vld [vmem:[%s1303_s1 + $0x200] sm:$0xff]  ;;  %v81_v32 = vld [vmem:[%s1303_s1 + $0x208] sm:$0xff]  ;;  %v927_v33 = vcombine.low %v64_v23, %v72_v24  ;;  %v929_v34 = vcombine.low %v65_v25, %v73_v26  ;;  %v50_v56 = vld [vmem:[%s1303_s1 + $0x110] sm:$0xff] }
   0xa   :  { %510 = vmatpush1.bf16.msra.mxu0 %v895_v19  ;;  %551 = vmatpush1.bf16.msra.mxu1 %v897_v20  ;;  %v944_v35 = vcombine.high %v80_v31, %v80_v31  ;;  %v943_v36 = vcombine.low %v80_v31, %v80_v31  ;;  %v946_v37 = vcombine.high %v81_v32, %v81_v32  ;;  %v1102_v51 = vld [vmem:[%s1304_s0] sm:$0x3]  ;;  %v58_v57 = vld [vmem:[%s1303_s1 + $0x150] sm:$0xff]  ;;  %v51_v58 = vld [vmem:[%s1303_s1 + $0x118] sm:$0xff] }
   0xb   :  { %511 = vmatprep.subr.bf16.mxu0 %v912_v21  ;;  %552 = vmatprep.subr.bf16.mxu1 %v914_v22  ;;  %v945_v38 = vcombine.low %v81_v32, %v81_v32  ;;  %v902_v55 = vcombine.high %v35_v49, %v43_v50  ;;  %v59_v59 = vld [vmem:[%s1303_s1 + $0x158] sm:$0xff]  ;;  %v88_v61 = vld [vmem:[%s1305_s2] sm:$0xf]  ;;  %v901_v62 = vcombine.low %v35_v49, %v43_v50  ;;  %v66_v1 = vld [vmem:[%s1303_s1 + $0x190] sm:$0xff] }
   0xc   :  { %v460_v43 = vsel %vm458_vm0, %v943_v36, 0  ;;  %v916_v63 = vcombine.high %v50_v56, %v58_v57  ;;  %v918_v0 = vcombine.high %v51_v58, %v59_v59  ;;  %v74_v2 = vld [vmem:[%s1303_s1 + $0x1d0] sm:$0xff]  ;;  %v67_v4 = vld [vmem:[%s1303_s1 + $0x198] sm:$0xff]  ;;  %91 = vperm.xlu0 %976, %v88_v61   ;;  %v915_v6 = vcombine.low %v50_v56, %v58_v57  ;;  %v20_v18 = vld [vmem:[%s1303_s1 + $0x20] sm:$0xff] }
   0xd   :  { %v466_v45 = vsel %vm458_vm0, %v945_v38, 0  ;;  %v75_v5 = vld [vmem:[%s1303_s1 + $0x1d8] sm:$0xff]  ;;  %v917_v7 = vcombine.low %v51_v58, %v59_v59  ;;  %v932_v8 = vcombine.high %v66_v1, %v74_v2  ;;  %v82_v10 = vld [vmem:[%s1303_s1 + $0x210] sm:$0xff]  ;;  %v931_v12 = vcombine.low %v66_v1, %v74_v2  ;;  %v28_v19 = vld [vmem:[%s1303_s1 + $0x60] sm:$0xff] }
   0xe   :  { %512 = vmatpush1.bf16.msra.mxu0 %v911_v27  ;;  %553 = vmatpush1.bf16.msra.mxu1 %v913_v28  ;;  %v934_v9 = vcombine.high %v67_v4, %v75_v5  ;;  %v83_v11 = vld [vmem:[%s1303_s1 + $0x218] sm:$0xff]  ;;  %v933_v13 = vcombine.low %v67_v4, %v75_v5  ;;  %v948_v14 = vcombine.high %v82_v10, %v82_v10  ;;  %v21_v20 = vld [vmem:[%s1303_s1 + $0x28] sm:$0xff]  ;;  %v36_v26 = vld [vmem:[%s1303_s1 + $0xa0] sm:$0xff] }
   0xf   :  { %513 = vmatprep.subr.bf16.mxu0 %v928_v29  ;;  %554 = vmatprep.subr.bf16.mxu1 %v930_v30  ;;  %v947_v15 = vcombine.low %v82_v10, %v82_v10  ;;  %v950_v16 = vcombine.high %v83_v11, %v83_v11  ;;  %v949_v17 = vcombine.low %v83_v11, %v83_v11  ;;  %v29_v21 = vld [vmem:[%s1303_s1 + $0x68] sm:$0xff]  ;;  %v44_v27 = vld [vmem:[%s1303_s1 + $0xe0] sm:$0xff]  ;;  %v22_v59 = vld [vmem:[%s1303_s1 + $0x30] sm:$0xff] }
  0x10   :  { %v888_v23 = vcombine.high %v20_v18, %v28_v19  ;;  %v890_v25 = vcombine.high %v21_v20, %v29_v21  ;;  %v37_v28 = vld [vmem:[%s1303_s1 + $0xa8] sm:$0xff]  ;;  %v887_v30 = vcombine.low %v20_v18, %v28_v19  ;;  %v889_v31 = vcombine.low %v21_v20, %v29_v21  ;;  %v68_v42 = vld [vmem:[%s1303_s1 + $0x1a0] sm:$0xff]  ;;  %v23_v61 = vld [vmem:[%s1303_s1 + $0x38] sm:$0xff] }
  0x11   :  { %v472_v22 = vsel %vm458_vm0, %v947_v15, 0  ;;  %v478_v24 = vsel %vm458_vm0, %v949_v17, 0  ;;  %v45_v29 = vld [vmem:[%s1303_s1 + $0xe8] sm:$0xff]  ;;  %v904_v32 = vcombine.high %v36_v26, %v44_v27  ;;  %v903_v38 = vcombine.low %v36_v26, %v44_v27  ;;  %v84_v50 = vld [vmem:[%s1303_s1 + $0x220] sm:$0xff]  ;;  %v38_v4 = vld [vmem:[%s1303_s1 + $0xb0] sm:$0xff] }
  0x12   :  { %514 = vmatpush1.bf16.msra.mxu0 %v927_v33  ;;  %555 = vmatpush1.bf16.msra.mxu1 %v929_v34  ;;  %v906_v33 = vcombine.high %v37_v28, %v45_v29  ;;  %v52_v34 = vld [vmem:[%s1303_s1 + $0x120] sm:$0xff]  ;;  %v53_v36 = vld [vmem:[%s1303_s1 + $0x128] sm:$0xff]  ;;  %v905_v39 = vcombine.low %v37_v28, %v45_v29  ;;  %v951_v56 = vcombine.low %v84_v50, %v84_v50  ;;  %v46_v5 = vld [vmem:[%s1303_s1 + $0xf0] sm:$0xff] }
  0x13   :  { %959 = vmatprep.subr.msk.bf16.mxu0 %vm458_vm0, %v944_v35  ;;  %961 = vmatprep.subr.msk.bf16.mxu1 %vm458_vm0, %v946_v37  ;;  %v60_v35 = vld [vmem:[%s1303_s1 + $0x160] sm:$0xff]  ;;  %v61_v37 = vld [vmem:[%s1303_s1 + $0x168] sm:$0xff]  ;;  %v908_v10 = vcombine.high %v38_v4, %v46_v5  ;;  %v63_v15 = vld [vmem:[%s1303_s1 + $0x178] sm:$0xff] }
  0x14   :  { %v920_v40 = vcombine.high %v52_v34, %v60_v35  ;;  %v922_v41 = vcombine.high %v53_v36, %v61_v37  ;;  %v921_v47 = vcombine.low %v53_v36, %v61_v37  ;;  %v70_v20 = vld [vmem:[%s1303_s1 + $0x1b0] sm:$0xff]  ;;  %v87_v29 = vld [vmem:[%s1303_s1 + $0x238] sm:$0xff] }
  0x15   :  { %v78_v21 = vld [vmem:[%s1303_s1 + $0x1f0] sm:$0xff] }
  0x16   :  { %516 = vmatpush1.bf16.msra.mxu0 %v460_v43  ;;  %557 = vmatpush1.bf16.msra.mxu1 %v466_v45  ;;  %v76_v43 = vld [vmem:[%s1303_s1 + $0x1e0] sm:$0xff]  ;;  %v77_v45 = vld [vmem:[%s1303_s1 + $0x1e8] sm:$0xff]  ;;  %v940_v26 = vcombine.high %v70_v20, %v78_v21  ;;  %v86_v28 = vld [vmem:[%s1303_s1 + $0x230] sm:$0xff] }
  0x17   :  { %589 = vmatprep.subr.bf16.mxu0 %v884_v44  ;;  %630 = vmatprep.subr.bf16.mxu1 %v886_v46  ;;  %v69_v44 = vld [vmem:[%s1303_s1 + $0x1a8] sm:$0xff]  ;;  %v919_v46 = vcombine.low %v52_v34, %v60_v35  ;;  %v936_v48 = vcombine.high %v68_v42, %v76_v43  ;;  %v957_v34 = vcombine.low %v87_v29, %v87_v29 }
  0x18   :  { %v938_v49 = vcombine.high %v69_v44, %v77_v45 }
  0x19   :  { %960 = vmatmul.mubr.msk.bf16.vlgmr.msra.gmra.mrb[0].mxu0 %vm454_vm1, %v1102_v51  ;;  %962 = vmatmul.mubr.msk.bf16.vlgmr.msra.gmra.mrb[0].mxu1 %vm454_vm1, %v1102_v51  ;;  %v502_v36 = vsel %vm458_vm0, %v957_v34, 0 }
  0x1a   :  { %590 = vmatpush1.bf16.msra.mxu0 %v883_v52  ;;  %631 = vmatpush1.bf16.msra.mxu1 %v885_v53  ;;  %v85_v52 = vld [vmem:[%s1303_s1 + $0x228] sm:$0xff]  ;;  %v935_v53 = vcombine.low %v68_v42, %v76_v43 }
  0x1b   :  { %591 = vmatprep.subr.bf16.mxu0 %v900_v54  ;;  %632 = vmatprep.subr.bf16.mxu1 %v902_v55  ;;  %v937_v54 = vcombine.low %v69_v44, %v77_v45  ;;  %v952_v55 = vcombine.high %v84_v50, %v84_v50  ;;  %v954_v57 = vcombine.high %v85_v52, %v85_v52 }
  0x1c   :  { %621 = vmatprep.mubr.bf16.mxu0 %v993_v3  ;;  %662 = vmatprep.mubr.bf16.mxu1 %v993_v3  ;;  %v953_v58 = vcombine.low %v85_v52, %v85_v52 }
  0x1e   :  { %592 = vmatpush1.bf16.msra.mxu0 %v899_v60  ;;  %633 = vmatpush1.bf16.msra.mxu1 %v901_v62  ;;  %v30_v60 = vld [vmem:[%s1303_s1 + $0x70] sm:$0xff]  ;;  %v31_v62 = vld [vmem:[%s1303_s1 + $0x78] sm:$0xff]  ;;  %v490_v1 = vsel %vm458_vm0, %v953_v58, 0 }
  0x1f   :  { %593 = vmatprep.subr.bf16.mxu0 %v916_v63  ;;  %634 = vmatprep.subr.bf16.mxu1 %v918_v0  ;;  %v484_v63 = vsel %vm458_vm0, %v951_v56, 0  ;;  %v892_v0 = vcombine.high %v22_v59, %v30_v60  ;;  %v894_v2 = vcombine.high %v23_v61, %v31_v62 }
  0x22   :  { %594 = vmatpush1.bf16.msra.mxu0 %v915_v6  ;;  %635 = vmatpush1.bf16.msra.mxu1 %v917_v7  ;;  %v39_v6 = vld [vmem:[%s1303_s1 + $0xb8] sm:$0xff] }
  0x23   :  { %595 = vmatprep.subr.bf16.mxu0 %v932_v8  ;;  %636 = vmatprep.subr.bf16.mxu1 %v934_v9  ;;  %v47_v7 = vld [vmem:[%s1303_s1 + $0xf8] sm:$0xff]  ;;  %v891_v8 = vcombine.low %v22_v59, %v30_v60  ;;  %v893_v9 = vcombine.low %v23_v61, %v31_v62 }
  0x24   :  { %v910_v11 = vcombine.high %v39_v6, %v47_v7  ;;  %v909_v17 = vcombine.low %v39_v6, %v47_v7 }
  0x26   :  { %596 = vmatpush1.bf16.msra.mxu0 %v931_v12  ;;  %637 = vmatpush1.bf16.msra.mxu1 %v933_v13  ;;  %v54_v12 = vld [vmem:[%s1303_s1 + $0x130] sm:$0xff] }
  0x27   :  { %963 = vmatprep.subr.msk.bf16.mxu0 %vm458_vm0, %v948_v14  ;;  %965 = vmatprep.subr.msk.bf16.mxu1 %vm458_vm0, %v950_v16  ;;  %v62_v13 = vld [vmem:[%s1303_s1 + $0x170] sm:$0xff]  ;;  %v55_v14 = vld [vmem:[%s1303_s1 + $0x138] sm:$0xff]  ;;  %v907_v16 = vcombine.low %v38_v4, %v46_v5 }
  0x28   :  { %v924_v18 = vcombine.high %v54_v12, %v62_v13  ;;  %v926_v19 = vcombine.high %v55_v14, %v63_v15 }
  0x2a   :  { %598 = vmatpush1.bf16.msra.mxu0 %v472_v22  ;;  %639 = vmatpush1.bf16.msra.mxu1 %v478_v24  ;;  %v71_v22 = vld [vmem:[%s1303_s1 + $0x1b8] sm:$0xff]  ;;  %v923_v24 = vcombine.low %v54_v12, %v62_v13 }
  0x2b   :  { %671 = vmatprep.subr.bf16.mxu0 %v888_v23  ;;  %712 = vmatprep.subr.bf16.mxu1 %v890_v25  ;;  %v79_v23 = vld [vmem:[%s1303_s1 + $0x1f8] sm:$0xff]  ;;  %v925_v25 = vcombine.low %v55_v14, %v63_v15 }
  0x2c   :  { %v942_v27 = vcombine.high %v71_v22, %v79_v23 }
  0x2d   :  { %964 = vmatmul.mubr.msk.bf16.vlgmr.msra.gmra.mrb[4].mxu0 %vm454_vm1, %v1102_v51  ;;  %966 = vmatmul.mubr.msk.bf16.vlgmr.msra.gmra.mrb[4].mxu1 %vm454_vm1, %v1102_v51 }
  0x2e   :  { %672 = vmatpush1.bf16.msra.mxu0 %v887_v30  ;;  %713 = vmatpush1.bf16.msra.mxu1 %v889_v31  ;;  %v939_v30 = vcombine.low %v70_v20, %v78_v21  ;;  %v956_v31 = vcombine.high %v86_v28, %v86_v28 }
  0x2f   :  { %673 = vmatprep.subr.bf16.mxu0 %v904_v32  ;;  %714 = vmatprep.subr.bf16.mxu1 %v906_v33  ;;  %v955_v32 = vcombine.low %v86_v28, %v86_v28  ;;  %v958_v33 = vcombine.high %v87_v29, %v87_v29 }
  0x30   :  { %703 = vmatprep.mubr.bf16.mxu0 %v993_v3  ;;  %744 = vmatprep.mubr.bf16.mxu1 %v993_v3 }
  0x31   :  { %v496_v35 = vsel %vm458_vm0, %v955_v32, 0 }
  0x32   :  { %674 = vmatpush1.bf16.msra.mxu0 %v903_v38  ;;  %715 = vmatpush1.bf16.msra.mxu1 %v905_v39 }
  0x33   :  { %675 = vmatprep.subr.bf16.mxu0 %v920_v40  ;;  %716 = vmatprep.subr.bf16.mxu1 %v922_v41 }
  0x36   :  { %676 = vmatpush1.bf16.msra.mxu0 %v919_v46  ;;  %717 = vmatpush1.bf16.msra.mxu1 %v921_v47 }
  0x37   :  { %677 = vmatprep.subr.bf16.mxu0 %v936_v48  ;;  %718 = vmatprep.subr.bf16.mxu1 %v938_v49 }
  0x3a   :  { %678 = vmatpush1.bf16.msra.mxu0 %v935_v53  ;;  %719 = vmatpush1.bf16.msra.mxu1 %v937_v54 }
  0x3b   :  { %967 = vmatprep.subr.msk.bf16.mxu0 %vm458_vm0, %v952_v55  ;;  %969 = vmatprep.subr.msk.bf16.mxu1 %vm458_vm0, %v954_v57 }
  0x3e   :  { %680 = vmatpush1.bf16.msra.mxu0 %v484_v63  ;;  %721 = vmatpush1.bf16.msra.mxu1 %v490_v1 }
  0x3f   :  { %753 = vmatprep.subr.bf16.mxu0 %v892_v0  ;;  %794 = vmatprep.subr.bf16.mxu1 %v894_v2 }
  0x41   :  { %968 = vmatmul.mubr.msk.bf16.vlgmr.msra.gmra.mrb[8].mxu0 %vm454_vm1, %v1102_v51  ;;  %970 = vmatmul.mubr.msk.bf16.vlgmr.msra.gmra.mrb[8].mxu1 %vm454_vm1, %v1102_v51 }
  0x42   :  { %754 = vmatpush1.bf16.msra.mxu0 %v891_v8  ;;  %795 = vmatpush1.bf16.msra.mxu1 %v893_v9 }
  0x43   :  { %755 = vmatprep.subr.bf16.mxu0 %v908_v10  ;;  %796 = vmatprep.subr.bf16.mxu1 %v910_v11 }
  0x44   :  { %785 = vmatprep.mubr.bf16.mxu0 %v993_v3  ;;  %826 = vmatprep.mubr.bf16.mxu1 %v993_v3  ;;  %v941_v3 = vcombine.low %v71_v22, %v79_v23 }
  0x46   :  { %756 = vmatpush1.bf16.msra.mxu0 %v907_v16  ;;  %797 = vmatpush1.bf16.msra.mxu1 %v909_v17 }
  0x47   :  { %757 = vmatprep.subr.bf16.mxu0 %v924_v18  ;;  %798 = vmatprep.subr.bf16.mxu1 %v926_v19 }
  0x4a   :  { %758 = vmatpush1.bf16.msra.mxu0 %v923_v24  ;;  %799 = vmatpush1.bf16.msra.mxu1 %v925_v25 }
  0x4b   :  { %759 = vmatprep.subr.bf16.mxu0 %v940_v26  ;;  %800 = vmatprep.subr.bf16.mxu1 %v942_v27 }
  0x4e   :  { %760 = vmatpush1.bf16.msra.mxu0 %v939_v30  ;;  %801 = vmatpush1.bf16.msra.mxu1 %v941_v3 }
  0x4f   :  { %971 = vmatprep.subr.msk.bf16.mxu0 %vm458_vm0, %v956_v31  ;;  %973 = vmatprep.subr.msk.bf16.mxu1 %vm458_vm0, %v958_v33 }
  0x52   :  { %762 = vmatpush1.bf16.msra.mxu0 %v496_v35  ;;  %803 = vmatpush1.bf16.msra.mxu1 %v502_v36 }
  0x55   :  { %972 = vmatmul.mubr.msk.bf16.vlgmr.msra.gmra.mrb[12].mxu0 %vm454_vm1, %v1102_v51  ;;  %974 = vmatmul.mubr.msk.bf16.vlgmr.msra.gmra.mrb[12].mxu1 %vm454_vm1, %v1102_v51 }
  0x8b   :  { %v92_v37 = vpop.permute.xlu0 %91 }
  0xec   :  { %v541_v38 = vpop.f32.mrb[0].mxu0  ;;  %v582_v39 = vpop.f32.mrb[0].mxu1 }
  0xed   :  { %v542_v40 = vadd.f32 %v541_v38, %v92_v37  ;;  %v543_v41 = vpop.f32.mrb[1].mxu0  ;;  %v583_v43 = vadd.f32 %v582_v39, %v92_v37  ;;  %v584_v44 = vpop.f32.mrb[1].mxu1 }
  0xee   :  { %v544_v42 = vadd.f32 %v543_v41, %v92_v37  ;;  %v545_v45 = vpop.f32.mrb[2].mxu0  ;;  %v585_v46 = vadd.f32 %v584_v44, %v92_v37  ;;  %v586_v47 = vpop.f32.mrb[2].mxu1 }
  0xef   :  { %v546_v48 = vpop.f32.mrb[3].mxu0  ;;  %v587_v50 = vpop.f32.mrb[3].mxu1 }
  0xf0   :  { %v851_v49 = vcombine.low %v542_v40, %v544_v42  ;;  %v852_v52 = vcombine.low %v583_v43, %v585_v46 }
  0xf2   :  { %867 = vst [vmem:[%s1306_s3] sm:$0xff] %v851_v49  ;;  %868 = vst [vmem:[%s1306_s3 + $0x8] sm:$0xff] %v852_v52 }
 0x100   :  { %v623_v51 = vpop.f32.mrb[4].mxu0  ;;  %v664_v54 = vpop.f32.mrb[4].mxu1 }
 0x101   :  { %v624_v53 = vadd.f32 %v623_v51, %v92_v37  ;;  %v625_v55 = vpop.f32.mrb[5].mxu0  ;;  %v665_v56 = vadd.f32 %v664_v54, %v92_v37  ;;  %v666_v58 = vpop.f32.mrb[5].mxu1 }
 0x102   :  { %v626_v57 = vadd.f32 %v625_v55, %v92_v37  ;;  %v627_v59 = vpop.f32.mrb[6].mxu0  ;;  %v667_v60 = vadd.f32 %v666_v58, %v92_v37  ;;  %v668_v61 = vpop.f32.mrb[6].mxu1 }
 0x103   :  { %v628_v62 = vpop.f32.mrb[7].mxu0  ;;  %v669_v0 = vpop.f32.mrb[7].mxu1 }
 0x104   :  { %v853_v63 = vcombine.low %v624_v53, %v626_v57  ;;  %v854_v1 = vcombine.low %v665_v56, %v667_v60 }
 0x106   :  { %869 = vst [vmem:[%s1306_s3 + $0x10] sm:$0xff] %v853_v63  ;;  %870 = vst [vmem:[%s1306_s3 + $0x18] sm:$0xff] %v854_v1 }
 0x114   :  { %v705_v2 = vpop.f32.mrb[8].mxu0  ;;  %v746_v5 = vpop.f32.mrb[8].mxu1 }
 0x115   :  { %v706_v4 = vadd.f32 %v705_v2, %v92_v37  ;;  %v707_v6 = vpop.f32.mrb[9].mxu0  ;;  %v747_v7 = vadd.f32 %v746_v5, %v92_v37  ;;  %v748_v9 = vpop.f32.mrb[9].mxu1 }
 0x116   :  { %v708_v8 = vadd.f32 %v707_v6, %v92_v37  ;;  %v709_v10 = vpop.f32.mrb[10].mxu0  ;;  %v749_v11 = vadd.f32 %v748_v9, %v92_v37  ;;  %v750_v12 = vpop.f32.mrb[10].mxu1 }
 0x117   :  { %v710_v13 = vpop.f32.mrb[11].mxu0  ;;  %v751_v15 = vpop.f32.mrb[11].mxu1 }
 0x118   :  { %v855_v14 = vcombine.low %v706_v4, %v708_v8  ;;  %v856_v16 = vcombine.low %v747_v7, %v749_v11 }
 0x11a   :  { %871 = vst [vmem:[%s1306_s3 + $0x20] sm:$0xff] %v855_v14  ;;  %872 = vst [vmem:[%s1306_s3 + $0x28] sm:$0xff] %v856_v16 }
 0x128   :  { %v787_v17 = vpop.f32.mrb[12].mxu0  ;;  %v828_v19 = vpop.f32.mrb[12].mxu1 }
 0x129   :  { %v788_v18 = vadd.f32 %v787_v17, %v92_v37  ;;  %v789_v20 = vpop.f32.mrb[13].mxu0  ;;  %v829_v21 = vadd.f32 %v828_v19, %v92_v37  ;;  %v830_v23 = vpop.f32.mrb[13].mxu1 }
 0x12a   :  { %v790_v22 = vadd.f32 %v789_v20, %v92_v37  ;;  %v791_v24 = vpop.f32.mrb[14].mxu0  ;;  %v831_v25 = vadd.f32 %v830_v23, %v92_v37  ;;  %v832_v26 = vpop.f32.mrb[14].mxu1 }
 0x12b   :  { %v792_v27 = vpop.f32.mrb[15].mxu0  ;;  %v833_v29 = vpop.f32.mrb[15].mxu1 }
 0x12c   :  { %v857_v28 = vcombine.low %v788_v18, %v790_v22  ;;  %v858_v30 = vcombine.low %v829_v21, %v831_v25 }
 0x12e   :  { %873 = vst [vmem:[%s1306_s3 + $0x30] sm:$0xff] %v857_v28  ;;  %874 = vst [vmem:[%s1306_s3 + $0x38] sm:$0xff] %v858_v30 }

</bundles_post_ra>
